<compile_context>
chip_gen: v5e
topology: v5e:2x2
jax: 0.10.0
libtpu: 0.0.40
codegen_flags: <defaults>
</compile_context>

<pallas_src>
import functools

import jax
import jax.numpy as jnp
from jax.experimental import pallas as pl
from jax.experimental.pallas import tpu as pltpu


# ----------------------------- Pallas kernel ------------------------------- #

def _basic_block_kernel(x_ref, mask_ref, w1_ref, b1_ref, w2_ref, b2_ref,
                        o_ref, out1_ref, *, TH, Wp, Gx, Gs, mm_dtype):
    """One (image, row-band) step of the fused BasicBlock.

    x_ref    : (Lg, C)   zero-padded, row-flattened image + zero guard rows
    mask_ref : (L, 1)    1.0 at interior positions of the padded-flat domain
    w1_ref   : (9, C, C) conv1 weights per tap (kh, kw), BN1 scale folded in
    b1_ref   : (1, C)    folded BN1 bias
    w2_ref   : (9, C, C) conv2 weights per tap, BN2 scale folded in
    b2_ref   : (1, C)    folded BN2 bias
    o_ref    : (TH*Wp, C)             this band's output rows (padded-flat cols)
    out1_ref : (2*Gs + (TH+2)*Wp, C)  VMEM scratch for the intermediate out1
    """
    C = o_ref.shape[-1]
    span1 = (TH + 2) * Wp      # out1 rows needed by this band (incl. conv2 halo)
    span2 = TH * Wp            # output rows produced by this band
    taps = [dy * Wp + dx for dy in (-1, 0, 1) for dx in (-1, 0, 1)]

    # Band start in padded-flat coordinates (TH*Wp is a multiple of 8).
    base = pl.multiple_of(pl.program_id(1) * span2, 8)

    # ---- conv1 (BN1 scale pre-folded) + bias + ReLU, zeroed at pad positions --
    acc1 = jnp.zeros((span1, C), jnp.float32)
    for k, s in enumerate(taps):
        xs = x_ref[pl.ds(base + (Gx + s), span1), :].astype(mm_dtype)
        acc1 = acc1 + jnp.dot(xs, w1_ref[k].astype(mm_dtype),
                              preferred_element_type=jnp.float32)
    interior = mask_ref[pl.ds(base, span1), :]
    out1 = jnp.maximum(acc1 + b1_ref[...], 0.0) * interior

    # Stash out1 in VMEM; zero guard rows act as conv2's zero padding.
    zeros_g = jnp.zeros((Gs, C), out1_ref.dtype)
    out1_ref[pl.ds(0, Gs), :] = zeros_g
    out1_ref[pl.ds(Gs + span1, Gs), :] = zeros_g
    out1_ref[pl.ds(Gs, span1), :] = out1.astype(out1_ref.dtype)

    # ---- conv2 (BN2 scale pre-folded) + bias + residual add + ReLU ------------
    acc2 = jnp.zeros((span2, C), jnp.float32)
    for k, s in enumerate(taps):
        ys = out1_ref[Gs + Wp + s:Gs + Wp + s + span2, :].astype(mm_dtype)
        acc2 = acc2 + jnp.dot(ys, w2_ref[k].astype(mm_dtype),
                              preferred_element_type=jnp.float32)
    res = x_ref[pl.ds(base + (Gx + Wp), span2), :].astype(jnp.float32)
    o_ref[...] = jnp.maximum(acc2 + b2_ref[...] + res, 0.0).astype(o_ref.dtype)


# ------------------------------- JAX glue ----------------------------------- #

def _bn_fold(gamma, beta, mean, var, eps=1e-5):
    scale = gamma / jnp.sqrt(var + eps)
    bias = beta - mean * scale
    return scale, bias


def _prep_weight(w_oihw, scale):
    """(Cout, Cin, 3, 3) torch layout -> (9, Cin, Cout) per-tap, BN scale folded."""
    w = jnp.transpose(w_oihw, (2, 3, 1, 0)) * scale[None, None, None, :]  # (3,3,Ci,Co)
    return w.reshape(9, w.shape[2], w.shape[3])


def basic_block_forward(x_nchw, params, *, row_tile=8, matmul_dtype=jnp.float32):
    N, C, H, W = x_nchw.shape
    Hp, Wp = H + 2, W + 2
    L = Hp * Wp                                   # padded-flat spatial length
    TH = row_tile if (H % row_tile == 0) else H   # output rows per grid step
    nT = H // TH
    Gx = ((Wp + 1 + 7) // 8) * 8                  # zero guard around the flat slab
    Gs = 8                                        # zero guard in the out1 scratch
    span1 = (TH + 2) * Wp
    span2 = TH * Wp
    Lg = L + 2 * Gx

    # --- HBM-side prep (cheap glue: ~1.3x pad, no 9x im2col) -------------------
    x_nhwc = jnp.transpose(x_nchw, (0, 2, 3, 1))
    x_flat = jnp.pad(x_nhwc, ((0, 0), (1, 1), (1, 1), (0, 0))).reshape(N, L, C)
    x_guard = jnp.pad(x_flat, ((0, 0), (Gx, Gx), (0, 0)))

    # interior-position mask over the padded-flat domain (shared by all images)
    row_ok = jnp.pad(jnp.ones((H,), jnp.float32), (1, 1))
    col_ok = jnp.pad(jnp.ones((W,), jnp.float32), (1, 1))
    mask = (row_ok[:, None] * col_ok[None, :]).reshape(L, 1)

    # fold BN (inference) scale into the conv weights; keep the bias separate
    s1, b1 = _bn_fold(params["g1"], params["b1"], params["m1"], params["v1"])
    s2, b2 = _bn_fold(params["g2"], params["b2"], params["m2"], params["v2"])
    w1s = _prep_weight(params["w1"], s1)
    w2s = _prep_weight(params["w2"], s2)
    b1 = b1.reshape(1, C).astype(jnp.float32)
    b2 = b2.reshape(1, C).astype(jnp.float32)

    kernel = functools.partial(_basic_block_kernel, TH=TH, Wp=Wp, Gx=Gx, Gs=Gs,
                               mm_dtype=matmul_dtype)

    out_flat = pl.pallas_call(
        kernel,
        grid=(N, nT),
        in_specs=[
            # x slab: block index constant in t -> one DMA per image (None == squeezed dim)
            pl.BlockSpec((None, Lg, C), lambda n, t: (n, 0, 0)),
            pl.BlockSpec((L, 1), lambda n, t: (0, 0)),          # interior mask
            pl.BlockSpec((9, C, C), lambda n, t: (0, 0, 0)),    # w1 (scale folded)
            pl.BlockSpec((1, C), lambda n, t: (0, 0)),          # b1
            pl.BlockSpec((9, C, C), lambda n, t: (0, 0, 0)),    # w2 (scale folded)
            pl.BlockSpec((1, C), lambda n, t: (0, 0)),          # b2
        ],
        out_specs=pl.BlockSpec((None, span2, C), lambda n, t: (n, t, 0)),
        out_shape=jax.ShapeDtypeStruct((N, H * Wp, C), x_nchw.dtype),
        scratch_shapes=[pltpu.VMEM((2 * Gs + span1, C), jnp.float32)],
        compiler_params=pltpu.CompilerParams(
            dimension_semantics=("parallel", "parallel")),
    )(x_guard, mask, w1s, b1, w2s, b2)

    # drop the width padding columns and return NCHW
    # TODO(synk): downsampling shortcut (stride != 1 / channel change: 1x1 conv + BN)
    # is not implemented; this block uses the identity shortcut path.
    out = out_flat.reshape(N, H, Wp, C)[:, :, 1:W + 1, :]
    return jnp.transpose(out, (0, 3, 1, 2))


# --------------------------- reference (pure JAX) --------------------------- #

def _reference(x, p, eps=1e-5):
    def conv(a, w):
        return jax.lax.conv_general_dilated(
            a, w, (1, 1), ((1, 1), (1, 1)),
            dimension_numbers=("NCHW", "OIHW", "NCHW"))

    def bn(a, g, b, m, v):
        g, b, m, v = (t[None, :, None, None] for t in (g, b, m, v))
        return (a - m) / jnp.sqrt(v + eps) * g + b

    out = jax.nn.relu(bn(conv(x, p["w1"]), p["g1"], p["b1"], p["m1"], p["v1"]))
    out = bn(conv(out, p["w2"]), p["g2"], p["b2"], p["m2"], p["v2"])
    out = out + x                                    # identity shortcut
    return jax.nn.relu(out)


# ----------------------------------- main ----------------------------------- #

if __name__ == "__main__":
    N, C, H, W = 2, 4, 16, 16
    key = jax.random.PRNGKey(0)
    ks = jax.random.split(key, 11)

    x = jax.random.normal(ks[0], (N, C, H, W), jnp.float32)

    params = {
        # conv weights in PyTorch OIHW layout, no bias (CIFAR ResNet convs)
        "w1": 0.1 * jax.random.normal(ks[1], (C, C, 3, 3), jnp.float32),
        "w2": 0.1 * jax.random.normal(ks[2], (C, C, 3, 3), jnp.float32),
        # BatchNorm2d params + running stats (inference mode)
        "g1": jax.random.uniform(ks[3], (C,), jnp.float32, 0.5, 1.5),
        "b1": 0.1 * jax.random.normal(ks[4], (C,), jnp.float32),
        "m1": 0.1 * jax.random.normal(ks[5], (C,), jnp.float32),
        "v1": jax.random.uniform(ks[6], (C,), jnp.float32, 0.5, 1.5),
        "g2": jax.random.uniform(ks[7], (C,), jnp.float32, 0.5, 1.5),
        "b2": 0.1 * jax.random.normal(ks[8], (C,), jnp.float32),
        "m2": 0.1 * jax.random.normal(ks[9], (C,), jnp.float32),
        "v2": jax.random.uniform(ks[10], (C,), jnp.float32, 0.5, 1.5),
    }

    ref = jax.block_until_ready(_reference(x, params))

    # multi-band grid (N, 2) and single-band grid (N, 1) paths
    for rt in (8, 16):
        out = jax.block_until_ready(basic_block_forward(x, params, row_tile=rt))
        assert out.shape == (N, C, H, W), out.shape
        assert jnp.allclose(out, ref, rtol=1e-4, atol=1e-4), (
            rt, float(jnp.max(jnp.abs(out - ref))))

    print("KERNEL_OK")
</pallas_src>

<mosaic_0001>
module attributes {stable_mosaic.version = 11 : i64} {
  func.func @_basic_block_kernel(%arg0: i32, %arg1: i32, %arg2: memref<1x372x4xf32, #tpu.memory_space<vmem>>, %arg3: memref<324x1xf32, #tpu.memory_space<vmem>>, %arg4: memref<9x4x4xf32, #tpu.memory_space<vmem>>, %arg5: memref<1x4xf32, #tpu.memory_space<vmem>>, %arg6: memref<9x4x4xf32, #tpu.memory_space<vmem>>, %arg7: memref<1x4xf32, #tpu.memory_space<vmem>>, %arg8: memref<1x144x4xf32, #tpu.memory_space<vmem>>, %arg9: memref<196x4xf32, #tpu.memory_space<vmem>>) attributes {dimension_semantics = [#tpu.dimension_semantics<parallel>, #tpu.dimension_semantics<parallel>], iteration_bounds = array<i64: 2, 2>, scalar_prefetch = 0 : i64, scratch_operands = 1 : i64, tpu.core_type = #tpu.core_type<tc>, window_params = [{transform_indices = @transform_0, window_bounds = array<i64: 1, 372, 4>}, {pipeline_mode = #tpu.pipeline_mode<synchronous>, transform_indices = @transform_1, window_bounds = array<i64: 324, 1>}, {pipeline_mode = #tpu.pipeline_mode<synchronous>, transform_indices = @transform_2, window_bounds = array<i64: 9, 4, 4>}, {pipeline_mode = #tpu.pipeline_mode<synchronous>, transform_indices = @transform_3, window_bounds = array<i64: 1, 4>}, {pipeline_mode = #tpu.pipeline_mode<synchronous>, transform_indices = @transform_4, window_bounds = array<i64: 9, 4, 4>}, {pipeline_mode = #tpu.pipeline_mode<synchronous>, transform_indices = @transform_5, window_bounds = array<i64: 1, 4>}, {transform_indices = @transform_6, window_bounds = array<i64: 1, 144, 4>}]} {
    %c144_i32 = arith.constant 144 : i32
    %0 = arith.muli %arg1, %c144_i32 : i32
    %1 = tpu.assume_multiple %0, 8 : i32
    %cst = arith.constant 0.000000e+00 : f32
    %2 = vector.broadcast %cst : f32 to vector<180x4xf32>
    %c5_i32 = arith.constant 5 : i32
    %3 = arith.addi %1, %c5_i32 : i32
    %c0 = arith.constant 0 : index
    %4 = arith.index_cast %3 : i32 to index
    %c0_0 = arith.constant 0 : index
    %5 = vector.load %arg2[%c0, %4, %c0_0] : memref<1x372x4xf32, #tpu.memory_space<vmem>>, vector<1x180x4xf32>
    %6 = vector.shape_cast %5 : vector<1x180x4xf32> to vector<180x4xf32>
    %c0_1 = arith.constant 0 : index
    %c0_2 = arith.constant 0 : index
    %c0_3 = arith.constant 0 : index
    %7 = vector.load %arg4[%c0_1, %c0_2, %c0_3] : memref<9x4x4xf32, #tpu.memory_space<vmem>>, vector<1x4x4xf32>
    %8 = vector.shape_cast %7 : vector<1x4x4xf32> to vector<4x4xf32>
    %cst_4 = arith.constant dense<0.000000e+00> : vector<180x4xf32>
    %9 = tpu.matmul %6, %8, %cst_4 {dimension_numbers = #tpu.dot_dimension_numbers<[1], [0], [0], [1], [0, 0, 1, 1], [], []>} : vector<180x4xf32>, vector<4x4xf32>, vector<180x4xf32> -> vector<180x4xf32>
    %10 = arith.addf %2, %9 : vector<180x4xf32>
    %c6_i32 = arith.constant 6 : i32
    %11 = arith.addi %1, %c6_i32 : i32
    %c0_5 = arith.constant 0 : index
    %12 = arith.index_cast %11 : i32 to index
    %c0_6 = arith.constant 0 : index
    %13 = vector.load %arg2[%c0_5, %12, %c0_6] : memref<1x372x4xf32, #tpu.memory_space<vmem>>, vector<1x180x4xf32>
    %14 = vector.shape_cast %13 : vector<1x180x4xf32> to vector<180x4xf32>
    %c1 = arith.constant 1 : index
    %c0_7 = arith.constant 0 : index
    %c0_8 = arith.constant 0 : index
    %15 = vector.load %arg4[%c1, %c0_7, %c0_8] : memref<9x4x4xf32, #tpu.memory_space<vmem>>, vector<1x4x4xf32>
    %16 = vector.shape_cast %15 : vector<1x4x4xf32> to vector<4x4xf32>
    %cst_9 = arith.constant dense<0.000000e+00> : vector<180x4xf32>
    %17 = tpu.matmul %14, %16, %cst_9 {dimension_numbers = #tpu.dot_dimension_numbers<[1], [0], [0], [1], [0, 0, 1, 1], [], []>} : vector<180x4xf32>, vector<4x4xf32>, vector<180x4xf32> -> vector<180x4xf32>
    %18 = arith.addf %10, %17 : vector<180x4xf32>
    %c7_i32 = arith.constant 7 : i32
    %19 = arith.addi %1, %c7_i32 : i32
    %c0_10 = arith.constant 0 : index
    %20 = arith.index_cast %19 : i32 to index
    %c0_11 = arith.constant 0 : index
    %21 = vector.load %arg2[%c0_10, %20, %c0_11] : memref<1x372x4xf32, #tpu.memory_space<vmem>>, vector<1x180x4xf32>
    %22 = vector.shape_cast %21 : vector<1x180x4xf32> to vector<180x4xf32>
    %c2 = arith.constant 2 : index
    %c0_12 = arith.constant 0 : index
    %c0_13 = arith.constant 0 : index
    %23 = vector.load %arg4[%c2, %c0_12, %c0_13] : memref<9x4x4xf32, #tpu.memory_space<vmem>>, vector<1x4x4xf32>
    %24 = vector.shape_cast %23 : vector<1x4x4xf32> to vector<4x4xf32>
    %cst_14 = arith.constant dense<0.000000e+00> : vector<180x4xf32>
    %25 = tpu.matmul %22, %24, %cst_14 {dimension_numbers = #tpu.dot_dimension_numbers<[1], [0], [0], [1], [0, 0, 1, 1], [], []>} : vector<180x4xf32>, vector<4x4xf32>, vector<180x4xf32> -> vector<180x4xf32>
    %26 = arith.addf %18, %25 : vector<180x4xf32>
    %c23_i32 = arith.constant 23 : i32
    %27 = arith.addi %1, %c23_i32 : i32
    %c0_15 = arith.constant 0 : index
    %28 = arith.index_cast %27 : i32 to index
    %c0_16 = arith.constant 0 : index
    %29 = vector.load %arg2[%c0_15, %28, %c0_16] : memref<1x372x4xf32, #tpu.memory_space<vmem>>, vector<1x180x4xf32>
    %30 = vector.shape_cast %29 : vector<1x180x4xf32> to vector<180x4xf32>
    %c3 = arith.constant 3 : index
    %c0_17 = arith.constant 0 : index
    %c0_18 = arith.constant 0 : index
    %31 = vector.load %arg4[%c3, %c0_17, %c0_18] : memref<9x4x4xf32, #tpu.memory_space<vmem>>, vector<1x4x4xf32>
    %32 = vector.shape_cast %31 : vector<1x4x4xf32> to vector<4x4xf32>
    %cst_19 = arith.constant dense<0.000000e+00> : vector<180x4xf32>
    %33 = tpu.matmul %30, %32, %cst_19 {dimension_numbers = #tpu.dot_dimension_numbers<[1], [0], [0], [1], [0, 0, 1, 1], [], []>} : vector<180x4xf32>, vector<4x4xf32>, vector<180x4xf32> -> vector<180x4xf32>
    %34 = arith.addf %26, %33 : vector<180x4xf32>
    %c24_i32 = arith.constant 24 : i32
    %35 = arith.addi %1, %c24_i32 : i32
    %c0_20 = arith.constant 0 : index
    %36 = arith.index_cast %35 : i32 to index
    %c0_21 = arith.constant 0 : index
    %37 = vector.load %arg2[%c0_20, %36, %c0_21] : memref<1x372x4xf32, #tpu.memory_space<vmem>>, vector<1x180x4xf32>
    %38 = vector.shape_cast %37 : vector<1x180x4xf32> to vector<180x4xf32>
    %c4 = arith.constant 4 : index
    %c0_22 = arith.constant 0 : index
    %c0_23 = arith.constant 0 : index
    %39 = vector.load %arg4[%c4, %c0_22, %c0_23] : memref<9x4x4xf32, #tpu.memory_space<vmem>>, vector<1x4x4xf32>
    %40 = vector.shape_cast %39 : vector<1x4x4xf32> to vector<4x4xf32>
    %cst_24 = arith.constant dense<0.000000e+00> : vector<180x4xf32>
    %41 = tpu.matmul %38, %40, %cst_24 {dimension_numbers = #tpu.dot_dimension_numbers<[1], [0], [0], [1], [0, 0, 1, 1], [], []>} : vector<180x4xf32>, vector<4x4xf32>, vector<180x4xf32> -> vector<180x4xf32>
    %42 = arith.addf %34, %41 : vector<180x4xf32>
    %c25_i32 = arith.constant 25 : i32
    %43 = arith.addi %1, %c25_i32 : i32
    %c0_25 = arith.constant 0 : index
    %44 = arith.index_cast %43 : i32 to index
    %c0_26 = arith.constant 0 : index
    %45 = vector.load %arg2[%c0_25, %44, %c0_26] : memref<1x372x4xf32, #tpu.memory_space<vmem>>, vector<1x180x4xf32>
    %46 = vector.shape_cast %45 : vector<1x180x4xf32> to vector<180x4xf32>
    %c5 = arith.constant 5 : index
    %c0_27 = arith.constant 0 : index
    %c0_28 = arith.constant 0 : index
    %47 = vector.load %arg4[%c5, %c0_27, %c0_28] : memref<9x4x4xf32, #tpu.memory_space<vmem>>, vector<1x4x4xf32>
    %48 = vector.shape_cast %47 : vector<1x4x4xf32> to vector<4x4xf32>
    %cst_29 = arith.constant dense<0.000000e+00> : vector<180x4xf32>
    %49 = tpu.matmul %46, %48, %cst_29 {dimension_numbers = #tpu.dot_dimension_numbers<[1], [0], [0], [1], [0, 0, 1, 1], [], []>} : vector<180x4xf32>, vector<4x4xf32>, vector<180x4xf32> -> vector<180x4xf32>
    %50 = arith.addf %42, %49 : vector<180x4xf32>
    %c41_i32 = arith.constant 41 : i32
    %51 = arith.addi %1, %c41_i32 : i32
    %c0_30 = arith.constant 0 : index
    %52 = arith.index_cast %51 : i32 to index
    %c0_31 = arith.constant 0 : index
    %53 = vector.load %arg2[%c0_30, %52, %c0_31] : memref<1x372x4xf32, #tpu.memory_space<vmem>>, vector<1x180x4xf32>
    %54 = vector.shape_cast %53 : vector<1x180x4xf32> to vector<180x4xf32>
    %c6 = arith.constant 6 : index
    %c0_32 = arith.constant 0 : index
    %c0_33 = arith.constant 0 : index
    %55 = vector.load %arg4[%c6, %c0_32, %c0_33] : memref<9x4x4xf32, #tpu.memory_space<vmem>>, vector<1x4x4xf32>
    %56 = vector.shape_cast %55 : vector<1x4x4xf32> to vector<4x4xf32>
    %cst_34 = arith.constant dense<0.000000e+00> : vector<180x4xf32>
    %57 = tpu.matmul %54, %56, %cst_34 {dimension_numbers = #tpu.dot_dimension_numbers<[1], [0], [0], [1], [0, 0, 1, 1], [], []>} : vector<180x4xf32>, vector<4x4xf32>, vector<180x4xf32> -> vector<180x4xf32>
    %58 = arith.addf %50, %57 : vector<180x4xf32>
    %c42_i32 = arith.constant 42 : i32
    %59 = arith.addi %1, %c42_i32 : i32
    %c0_35 = arith.constant 0 : index
    %60 = arith.index_cast %59 : i32 to index
    %c0_36 = arith.constant 0 : index
    %61 = vector.load %arg2[%c0_35, %60, %c0_36] : memref<1x372x4xf32, #tpu.memory_space<vmem>>, vector<1x180x4xf32>
    %62 = vector.shape_cast %61 : vector<1x180x4xf32> to vector<180x4xf32>
    %c7 = arith.constant 7 : index
    %c0_37 = arith.constant 0 : index
    %c0_38 = arith.constant 0 : index
    %63 = vector.load %arg4[%c7, %c0_37, %c0_38] : memref<9x4x4xf32, #tpu.memory_space<vmem>>, vector<1x4x4xf32>
    %64 = vector.shape_cast %63 : vector<1x4x4xf32> to vector<4x4xf32>
    %cst_39 = arith.constant dense<0.000000e+00> : vector<180x4xf32>
    %65 = tpu.matmul %62, %64, %cst_39 {dimension_numbers = #tpu.dot_dimension_numbers<[1], [0], [0], [1], [0, 0, 1, 1], [], []>} : vector<180x4xf32>, vector<4x4xf32>, vector<180x4xf32> -> vector<180x4xf32>
    %66 = arith.addf %58, %65 : vector<180x4xf32>
    %c43_i32 = arith.constant 43 : i32
    %67 = arith.addi %1, %c43_i32 : i32
    %c0_40 = arith.constant 0 : index
    %68 = arith.index_cast %67 : i32 to index
    %c0_41 = arith.constant 0 : index
    %69 = vector.load %arg2[%c0_40, %68, %c0_41] : memref<1x372x4xf32, #tpu.memory_space<vmem>>, vector<1x180x4xf32>
    %70 = vector.shape_cast %69 : vector<1x180x4xf32> to vector<180x4xf32>
    %c8 = arith.constant 8 : index
    %c0_42 = arith.constant 0 : index
    %c0_43 = arith.constant 0 : index
    %71 = vector.load %arg4[%c8, %c0_42, %c0_43] : memref<9x4x4xf32, #tpu.memory_space<vmem>>, vector<1x4x4xf32>
    %72 = vector.shape_cast %71 : vector<1x4x4xf32> to vector<4x4xf32>
    %cst_44 = arith.constant dense<0.000000e+00> : vector<180x4xf32>
    %73 = tpu.matmul %70, %72, %cst_44 {dimension_numbers = #tpu.dot_dimension_numbers<[1], [0], [0], [1], [0, 0, 1, 1], [], []>} : vector<180x4xf32>, vector<4x4xf32>, vector<180x4xf32> -> vector<180x4xf32>
    %74 = arith.addf %66, %73 : vector<180x4xf32>
    %75 = arith.index_cast %1 : i32 to index
    %c0_45 = arith.constant 0 : index
    %76 = vector.load %arg3[%75, %c0_45] : memref<324x1xf32, #tpu.memory_space<vmem>>, vector<180x1xf32>
    %c0_46 = arith.constant 0 : index
    %c0_47 = arith.constant 0 : index
    %77 = vector.load %arg5[%c0_46, %c0_47] : memref<1x4xf32, #tpu.memory_space<vmem>>, vector<1x4xf32>
    %78 = vector.broadcast %77 : vector<1x4xf32> to vector<180x4xf32>
    %79 = arith.addf %74, %78 : vector<180x4xf32>
    %cst_48 = arith.constant 0.000000e+00 : f32
    %80 = vector.broadcast %cst_48 : f32 to vector<180x4xf32>
    %81 = arith.maximumf %79, %80 : vector<180x4xf32>
    %82 = vector.broadcast %76 : vector<180x1xf32> to vector<180x4xf32>
    %83 = arith.mulf %81, %82 : vector<180x4xf32>
    %cst_49 = arith.constant 0.000000e+00 : f32
    %84 = vector.broadcast %cst_49 : f32 to vector<8x4xf32>
    %c0_50 = arith.constant 0 : index
    %c0_51 = arith.constant 0 : index
    %85 = vector.load %arg9[%c0_50, %c0_51] : memref<196x4xf32, #tpu.memory_space<vmem>>, vector<8x4xf32>
    tpu.vector_store %arg9[%c0_50, %c0_51], %84 {strides = array<i32>} : memref<196x4xf32, #tpu.memory_space<vmem>>, vector<8x4xf32>,
    %c188 = arith.constant 188 : index
    %c0_52 = arith.constant 0 : index
    %86 = vector.load %arg9[%c188, %c0_52] : memref<196x4xf32, #tpu.memory_space<vmem>>, vector<8x4xf32>
    tpu.vector_store %arg9[%c188, %c0_52], %84 {strides = array<i32>} : memref<196x4xf32, #tpu.memory_space<vmem>>, vector<8x4xf32>,
    %c8_53 = arith.constant 8 : index
    %c0_54 = arith.constant 0 : index
    %87 = vector.load %arg9[%c8_53, %c0_54] : memref<196x4xf32, #tpu.memory_space<vmem>>, vector<180x4xf32>
    tpu.vector_store %arg9[%c8_53, %c0_54], %83 {strides = array<i32>} : memref<196x4xf32, #tpu.memory_space<vmem>>, vector<180x4xf32>,
    %cst_55 = arith.constant 0.000000e+00 : f32
    %88 = vector.broadcast %cst_55 : f32 to vector<144x4xf32>
    %c7_56 = arith.constant 7 : index
    %c0_57 = arith.constant 0 : index
    %89 = vector.load %arg9[%c7_56, %c0_57] : memref<196x4xf32, #tpu.memory_space<vmem>>, vector<144x4xf32>
    %c0_58 = arith.constant 0 : index
    %c0_59 = arith.constant 0 : index
    %c0_60 = arith.constant 0 : index
    %90 = vector.load %arg6[%c0_58, %c0_59, %c0_60] : memref<9x4x4xf32, #tpu.memory_space<vmem>>, vector<1x4x4xf32>
    %91 = vector.shape_cast %90 : vector<1x4x4xf32> to vector<4x4xf32>
    %cst_61 = arith.constant dense<0.000000e+00> : vector<144x4xf32>
    %92 = tpu.matmul %89, %91, %cst_61 {dimension_numbers = #tpu.dot_dimension_numbers<[1], [0], [0], [1], [0, 0, 1, 1], [], []>} : vector<144x4xf32>, vector<4x4xf32>, vector<144x4xf32> -> vector<144x4xf32>
    %93 = arith.addf %88, %92 : vector<144x4xf32>
    %c8_62 = arith.constant 8 : index
    %c0_63 = arith.constant 0 : index
    %94 = vector.load %arg9[%c8_62, %c0_63] : memref<196x4xf32, #tpu.memory_space<vmem>>, vector<144x4xf32>
    %c1_64 = arith.constant 1 : index
    %c0_65 = arith.constant 0 : index
    %c0_66 = arith.constant 0 : index
    %95 = vector.load %arg6[%c1_64, %c0_65, %c0_66] : memref<9x4x4xf32, #tpu.memory_space<vmem>>, vector<1x4x4xf32>
    %96 = vector.shape_cast %95 : vector<1x4x4xf32> to vector<4x4xf32>
    %cst_67 = arith.constant dense<0.000000e+00> : vector<144x4xf32>
    %97 = tpu.matmul %94, %96, %cst_67 {dimension_numbers = #tpu.dot_dimension_numbers<[1], [0], [0], [1], [0, 0, 1, 1], [], []>} : vector<144x4xf32>, vector<4x4xf32>, vector<144x4xf32> -> vector<144x4xf32>
    %98 = arith.addf %93, %97 : vector<144x4xf32>
    %c9 = arith.constant 9 : index
    %c0_68 = arith.constant 0 : index
    %99 = vector.load %arg9[%c9, %c0_68] : memref<196x4xf32, #tpu.memory_space<vmem>>, vector<144x4xf32>
    %c2_69 = arith.constant 2 : index
    %c0_70 = arith.constant 0 : index
    %c0_71 = arith.constant 0 : index
    %100 = vector.load %arg6[%c2_69, %c0_70, %c0_71] : memref<9x4x4xf32, #tpu.memory_space<vmem>>, vector<1x4x4xf32>
    %101 = vector.shape_cast %100 : vector<1x4x4xf32> to vector<4x4xf32>
    %cst_72 = arith.constant dense<0.000000e+00> : vector<144x4xf32>
    %102 = tpu.matmul %99, %101, %cst_72 {dimension_numbers = #tpu.dot_dimension_numbers<[1], [0], [0], [1], [0, 0, 1, 1], [], []>} : vector<144x4xf32>, vector<4x4xf32>, vector<144x4xf32> -> vector<144x4xf32>
    %103 = arith.addf %98, %102 : vector<144x4xf32>
    %c25 = arith.constant 25 : index
    %c0_73 = arith.constant 0 : index
    %104 = vector.load %arg9[%c25, %c0_73] : memref<196x4xf32, #tpu.memory_space<vmem>>, vector<144x4xf32>
    %c3_74 = arith.constant 3 : index
    %c0_75 = arith.constant 0 : index
    %c0_76 = arith.constant 0 : index
    %105 = vector.load %arg6[%c3_74, %c0_75, %c0_76] : memref<9x4x4xf32, #tpu.memory_space<vmem>>, vector<1x4x4xf32>
    %106 = vector.shape_cast %105 : vector<1x4x4xf32> to vector<4x4xf32>
    %cst_77 = arith.constant dense<0.000000e+00> : vector<144x4xf32>
    %107 = tpu.matmul %104, %106, %cst_77 {dimension_numbers = #tpu.dot_dimension_numbers<[1], [0], [0], [1], [0, 0, 1, 1], [], []>} : vector<144x4xf32>, vector<4x4xf32>, vector<144x4xf32> -> vector<144x4xf32>
    %108 = arith.addf %103, %107 : vector<144x4xf32>
    %c26 = arith.constant 26 : index
    %c0_78 = arith.constant 0 : index
    %109 = vector.load %arg9[%c26, %c0_78] : memref<196x4xf32, #tpu.memory_space<vmem>>, vector<144x4xf32>
    %c4_79 = arith.constant 4 : index
    %c0_80 = arith.constant 0 : index
    %c0_81 = arith.constant 0 : index
    %110 = vector.load %arg6[%c4_79, %c0_80, %c0_81] : memref<9x4x4xf32, #tpu.memory_space<vmem>>, vector<1x4x4xf32>
    %111 = vector.shape_cast %110 : vector<1x4x4xf32> to vector<4x4xf32>
    %cst_82 = arith.constant dense<0.000000e+00> : vector<144x4xf32>
    %112 = tpu.matmul %109, %111, %cst_82 {dimension_numbers = #tpu.dot_dimension_numbers<[1], [0], [0], [1], [0, 0, 1, 1], [], []>} : vector<144x4xf32>, vector<4x4xf32>, vector<144x4xf32> -> vector<144x4xf32>
    %113 = arith.addf %108, %112 : vector<144x4xf32>
    %c27 = arith.constant 27 : index
    %c0_83 = arith.constant 0 : index
    %114 = vector.load %arg9[%c27, %c0_83] : memref<196x4xf32, #tpu.memory_space<vmem>>, vector<144x4xf32>
    %c5_84 = arith.constant 5 : index
    %c0_85 = arith.constant 0 : index
    %c0_86 = arith.constant 0 : index
    %115 = vector.load %arg6[%c5_84, %c0_85, %c0_86] : memref<9x4x4xf32, #tpu.memory_space<vmem>>, vector<1x4x4xf32>
    %116 = vector.shape_cast %115 : vector<1x4x4xf32> to vector<4x4xf32>
    %cst_87 = arith.constant dense<0.000000e+00> : vector<144x4xf32>
    %117 = tpu.matmul %114, %116, %cst_87 {dimension_numbers = #tpu.dot_dimension_numbers<[1], [0], [0], [1], [0, 0, 1, 1], [], []>} : vector<144x4xf32>, vector<4x4xf32>, vector<144x4xf32> -> vector<144x4xf32>
    %118 = arith.addf %113, %117 : vector<144x4xf32>
    %c43 = arith.constant 43 : index
    %c0_88 = arith.constant 0 : index
    %119 = vector.load %arg9[%c43, %c0_88] : memref<196x4xf32, #tpu.memory_space<vmem>>, vector<144x4xf32>
    %c6_89 = arith.constant 6 : index
    %c0_90 = arith.constant 0 : index
    %c0_91 = arith.constant 0 : index
    %120 = vector.load %arg6[%c6_89, %c0_90, %c0_91] : memref<9x4x4xf32, #tpu.memory_space<vmem>>, vector<1x4x4xf32>
    %121 = vector.shape_cast %120 : vector<1x4x4xf32> to vector<4x4xf32>
    %cst_92 = arith.constant dense<0.000000e+00> : vector<144x4xf32>
    %122 = tpu.matmul %119, %121, %cst_92 {dimension_numbers = #tpu.dot_dimension_numbers<[1], [0], [0], [1], [0, 0, 1, 1], [], []>} : vector<144x4xf32>, vector<4x4xf32>, vector<144x4xf32> -> vector<144x4xf32>
    %123 = arith.addf %118, %122 : vector<144x4xf32>
    %c44 = arith.constant 44 : index
    %c0_93 = arith.constant 0 : index
    %124 = vector.load %arg9[%c44, %c0_93] : memref<196x4xf32, #tpu.memory_space<vmem>>, vector<144x4xf32>
    %c7_94 = arith.constant 7 : index
    %c0_95 = arith.constant 0 : index
    %c0_96 = arith.constant 0 : index
    %125 = vector.load %arg6[%c7_94, %c0_95, %c0_96] : memref<9x4x4xf32, #tpu.memory_space<vmem>>, vector<1x4x4xf32>
    %126 = vector.shape_cast %125 : vector<1x4x4xf32> to vector<4x4xf32>
    %cst_97 = arith.constant dense<0.000000e+00> : vector<144x4xf32>
    %127 = tpu.matmul %124, %126, %cst_97 {dimension_numbers = #tpu.dot_dimension_numbers<[1], [0], [0], [1], [0, 0, 1, 1], [], []>} : vector<144x4xf32>, vector<4x4xf32>, vector<144x4xf32> -> vector<144x4xf32>
    %128 = arith.addf %123, %127 : vector<144x4xf32>
    %c45 = arith.constant 45 : index
    %c0_98 = arith.constant 0 : index
    %129 = vector.load %arg9[%c45, %c0_98] : memref<196x4xf32, #tpu.memory_space<vmem>>, vector<144x4xf32>
    %c8_99 = arith.constant 8 : index
    %c0_100 = arith.constant 0 : index
    %c0_101 = arith.constant 0 : index
    %130 = vector.load %arg6[%c8_99, %c0_100, %c0_101] : memref<9x4x4xf32, #tpu.memory_space<vmem>>, vector<1x4x4xf32>
    %131 = vector.shape_cast %130 : vector<1x4x4xf32> to vector<4x4xf32>
    %cst_102 = arith.constant dense<0.000000e+00> : vector<144x4xf32>
    %132 = tpu.matmul %129, %131, %cst_102 {dimension_numbers = #tpu.dot_dimension_numbers<[1], [0], [0], [1], [0, 0, 1, 1], [], []>} : vector<144x4xf32>, vector<4x4xf32>, vector<144x4xf32> -> vector<144x4xf32>
    %133 = arith.addf %128, %132 : vector<144x4xf32>
    %c42_i32_103 = arith.constant 42 : i32
    %134 = arith.addi %1, %c42_i32_103 : i32
    %c0_104 = arith.constant 0 : index
    %135 = arith.index_cast %134 : i32 to index
    %c0_105 = arith.constant 0 : index
    %136 = vector.load %arg2[%c0_104, %135, %c0_105] : memref<1x372x4xf32, #tpu.memory_space<vmem>>, vector<1x144x4xf32>
    %137 = vector.shape_cast %136 : vector<1x144x4xf32> to vector<144x4xf32>
    %c0_106 = arith.constant 0 : index
    %c0_107 = arith.constant 0 : index
    %138 = vector.load %arg7[%c0_106, %c0_107] : memref<1x4xf32, #tpu.memory_space<vmem>>, vector<1x4xf32>
    %139 = vector.broadcast %138 : vector<1x4xf32> to vector<144x4xf32>
    %140 = arith.addf %133, %139 : vector<144x4xf32>
    %141 = arith.addf %140, %137 : vector<144x4xf32>
    %cst_108 = arith.constant 0.000000e+00 : f32
    %142 = vector.broadcast %cst_108 : f32 to vector<144x4xf32>
    %143 = arith.maximumf %141, %142 : vector<144x4xf32>
    %c0_109 = arith.constant 0 : index
    %c0_110 = arith.constant 0 : index
    %c0_111 = arith.constant 0 : index
    %144 = vector.load %arg8[%c0_109, %c0_110, %c0_111] : memref<1x144x4xf32, #tpu.memory_space<vmem>>, vector<1x144x4xf32>
    %145 = vector.shape_cast %144 : vector<1x144x4xf32> to vector<144x4xf32>
    %146 = vector.shape_cast %143 : vector<144x4xf32> to vector<1x144x4xf32>
    tpu.vector_store %arg8[%c0_109, %c0_110, %c0_111], %146 {strides = array<i32>} : memref<1x144x4xf32, #tpu.memory_space<vmem>>, vector<1x144x4xf32>,
    return
  }
  func.func @transform_0(%arg0: i32, %arg1: i32) -> (i32, i32, i32) {
    %c0_i32 = arith.constant 0 : i32
    %c0_i32_0 = arith.constant 0 : i32
    %c0_i32_1 = arith.constant 0 : i32
    return %arg0, %c0_i32, %c0_i32_0 : i32, i32, i32
  }
  func.func @transform_1(%arg0: i32, %arg1: i32) -> (i32, i32) {
    %c0_i32 = arith.constant 0 : i32
    %c0_i32_0 = arith.constant 0 : i32
    %c0_i32_1 = arith.constant 0 : i32
    return %c0_i32, %c0_i32_0 : i32, i32
  }
  func.func @transform_2(%arg0: i32, %arg1: i32) -> (i32, i32, i32) {
    %c0_i32 = arith.constant 0 : i32
    %c0_i32_0 = arith.constant 0 : i32
    %c0_i32_1 = arith.constant 0 : i32
    %c0_i32_2 = arith.constant 0 : i32
    return %c0_i32, %c0_i32_0, %c0_i32_1 : i32, i32, i32
  }
  func.func @transform_3(%arg0: i32, %arg1: i32) -> (i32, i32) {
    %c0_i32 = arith.constant 0 : i32
    %c0_i32_0 = arith.constant 0 : i32
    %c0_i32_1 = arith.constant 0 : i32
    return %c0_i32, %c0_i32_0 : i32, i32
  }
  func.func @transform_4(%arg0: i32, %arg1: i32) -> (i32, i32, i32) {
    %c0_i32 = arith.constant 0 : i32
    %c0_i32_0 = arith.constant 0 : i32
    %c0_i32_1 = arith.constant 0 : i32
    %c0_i32_2 = arith.constant 0 : i32
    return %c0_i32, %c0_i32_0, %c0_i32_1 : i32, i32, i32
  }
  func.func @transform_5(%arg0: i32, %arg1: i32) -> (i32, i32) {
    %c0_i32 = arith.constant 0 : i32
    %c0_i32_0 = arith.constant 0 : i32
    %c0_i32_1 = arith.constant 0 : i32
    return %c0_i32, %c0_i32_0 : i32, i32
  }
  func.func @transform_6(%arg0: i32, %arg1: i32) -> (i32, i32, i32) {
    %c0_i32 = arith.constant 0 : i32
    %c0_i32_0 = arith.constant 0 : i32
    return %arg0, %arg1, %c0_i32 : i32, i32, i32
  }
}

</mosaic_0001>

<bundles_post_ra>
// kernel: tpu_custom_call.1
= control target key start
LH: loop header
LB: loop body
LE: loop exit
PB: predicated region body
PF: predicated region fallthrough
CT: control target
= control target key end

     0   :  { %s4772_s21 = smov 0   ;;  %s4774_s22 = smov 0   ;;  %s6473_s0 = inlined_call_operand.vmem [shape: f32[2,372,4], index: 0, kind: input, shape index: {}]   ;;  %s6474_s1 = inlined_call_operand.vmem [shape: f32[324,1], index: 1, kind: input, shape index: {}]   ;;  %s6475_s2 = inlined_call_operand.vmem [shape: f32[9,4,4], index: 2, kind: input, shape index: {}]   ;;  %s6476_s3 = inlined_call_operand.vmem [shape: f32[1,4], index: 3, kind: input, shape index: {}]   ;;  %s6477_s4 = inlined_call_operand.vmem [shape: f32[9,4,4], index: 4, kind: input, shape index: {}]   ;;  %s6478_s5 = inlined_call_operand.vmem [shape: f32[1,4], index: 5, kind: input, shape index: {}]   ;;  %s6479_s6 = inlined_call_operand.vmem [shape: f32[2,288,4], index: 6, kind: output, shape index: {}]  }
   0x1   :  { %s4776_s23 = smov 0   ;;  %s4778_s24 = smov 0  }
   0x2   :  { %s4780_s25 = smov 0  }
   0x3 LB: > { %s25_s26 = sadd.s32 1, %s4725_s23  ;;  %s28_s27 = sadd.s32 1, %s4729_s24  ;;  %s4733_s25 = sphi %s4780_s25, %s16_s25   ;;  %s4729_s24 = sphi %s4778_s24, %s6639_s24   ;;  %s4725_s23 = sphi %s4776_s23, %s6638_s23   ;;  %s4721_s22 = sphi %s4774_s22, %s6637_s22   ;;  %s4717_s21 = sphi %s4772_s21, %s6636_s21  }
   0x4   : > { %p26_p0 = scmp.ge.s32.totalorder %s25_s26, 2  ;;  %p4009_p1 = scmp.ge.s32.totalorder %s4733_s25, 1 }
   0x5   : > { %p226_p2 = scmp.lt.s32.totalorder %s4733_s25, 5 }
   0x6   : > { %s6641_s26 = smov (%p26_p0, %s25_s26), 0  ;;  %s6643_s27 = smov (!%p26_p0, %s28_s27), %s4729_s24 }
   0x7   : > { %p227_p3 = pnand %p4009_p1, %p226_p2  ;;  %p30_p4 = scmp.ge.s32.totalorder %s6643_s27, 2 }
   0x9   : > { %s6645_s27 = smov (%p30_p4, %s6643_s27), 0  ;;  %230 = sbr.rel (%p227_p3) target bundleno = 1146 (0x47a), region = 44 }
   0xe   : > { %v4058_v0 = vld [vmem:[%s6475_s2 + $0x4] sm:$0xf]  ;;  %vm399_vm0 = vcmask 1043456   ;;  %v301_v1 = vld [vmem:[%s6475_s2] sm:$0xf]  ;;  %p260_p5 = scmp.lt.s32.totalorder %s4721_s22, 1 }
   0xf   : > { %4059 = vmatpush.msk.msra.mxu0 %vm399_vm0, %v4058_v0  ;;  %4642 = vmatpush.msk.msra.mxu3 %vm399_vm0, %v4058_v0  ;;  %v4130_v2 = vld [vmem:[%s6475_s2 + $0x8] sm:$0xf]  ;;  %s275_s10 = smul.u32 144, %s4717_s21  ;;  %vm329_vm1 = vcmask 31744   ;;  %v4178_v18 = vld [vmem:[%s6475_s2 + $0xc] sm:$0xf] }
  0x10   : > { %4083 = vmatpush.msk.msra.mxu1 %vm399_vm0, %v301_v1  ;;  %s6647_s22 = smov (!%p260_p5, %s4721_s22), 1  ;;  %4644 = vmatpush.msk.msra.mxu2 %vm399_vm0, %v4130_v2  ;;  %vm2339_vm2 = vcmask 27648   ;;  %s265_s28 = smul.u32 18, %s4717_s21 }
  0x11   : > { %4131 = vmatpush.msk.msrb.mxu0 %vm399_vm0, %v4130_v2  ;;  %4643 = vmatpush.msk.msrb.mxu3 %vm399_vm0, %v301_v1  ;;  %s4645_s11 = smul.u32 376, %s6647_s22 }
  0x12   : > { %p268_p6 = scmp.lt.s32.totalorder %s265_s28, 35  ;;  %s4646_s29 = smul.u32 36, %s6647_s22 }
  0x13   : > { %s264_s14 = scalar_lea.vmem %s6473_s0, %s4645_s11 }
  0x14   : > { %s4828_s15 = scalar_lea.vmem %s264_s14, %s275_s10  ;;  %s5353_s14 = scalar_lea.vmem %s6474_s1, %s275_s10 }
  0x15   : > { %v4035_v3 = vld [vmem:[%s4828_s15 + $0x6] sm:$0xff]  ;;  %v4057_v4 = vld [vmem:[%s4828_s15 + $0xb6] sm:$0xf]  ;;  %v4036_v6 = vld [vmem:[%s4828_s15 + $0xe] sm:$0xff]  ;;  %s6649_s28 = smov (!%p268_p6, %s265_s28), 35 }
  0x16   : > { %v4012_v5 = vld [vmem:[%s4828_s15 + $0x5] sm:$0xff]  ;;  %4060 = vmatmul.msk.f32.vlgmr.msra.gmra.mxu0 %vm329_vm1, %v4035_v3  ;;  %4082 = vmatmul.msk.f32.vlgmr.msra.gmra.mxu3 %vm329_vm1, %v4057_v4  ;;  %v4013_v8 = vld [vmem:[%s4828_s15 + $0xd] sm:$0xff]  ;;  %v4037_v10 = vld [vmem:[%s4828_s15 + $0x16] sm:$0xff]  ;;  %s271_s7 = sadd.s32 %s4646_s29, %s6649_s28 }
  0x17   : > { %4084 = vmatmul.msk.f32.vlgmr.msra.gmra.mxu1 %vm329_vm1, %v4012_v5  ;;  %v4028_v7 = vld [vmem:[%s4828_s15 + $0x85] sm:$0xff]  ;;  %v4029_v11 = vld [vmem:[%s4828_s15 + $0x8d] sm:$0xff]  ;;  %v4014_v12 = vld [vmem:[%s4828_s15 + $0x15] sm:$0xff]  ;;  %4179 = vmatpush.msk.msra.mxu3 %vm399_vm0, %v4178_v18  ;;  %s4011_s22 = sshll.u32 %s271_s7, 3 }
  0x18   : > { %v4843_v9 = vld [vmem:[%s4828_s15 + $0x3f] sm:$0xff]  ;;  %v4854_v13 = vld [vmem:[%s4828_s15 + $0x47] sm:$0xff]  ;;  %v4030_v15 = vld [vmem:[%s4828_s15 + $0x95] sm:$0xff]  ;;  %s6370_s11 = scalar_lea.vmem %s6479_s6, %s4011_s22 }
  0x19   : > { %4139 = vmatmul.msk.f32.vlgmr.msra.gmra.mxu2 %vm329_vm1, %v4843_v9  ;;  %v4038_v14 = vld [vmem:[%s4828_s15 + $0x1e] sm:$0xff]  ;;  %v4865_v17 = vld [vmem:[%s4828_s15 + $0x4f] sm:$0xff]  ;;  %v4039_v19 = vld [vmem:[%s4828_s15 + $0x26] sm:$0xff] }
  0x1a   : > { %v4015_v16 = vld [vmem:[%s4828_s15 + $0x1d] sm:$0xff]  ;;  %v4016_v21 = vld [vmem:[%s4828_s15 + $0x25] sm:$0xff]  ;;  %v4040_v23 = vld [vmem:[%s4828_s15 + $0x2e] sm:$0xff] }
  0x1b   : > { %v4031_v20 = vld [vmem:[%s4828_s15 + $0x9d] sm:$0xff]  ;;  %v4032_v24 = vld [vmem:[%s4828_s15 + $0xa5] sm:$0xff]  ;;  %v4017_v25 = vld [vmem:[%s4828_s15 + $0x2d] sm:$0xff] }
  0x1c   : > { %v4880_v22 = vld [vmem:[%s4828_s15 + $0x57] sm:$0xff]  ;;  %v4891_v26 = vld [vmem:[%s4828_s15 + $0x5f] sm:$0xff]  ;;  %v4033_v28 = vld [vmem:[%s4828_s15 + $0xad] sm:$0xff] }
  0x1d   : > { %v4041_v27 = vld [vmem:[%s4828_s15 + $0x36] sm:$0xff]  ;;  %v4902_v30 = vld [vmem:[%s4828_s15 + $0x67] sm:$0xff]  ;;  %v4042_v31 = vld [vmem:[%s4828_s15 + $0x3e] sm:$0xff] }
  0x1e   : > { %4061 = vmatmul.msk.f32.gmra.mxu0 %vm329_vm1, %v4036_v6  ;;  %4100 = vmatmul.msk.f32.vlgmr.msrb.gmra.mxu3 %vm329_vm1, %v4028_v7  ;;  %v4018_v29 = vld [vmem:[%s4828_s15 + $0x35] sm:$0xff]  ;;  %v4019_v33 = vld [vmem:[%s4828_s15 + $0x3d] sm:$0xff]  ;;  %v4043_v35 = vld [vmem:[%s4828_s15 + $0x46] sm:$0xff] }
  0x1f   : > { %4085 = vmatmul.msk.f32.gmra.mxu1 %vm329_vm1, %v4013_v8  ;;  %v4034_v32 = vld [vmem:[%s4828_s15 + $0xb5] sm:$0xf]  ;;  %v4020_v37 = vld [vmem:[%s4828_s15 + $0x45] sm:$0xff]  ;;  %v4021_v41 = vld [vmem:[%s4828_s15 + $0x4d] sm:$0xff] }
  0x20   : > { %v4913_v34 = vld [vmem:[%s4828_s15 + $0x6f] sm:$0xff]  ;;  %v4919_v36 = vld [vmem:[%s4828_s15 + $0x17] sm:$0xff]  ;;  %v4933_v40 = vld [vmem:[%s4828_s15 + $0x1f] sm:$0xff] }
  0x21   : > { %4140 = vmatmul.msk.f32.gmra.mxu2 %vm329_vm1, %v4854_v13  ;;  %v4927_v38 = vld [vmem:[%s4828_s15 + $0x77] sm:$0xff]  ;;  %v4044_v39 = vld [vmem:[%s4828_s15 + $0x4e] sm:$0xff]  ;;  %v4941_v42 = vld [vmem:[%s4828_s15 + $0x7f] sm:$0xff] }
  0x22   : > { %v4045_v43 = vld [vmem:[%s4828_s15 + $0x56] sm:$0xff]  ;;  %v4947_v44 = vld [vmem:[%s4828_s15 + $0x27] sm:$0xff]  ;;  %v4046_v47 = vld [vmem:[%s4828_s15 + $0x5e] sm:$0xff] }
  0x23   : > { %v4022_v45 = vld [vmem:[%s4828_s15 + $0x55] sm:$0xff]  ;;  %v4955_v46 = vld [vmem:[%s4828_s15 + $0x87] sm:$0xff]  ;;  %v4023_v49 = vld [vmem:[%s4828_s15 + $0x5d] sm:$0xff] }
  0x24   : > { %v4961_v48 = vld [vmem:[%s4828_s15 + $0x2f] sm:$0xff]  ;;  %v4047_v51 = vld [vmem:[%s4828_s15 + $0x66] sm:$0xff]  ;;  %v4975_v52 = vld [vmem:[%s4828_s15 + $0x37] sm:$0xff] }
  0x25   : > { %v4969_v50 = vld [vmem:[%s4828_s15 + $0x8f] sm:$0xff]  ;;  %v4024_v53 = vld [vmem:[%s4828_s15 + $0x65] sm:$0xff]  ;;  %v4982_v54 = vld [vmem:[%s4828_s15 + $0x97] sm:$0xff] }
  0x26   : > { %4062 = vmatmul.msk.f32.gmra.mxu0 %vm329_vm1, %v4037_v10  ;;  %4101 = vmatmul.msk.f32.gmra.mxu3 %vm329_vm1, %v4029_v11  ;;  %v4048_v55 = vld [vmem:[%s4828_s15 + $0x6e] sm:$0xff]  ;;  %v4993_v57 = vld [vmem:[%s4828_s15 + $0x9f] sm:$0xff]  ;;  %v4049_v58 = vld [vmem:[%s4828_s15 + $0x76] sm:$0xff] }
  0x27   : > { %4086 = vmatmul.msk.f32.gmra.mxu1 %vm329_vm1, %v4014_v12  ;;  %v4025_v56 = vld [vmem:[%s4828_s15 + $0x6d] sm:$0xff]  ;;  %v4026_v59 = vld [vmem:[%s4828_s15 + $0x75] sm:$0xff]  ;;  %v4050_v61 = vld [vmem:[%s4828_s15 + $0x7e] sm:$0xff] }
  0x28   : > { %v5004_v60 = vld [vmem:[%s4828_s15 + $0xa7] sm:$0xff]  ;;  %v4027_v62 = vld [vmem:[%s4828_s15 + $0x7d] sm:$0xff]  ;;  %v5015_v63 = vld [vmem:[%s4828_s15 + $0xaf] sm:$0xff] }
  0x29   : > { %4141 = vmatmul.msk.f32.gmra.mxu2 %vm329_vm1, %v4865_v17  ;;  %v4051_v1 = vld [vmem:[%s4828_s15 + $0x86] sm:$0xff]  ;;  %v4129_v2 = vld [vmem:[%s4828_s15 + $0xb7] sm:$0xf]  ;;  %v4052_v5 = vld [vmem:[%s4828_s15 + $0x8e] sm:$0xff] }
  0x2a   : > { %v4053_v8 = vld [vmem:[%s4828_s15 + $0x96] sm:$0xff]  ;;  %v4054_v12 = vld [vmem:[%s4828_s15 + $0x9e] sm:$0xff]  ;;  %v4056_v18 = vld [vmem:[%s4828_s15 + $0xae] sm:$0xff] }
  0x2e   : > { %4063 = vmatmul.msk.f32.gmra.mxu0 %vm329_vm1, %v4038_v14  ;;  %4102 = vmatmul.msk.f32.gmra.mxu3 %vm329_vm1, %v4030_v15  ;;  %v4055_v15 = vld [vmem:[%s4828_s15 + $0xa6] sm:$0xff] }
  0x2f   : > { %4087 = vmatmul.msk.f32.gmra.mxu1 %vm329_vm1, %v4015_v16 }
  0x31   : > { %4142 = vmatmul.msk.f32.gmra.mxu2 %vm329_vm1, %v4880_v22 }
  0x36   : > { %4064 = vmatmul.msk.f32.gmra.mxu0 %vm329_vm1, %v4039_v19  ;;  %4103 = vmatmul.msk.f32.gmra.mxu3 %vm329_vm1, %v4031_v20 }
  0x37   : > { %4088 = vmatmul.msk.f32.gmra.mxu1 %vm329_vm1, %v4016_v21  ;;  %v4107_v21 = vld [vmem:[%s4828_s15 + $0x7] sm:$0xff] }
  0x39   : > { %4143 = vmatmul.msk.f32.gmra.mxu2 %vm329_vm1, %v4891_v26 }
  0x3e   : > { %4065 = vmatmul.msk.f32.gmra.mxu0 %vm329_vm1, %v4040_v23  ;;  %4104 = vmatmul.msk.f32.gmra.mxu3 %vm329_vm1, %v4032_v24  ;;  %v4108_v24 = vld [vmem:[%s4828_s15 + $0xf] sm:$0xff] }
  0x3f   : > { %4089 = vmatmul.msk.f32.gmra.mxu1 %vm329_vm1, %v4017_v25 }
  0x41   : > { %4144 = vmatmul.msk.f32.gmra.mxu2 %vm329_vm1, %v4902_v30 }
  0x46   : > { %4066 = vmatmul.msk.f32.gmra.mxu0 %vm329_vm1, %v4041_v27  ;;  %4105 = vmatmul.msk.f32.gmra.mxu3 %vm329_vm1, %v4033_v28  ;;  %v4370_v28 = vld [vmem:[%s6475_s2 + $0x1c] sm:$0xf] }
  0x47   : > { %4090 = vmatmul.msk.f32.gmra.mxu1 %vm329_vm1, %v4018_v29  ;;  %4371 = vmatpush.msk.msrb.mxu3 %vm399_vm0, %v4370_v28 }
  0x49   : > { %4145 = vmatmul.msk.f32.gmra.mxu2 %vm329_vm1, %v4913_v34 }
  0x4e   : > { %4067 = vmatmul.msk.f32.gmra.mxu0 %vm329_vm1, %v4042_v31  ;;  %4106 = vmatmul.msk.f32.gmra.mxu3 %vm329_vm1, %v4034_v32  ;;  %v4299_v31 = vld [vmem:[%s4828_s15 + $0x29] sm:$0xff]  ;;  %v4418_v32 = vld [vmem:[%s6475_s2 + $0x20] sm:$0xf] }
  0x4f   : > { %4091 = vmatmul.msk.f32.gmra.mxu1 %vm329_vm1, %v4019_v33  ;;  %v4274_v33 = vld [vmem:[%s6475_s2 + $0x14] sm:$0xf] }
  0x50   : > { %4275 = vmatpush.msk.msrb.mxu1 %vm399_vm0, %v4274_v33  ;;  %v4308_v33 = vld [vmem:[%s4828_s15 + $0x71] sm:$0xff] }
  0x51   : > { %4146 = vmatmul.msk.f32.gmra.mxu2 %vm329_vm1, %v4927_v38 }
  0x56   : > { %4068 = vmatmul.msk.f32.gmra.mxu0 %vm329_vm1, %v4043_v35  ;;  %4180 = vmatmul.msk.f32.vlgmr.msra.gmra.mxu3 %vm329_vm1, %v4919_v36 }
  0x57   : > { %4092 = vmatmul.msk.f32.gmra.mxu1 %vm329_vm1, %v4020_v37  ;;  %v4252_v37 = vld [vmem:[%s4828_s15 + $0x21] sm:$0xff] }
  0x59   : > { %4147 = vmatmul.msk.f32.gmra.mxu2 %vm329_vm1, %v4941_v42 }
  0x5e   : > { %4069 = vmatmul.msk.f32.gmra.mxu0 %vm329_vm1, %v4044_v39  ;;  %4181 = vmatmul.msk.f32.gmra.mxu3 %vm329_vm1, %v4933_v40 }
  0x5f   : > { %4093 = vmatmul.msk.f32.gmra.mxu1 %vm329_vm1, %v4021_v41 }
  0x61   : > { %4148 = vmatmul.msk.f32.gmra.mxu2 %vm329_vm1, %v4955_v46 }
  0x66   : > { %4070 = vmatmul.msk.f32.gmra.mxu0 %vm329_vm1, %v4045_v43  ;;  %4182 = vmatmul.msk.f32.gmra.mxu3 %vm329_vm1, %v4947_v44  ;;  %v4302_v43 = vld [vmem:[%s4828_s15 + $0x41] sm:$0xff] }
  0x67   : > { %4094 = vmatmul.msk.f32.gmra.mxu1 %vm329_vm1, %v4022_v45 }
  0x69   : > { %4149 = vmatmul.msk.f32.gmra.mxu2 %vm329_vm1, %v4969_v50 }
  0x6e   : > { %4071 = vmatmul.msk.f32.gmra.mxu0 %vm329_vm1, %v4046_v47  ;;  %4183 = vmatmul.msk.f32.gmra.mxu3 %vm329_vm1, %v4961_v48  ;;  %v4203_v47 = vld [vmem:[%s4828_s15 + $0x18] sm:$0xff] }
  0x6f   : > { %4095 = vmatmul.msk.f32.gmra.mxu1 %vm329_vm1, %v4023_v49 }
  0x71   : > { %4150 = vmatmul.msk.f32.gmra.mxu2 %vm329_vm1, %v4982_v54 }
  0x76   : > { %4072 = vmatmul.msk.f32.gmra.mxu0 %vm329_vm1, %v4047_v51  ;;  %4184 = vmatmul.msk.f32.gmra.mxu3 %vm329_vm1, %v4975_v52 }
  0x77   : > { %4096 = vmatmul.msk.f32.gmra.mxu1 %vm329_vm1, %v4024_v53  ;;  %v4204_v53 = vld [vmem:[%s4828_s15 + $0x20] sm:$0xff] }
  0x79   : > { %4151 = vmatmul.msk.f32.gmra.mxu2 %vm329_vm1, %v4993_v57 }
  0x7e   : > { %4073 = vmatmul.msk.f32.gmra.mxu0 %vm329_vm1, %v4048_v55  ;;  %4185 = vmatmul.msk.f32.gmra.mxu3 %vm329_vm1, %v4843_v9  ;;  %v4226_v9 = vld [vmem:[%s6475_s2 + $0x10] sm:$0xf] }
  0x7f   : > { %4097 = vmatmul.msk.f32.gmra.mxu1 %vm329_vm1, %v4025_v56  ;;  %4227 = vmatpush.msk.msra.mxu0 %vm399_vm0, %v4226_v9 }
  0x81   : > { %4152 = vmatmul.msk.f32.gmra.mxu2 %vm329_vm1, %v5004_v60 }
  0x86   : > { %4074 = vmatmul.msk.f32.gmra.mxu0 %vm329_vm1, %v4049_v58  ;;  %4186 = vmatmul.msk.f32.gmra.mxu3 %vm329_vm1, %v4854_v13 }
  0x87   : > { %4098 = vmatmul.msk.f32.gmra.mxu1 %vm329_vm1, %v4026_v59  ;;  %v4205_v59 = vld [vmem:[%s4828_s15 + $0x28] sm:$0xff] }
  0x89   : > { %4153 = vmatmul.msk.f32.gmra.mxu2 %vm329_vm1, %v5015_v63 }
  0x8e   : > { %4075 = vmatmul.msk.f32.gmra.mxu0 %vm329_vm1, %v4050_v61  ;;  %4187 = vmatmul.msk.f32.gmra.mxu3 %vm329_vm1, %v4865_v17  ;;  %v4305_v61 = vld [vmem:[%s4828_s15 + $0x59] sm:$0xff] }
  0x8f   : > { %4099 = vmatmul.msk.f32.gmra.mxu1 %vm329_vm1, %v4027_v62 }
  0x91   : > { %4154 = vmatmul.msk.f32.gmra.mxu2 %vm329_vm1, %v4129_v2  ;;  %v4348_v2 = vld [vmem:[%s4828_s15 + $0x32] sm:$0xff] }
  0x93   : > { %v5020_v0 = vpop.f32.mrf.mxu0 }
  0x94   : > { %v5170_v55 = vpop.f32.mrf.mxu1 }
  0x96   : > { %4076 = vmatmul.msk.f32.gmra.mxu0 %vm329_vm1, %v4051_v1  ;;  %4188 = vmatmul.msk.f32.gmra.mxu3 %vm329_vm1, %v4880_v22  ;;  %v4206_v1 = vld [vmem:[%s4828_s15 + $0x30] sm:$0xff] }
  0x99   : > { %v486_v3 = vpop.f32.mrf.mxu3 }
  0x9b   : > { %v5028_v4 = vpop.f32.mrf.mxu0 }
  0x9c   : > { %v5188_v62 = vpop.f32.mrf.mxu1 }
  0x9e   : > { %4077 = vmatmul.msk.f32.gmra.mxu0 %vm329_vm1, %v4052_v5  ;;  %4189 = vmatmul.msk.f32.gmra.mxu3 %vm329_vm1, %v4891_v26  ;;  %v4306_v5 = vld [vmem:[%s4828_s15 + $0x61] sm:$0xff] }
  0xa1   : > { %v5034_v6 = vpop.f32.mrf.mxu3 }
  0xa2   : > { %6480 = vst [vmem:[#allocation3_spill] sm:$0xff] %v5034_v6  ;;  %v4359_v6 = vld [vmem:[%s4828_s15 + $0x8a] sm:$0xff] }
  0xa3   : > { %v5036_v7 = vpop.f32.mrf.mxu0 }
  0xa4   : > { %v5204_v9 = vpop.f32.mrf.mxu1 }
  0xa6   : > { %4078 = vmatmul.msk.f32.gmra.mxu0 %vm329_vm1, %v4053_v8  ;;  %4190 = vmatmul.msk.f32.gmra.mxu3 %vm329_vm1, %v4902_v30  ;;  %v4322_v30 = vld [vmem:[%s6475_s2 + $0x18] sm:$0xf] }
  0xa7   : > { %4323 = vmatpush.msk.msrb.mxu2 %vm399_vm0, %v4322_v30 }
  0xa8   : > { %4324 = vmatmul.msk.f32.vlgmr.msrb.gmra.mxu2 %vm329_vm1, %v4299_v31 }
  0xa9   : > { %v5046_v10 = vpop.f32.mrf.mxu3 }
  0xaa   : > { %6481 = vst [vmem:[#allocation4_spill] sm:$0xff] %v5046_v10 }
  0xab   : > { %v5048_v11 = vpop.f32.mrf.mxu0 }
  0xac   : > { %v5219_v28 = vpop.f32.mrf.mxu1 }
  0xae   : > { %4079 = vmatmul.msk.f32.gmra.mxu0 %vm329_vm1, %v4054_v12  ;;  %4191 = vmatmul.msk.f32.gmra.mxu3 %vm329_vm1, %v4913_v34  ;;  %v4251_v34 = vld [vmem:[%s4828_s15 + $0x19] sm:$0xff] }
  0xaf   : > { %4276 = vmatmul.msk.f32.vlgmr.msrb.gmra.mxu1 %vm329_vm1, %v4251_v34 }
  0xb1   : > { %v5054_v13 = vpop.f32.mrf.mxu3 }
  0xb2   : > { %6482 = vst [vmem:[#allocation5_spill] sm:$0xff] %v5054_v13  ;;  %v4315_v13 = vld [vmem:[%s4828_s15 + $0xa9] sm:$0xff] }
  0xb3   : > { %v5056_v14 = vpop.f32.mrf.mxu0 }
  0xb6   : > { %4080 = vmatmul.msk.f32.gmra.mxu0 %vm329_vm1, %v4055_v15  ;;  %4192 = vmatmul.msk.f32.gmra.mxu3 %vm329_vm1, %v4927_v38  ;;  %v4207_v15 = vld [vmem:[%s4828_s15 + $0x38] sm:$0xff] }
  0xb7   : > { %4277 = vmatmul.msk.f32.gmra.mxu1 %vm329_vm1, %v4252_v37 }
  0xb9   : > { %v5062_v16 = vpop.f32.mrf.mxu3 }
  0xba   : > { %6483 = vst [vmem:[#allocation6_spill] sm:$0xff] %v5062_v16  ;;  %v4215_v16 = vld [vmem:[%s4828_s15 + $0x78] sm:$0xff] }
  0xbb   : > { %v5064_v17 = vpop.f32.mrf.mxu0 }
  0xbe   : > { %4081 = vmatmul.msk.f32.gmra.mxu0 %vm329_vm1, %v4056_v18  ;;  %4193 = vmatmul.msk.f32.gmra.mxu3 %vm329_vm1, %v4941_v42  ;;  %v4175_v42 = vld [vmem:[%s4828_s15 + $0xb7] sm:$0xff] }
  0xbf   : > { %4278 = vmatmul.msk.f32.gmra.mxu1 %vm329_vm1, %v4299_v31  ;;  %v4349_v18 = vld [vmem:[%s4828_s15 + $0x3a] sm:$0xff] }
  0xc0   : > { %v4208_v31 = vld [vmem:[%s4828_s15 + $0x40] sm:$0xff] }
  0xc1   : > { %v5070_v19 = vpop.f32.mrf.mxu3 }
  0xc2   : > { %6484 = vst [vmem:[#allocation7_spill] sm:$0xff] %v5070_v19  ;;  %v4314_v19 = vld [vmem:[%s4828_s15 + $0xa1] sm:$0xff] }
  0xc3   : > { %v5072_v20 = vpop.f32.mrf.mxu0 }
  0xc6   : > { %4132 = vmatmul.msk.f32.vlgmr.msrb.gmra.mxu0 %vm329_vm1, %v4107_v21  ;;  %4194 = vmatmul.msk.f32.gmra.mxu3 %vm329_vm1, %v4955_v46  ;;  %v4176_v46 = vld [vmem:[%s4828_s15 + $0xbf] sm:$0xff]  ;;  %v4307_v21 = vld [vmem:[%s4828_s15 + $0x69] sm:$0xff] }
  0xc7   : > { %4419 = vmatpush.msk.msrb.mxu0 %vm399_vm0, %v4418_v32  ;;  %v4350_v32 = vld [vmem:[%s4828_s15 + $0x42] sm:$0xff] }
  0xc9   : > { %v5078_v22 = vpop.f32.mrf.mxu3 }
  0xca   : > { %6485 = vst [vmem:[#allocation8_spill] sm:$0xff] %v5078_v22  ;;  %v4214_v22 = vld [vmem:[%s4828_s15 + $0x70] sm:$0xff] }
  0xcb   : > { %v5080_v23 = vpop.f32.mrf.mxu0 }
  0xce   : > { %4133 = vmatmul.msk.f32.gmra.mxu0 %vm329_vm1, %v4108_v24  ;;  %4195 = vmatmul.msk.f32.gmra.mxu3 %vm329_vm1, %v4969_v50  ;;  %v5163_v50 = vpop.f32.mrf.mxu2 }
  0xcf   : > { %6493 = vst [vmem:[#allocation16_spill] sm:$0xff] %v5163_v50 }
  0xd1   : > { %v644_v25 = vpop.f32.mrf.mxu3 }
  0xd2   : > { %v5086_v26 = vadd.f32 %v644_v25, %v486_v3 }
  0xd3   : > { %v5088_v27 = vpop.f32.mrf.mxu0 }
  0xd4   : > { %6486 = vst [vmem:[#allocation9_spill] sm:$0xff] %v5086_v26  ;;  %v4313_v26 = vld [vmem:[%s4828_s15 + $0x99] sm:$0xff] }
  0xd5   : > { %6487 = vst [vmem:[#allocation10_spill] sm:$0xff] %v5088_v27 }
  0xd6   : > { %4134 = vmatmul.msk.f32.gmra.mxu0 %vm329_vm1, %v4919_v36  ;;  %4196 = vmatmul.msk.f32.gmra.mxu3 %vm329_vm1, %v4982_v54  ;;  %v4300_v36 = vld [vmem:[%s4828_s15 + $0x31] sm:$0xff] }
  0xd7   : > { %4325 = vmatmul.msk.f32.gmra.mxu2 %vm329_vm1, %v4300_v36  ;;  %4279 = vmatmul.msk.f32.gmra.mxu1 %vm329_vm1, %v4300_v36  ;;  %v4304_v54 = vld [vmem:[%s4828_s15 + $0x51] sm:$0xff] }
  0xd9   : > { %v5132_v39 = vpop.f32.mrf.mxu3 }
  0xdb   : > { %v5098_v29 = vpop.f32.mrf.mxu0 }
  0xdc   : > { %6488 = vst [vmem:[#allocation11_spill] sm:$0xff] %v5098_v29 }
  0xde   : > { %4135 = vmatmul.msk.f32.gmra.mxu0 %vm329_vm1, %v4933_v40  ;;  %4197 = vmatmul.msk.f32.gmra.mxu3 %vm329_vm1, %v4993_v57  ;;  %v4301_v40 = vld [vmem:[%s4828_s15 + $0x39] sm:$0xff]  ;;  %v5178_v57 = vpop.f32.mrf.mxu2 }
  0xdf   : > { %4326 = vmatmul.msk.f32.gmra.mxu2 %vm329_vm1, %v4301_v40  ;;  %4280 = vmatmul.msk.f32.gmra.mxu1 %vm329_vm1, %v4301_v40  ;;  %6495 = vst [vmem:[#allocation18_spill] sm:$0xff] %v5178_v57  ;;  %v4209_v40 = vld [vmem:[%s4828_s15 + $0x48] sm:$0xff] }
  0xe3   : > { %v5120_v35 = vpop.f32.mrf.mxu0 }
  0xe4   : > { %6489 = vst [vmem:[#allocation12_spill] sm:$0xff] %v5120_v35 }
  0xe6   : > { %4136 = vmatmul.msk.f32.gmra.mxu0 %vm329_vm1, %v4947_v44  ;;  %4198 = vmatmul.msk.f32.gmra.mxu3 %vm329_vm1, %v5004_v60  ;;  %v5146_v44 = vpop.f32.mrf.mxu3  ;;  %v4347_v60 = vld [vmem:[%s4828_s15 + $0x2a] sm:$0xff]  ;;  %v5198_v8 = vpop.f32.mrf.mxu2 }
  0xe7   : > { %4327 = vmatmul.msk.f32.gmra.mxu2 %vm329_vm1, %v4302_v43  ;;  %4281 = vmatmul.msk.f32.gmra.mxu1 %vm329_vm1, %v4302_v43  ;;  %6498 = vst [vmem:[#allocation21_spill] sm:$0xff] %v5198_v8  ;;  %v4309_v43 = vld [vmem:[%s4828_s15 + $0x79] sm:$0xff] }
  0xeb   : > { %v5130_v38 = vpop.f32.mrf.mxu0 }
  0xec   : > { %6490 = vst [vmem:[#allocation13_spill] sm:$0xff] %v5130_v38 }
  0xee   : > { %4137 = vmatmul.msk.f32.gmra.mxu0 %vm329_vm1, %v4961_v48  ;;  %4199 = vmatmul.msk.f32.gmra.mxu3 %vm329_vm1, %v5015_v63  ;;  %v4303_v48 = vld [vmem:[%s4828_s15 + $0x49] sm:$0xff]  ;;  %v5160_v49 = vpop.f32.mrf.mxu3  ;;  %v5216_v25 = vpop.f32.mrf.mxu2 }
  0xef   : > { %4328 = vmatmul.msk.f32.gmra.mxu2 %vm329_vm1, %v4303_v48  ;;  %4282 = vmatmul.msk.f32.gmra.mxu1 %vm329_vm1, %v4303_v48  ;;  %6500 = vst [vmem:[#allocation23_spill] sm:$0xff] %v5216_v25 }
  0xf3   : > { %v5141_v41 = vpop.f32.mrf.mxu0 }
  0xf4   : > { %6491 = vst [vmem:[#allocation14_spill] sm:$0xff] %v5141_v41  ;;  %v4396_v41 = vld [vmem:[%s4828_s15 + $0x33] sm:$0xff] }
  0xf6   : > { %4138 = vmatmul.msk.f32.gmra.mxu0 %vm329_vm1, %v4975_v52  ;;  %4200 = vmatmul.msk.f32.gmra.mxu3 %vm329_vm1, %v4175_v42  ;;  %v4177_v52 = vld [vmem:[%s4828_s15 + $0xc7] sm:$0xf]  ;;  %v5176_v56 = vpop.f32.mrf.mxu3  ;;  %v5232_v36 = vpop.f32.mrf.mxu2 }
  0xf7   : > { %4329 = vmatmul.msk.f32.gmra.mxu2 %vm329_vm1, %v4304_v54  ;;  %4283 = vmatmul.msk.f32.gmra.mxu1 %vm329_vm1, %v4304_v54  ;;  %6502 = vst [vmem:[#allocation25_spill] sm:$0xff] %v5232_v36  ;;  %v4351_v42 = vld [vmem:[%s4828_s15 + $0x4a] sm:$0xff]  ;;  %v4352_v54 = vld [vmem:[%s4828_s15 + $0x52] sm:$0xff] }
  0xfb   : > { %v5152_v45 = vpop.f32.mrf.mxu0 }
  0xfc   : > { %6492 = vst [vmem:[#allocation15_spill] sm:$0xff] %v5152_v45  ;;  %v4320_v45 = vld [vmem:[%s4828_s15 + $0xd1] sm:$0xff] }
  0xfe   : > { %4201 = vmatmul.msk.f32.gmra.mxu3 %vm329_vm1, %v4176_v46  ;;  %4228 = vmatmul.msk.f32.vlgmr.msra.gmra.mxu0 %vm329_vm1, %v4203_v47  ;;  %v5195_v3 = vpop.f32.mrf.mxu3  ;;  %v5239_v46 = vpop.f32.mrf.mxu1 }
  0xff   : > { %4330 = vmatmul.msk.f32.gmra.mxu2 %vm329_vm1, %v4305_v61  ;;  %4284 = vmatmul.msk.f32.gmra.mxu1 %vm329_vm1, %v4305_v61  ;;  %v5247_v48 = vpop.f32.mrf.mxu2 }
 0x100   : > { %6505 = vst [vmem:[#allocation28_spill] sm:$0xff] %v5247_v48  ;;  %v4367_v48 = vld [vmem:[%s4828_s15 + $0xca] sm:$0xff] }
 0x103   : > { %v5165_v51 = vpop.f32.mrf.mxu0 }
 0x104   : > { %6494 = vst [vmem:[#allocation17_spill] sm:$0xff] %v5165_v51  ;;  %v4219_v51 = vld [vmem:[%s4828_s15 + $0x98] sm:$0xff] }
 0x106   : > { %4202 = vmatmul.msk.f32.gmra.mxu3 %vm329_vm1, %v4177_v52  ;;  %4229 = vmatmul.msk.f32.gmra.mxu0 %vm329_vm1, %v4204_v53  ;;  %v5212_v24 = vpop.f32.mrf.mxu3  ;;  %v4210_v53 = vld [vmem:[%s4828_s15 + $0x50] sm:$0xff] }
 0x107   : > { %4331 = vmatmul.msk.f32.gmra.mxu2 %vm329_vm1, %v4306_v5  ;;  %4285 = vmatmul.msk.f32.gmra.mxu1 %vm329_vm1, %v4306_v5 }
 0x10b   : > { %v5180_v58 = vpop.f32.mrf.mxu0 }
 0x10c   : > { %6496 = vst [vmem:[#allocation19_spill] sm:$0xff] %v5180_v58  ;;  %v4443_v58 = vld [vmem:[%s6477_s4 + $0x4] sm:$0xf] }
 0x10d   : > { %4444 = vmatpush.msk.msra.mxu1 %vm399_vm0, %v4443_v58 }
 0x10e   : > { %4230 = vmatmul.msk.f32.gmra.mxu0 %vm329_vm1, %v4205_v59  ;;  %4372 = vmatmul.msk.f32.vlgmr.msrb.gmra.mxu3 %vm329_vm1, %v4347_v60  ;;  %v5229_v34 = vpop.f32.mrf.mxu3  ;;  %v4310_v59 = vld [vmem:[%s4828_s15 + $0x81] sm:$0xff]  ;;  %v5257_v60 = vpop.f32.mrf.mxu1 }
 0x10f   : > { %4332 = vmatmul.msk.f32.gmra.mxu2 %vm329_vm1, %v4307_v21  ;;  %4286 = vmatmul.msk.f32.gmra.mxu1 %vm329_vm1, %v4307_v21 }
 0x113   : > { %v5191_v63 = vpop.f32.mrf.mxu0 }
 0x114   : > { %6497 = vst [vmem:[#allocation20_spill] sm:$0xff] %v5191_v63 }
 0x116   : > { %4231 = vmatmul.msk.f32.gmra.mxu0 %vm329_vm1, %v4206_v1  ;;  %4373 = vmatmul.msk.f32.gmra.mxu3 %vm329_vm1, %v4348_v2  ;;  %v5245_v47 = vpop.f32.mrf.mxu3  ;;  %v4211_v1 = vld [vmem:[%s4828_s15 + $0x58] sm:$0xff]  ;;  %v5273_v21 = vpop.f32.mrf.mxu1 }
 0x117   : > { %4333 = vmatmul.msk.f32.gmra.mxu2 %vm329_vm1, %v4308_v33  ;;  %6504 = vst [vmem:[#allocation27_spill] sm:$0xff] %v5245_v47  ;;  %4287 = vmatmul.msk.f32.gmra.mxu1 %vm329_vm1, %v4308_v33  ;;  %v4353_v2 = vld [vmem:[%s4828_s15 + $0x5a] sm:$0xff]  ;;  %v4354_v33 = vld [vmem:[%s4828_s15 + $0x62] sm:$0xff] }
 0x11b   : > { %v5206_v12 = vpop.f32.mrf.mxu0 }
 0x11c   : > { %6499 = vst [vmem:[#allocation22_spill] sm:$0xff] %v5206_v12  ;;  %v4316_v12 = vld [vmem:[%s4828_s15 + $0xb1] sm:$0xff] }
 0x11e   : > { %4232 = vmatmul.msk.f32.gmra.mxu0 %vm329_vm1, %v4207_v15  ;;  %4374 = vmatmul.msk.f32.gmra.mxu3 %vm329_vm1, %v4349_v18  ;;  %v5264_v5 = vpop.f32.mrf.mxu3  ;;  %v4311_v15 = vld [vmem:[%s4828_s15 + $0x89] sm:$0xff]  ;;  %v5267_v18 = vpop.f32.mrf.mxu2 }
 0x11f   : > { %4334 = vmatmul.msk.f32.gmra.mxu2 %vm329_vm1, %v4309_v43  ;;  %6508 = vst [vmem:[#allocation31_spill] sm:$0xff] %v5264_v5  ;;  %4288 = vmatmul.msk.f32.gmra.mxu1 %vm329_vm1, %v4309_v43  ;;  %v5288_v43 = vpop.f32.mrf.mxu1 }
 0x120   : > { %6509 = vst [vmem:[#allocation32_spill] sm:$0xff] %v5267_v18  ;;  %v4319_v18 = vld [vmem:[%s4828_s15 + $0xc9] sm:$0xff] }
 0x123   : > { %v5221_v30 = vpop.f32.mrf.mxu0 }
 0x124   : > { %6501 = vst [vmem:[#allocation24_spill] sm:$0xff] %v5221_v30  ;;  %v4358_v30 = vld [vmem:[%s4828_s15 + $0x82] sm:$0xff] }
 0x126   : > { %4233 = vmatmul.msk.f32.gmra.mxu0 %vm329_vm1, %v4208_v31  ;;  %4375 = vmatmul.msk.f32.gmra.mxu3 %vm329_vm1, %v4350_v32  ;;  %v4212_v32 = vld [vmem:[%s4828_s15 + $0x60] sm:$0xff] }
 0x127   : > { %4335 = vmatmul.msk.f32.gmra.mxu2 %vm329_vm1, %v4310_v59  ;;  %4289 = vmatmul.msk.f32.gmra.mxu1 %vm329_vm1, %v4310_v59 }
 0x12b   : > { %v5234_v37 = vpop.f32.mrf.mxu0 }
 0x12c   : > { %6503 = vst [vmem:[#allocation26_spill] sm:$0xff] %v5234_v37  ;;  %v4357_v37 = vld [vmem:[%s4828_s15 + $0x7a] sm:$0xff] }
 0x12e   : > { %4234 = vmatmul.msk.f32.gmra.mxu0 %vm329_vm1, %v4209_v40  ;;  %4376 = vmatmul.msk.f32.gmra.mxu3 %vm329_vm1, %v4351_v42  ;;  %v4312_v40 = vld [vmem:[%s4828_s15 + $0x91] sm:$0xff]  ;;  %v5281_v42 = vpop.f32.mrf.mxu3 }
 0x12f   : > { %4336 = vmatmul.msk.f32.gmra.mxu2 %vm329_vm1, %v4311_v15  ;;  %6510 = vst [vmem:[#allocation33_spill] sm:$0xff] %v5281_v42  ;;  %4290 = vmatmul.msk.f32.gmra.mxu1 %vm329_vm1, %v4311_v15  ;;  %v4405_v42 = vld [vmem:[%s4828_s15 + $0x7b] sm:$0xff] }
 0x133   : > { %v5249_v52 = vpop.f32.mrf.mxu0 }
 0x134   : > { %6506 = vst [vmem:[#allocation29_spill] sm:$0xff] %v5249_v52  ;;  %v5308_v52 = vpop.f32.mrf.mxu1 }
 0x135   : > { %6514 = vst [vmem:[#allocation37_spill] sm:$0xff] %v5308_v52  ;;  %v4736_v52 = vmov 0.0  }
 0x136   : > { %4235 = vmatmul.msk.f32.gmra.mxu0 %vm329_vm1, %v4210_v53  ;;  %4377 = vmatmul.msk.f32.gmra.mxu3 %vm329_vm1, %v4352_v54  ;;  %v5285_v53 = vpop.f32.mrf.mxu2  ;;  %2315 = vst.msk [vmem:[#allocation2] sm:$0xff] %vm329_vm1, %v4736_v52 }
 0x137   : > { %4337 = vmatmul.msk.f32.gmra.mxu2 %vm329_vm1, %v4312_v40  ;;  %6511 = vst [vmem:[#allocation34_spill] sm:$0xff] %v5285_v53  ;;  %4291 = vmatmul.msk.f32.gmra.mxu1 %vm329_vm1, %v4312_v40  ;;  %v4216_v40 = vld [vmem:[%s4828_s15 + $0x80] sm:$0xff] }
 0x138   : > { %2316 = vst.msk [vmem:[#allocation2 + $0xbc] sm:$0xff] %vm329_vm1, %v4736_v52 }
 0x13b   : > { %v5260_v61 = vpop.f32.mrf.mxu0 }
 0x13c   : > { %6507 = vst [vmem:[#allocation30_spill] sm:$0xff] %v5260_v61  ;;  %v4356_v61 = vld [vmem:[%s4828_s15 + $0x72] sm:$0xff] }
 0x13e   : > { %4236 = vmatmul.msk.f32.gmra.mxu0 %vm329_vm1, %v4211_v1  ;;  %4378 = vmatmul.msk.f32.gmra.mxu3 %vm329_vm1, %v4353_v2  ;;  %v4213_v1 = vld [vmem:[%s4828_s15 + $0x68] sm:$0xff]  ;;  %v5301_v59 = vpop.f32.mrf.mxu2 }
 0x13f   : > { %v4355_v2 = vld [vmem:[%s4828_s15 + $0x6a] sm:$0xff]  ;;  %4338 = vmatmul.msk.f32.gmra.mxu2 %vm329_vm1, %v4313_v26  ;;  %6513 = vst [vmem:[#allocation36_spill] sm:$0xff] %v5301_v59  ;;  %4292 = vmatmul.msk.f32.gmra.mxu1 %vm329_vm1, %v4313_v26  ;;  %v4735_v59 = vmov 0  }
 0x140   : > { %4689 = vset.pattern.permute.xlu0 %v4735_v59  ;;  %4690 = vset.pattern.permute.xlu1 %v4735_v59 }
 0x141   : > { %4691 = vset.pattern.permute.xlu2 %v4735_v59 }
 0x143   : > { %v5275_v31 = vpop.f32.mrf.mxu0 }
 0x146   : > { %4237 = vmatmul.msk.f32.gmra.mxu0 %vm329_vm1, %v4212_v32  ;;  %4379 = vmatmul.msk.f32.gmra.mxu3 %vm329_vm1, %v4354_v33  ;;  %v5298_v32 = vpop.f32.mrf.mxu3 }
 0x147   : > { %6512 = vst [vmem:[#allocation35_spill] sm:$0xff] %v5298_v32  ;;  %4339 = vmatmul.msk.f32.gmra.mxu2 %vm329_vm1, %v4314_v19 }
 0x14b   : > { %v5290_v54 = vpop.f32.mrf.mxu0 }
 0x14e   : > { %4238 = vmatmul.msk.f32.gmra.mxu0 %vm329_vm1, %v4213_v1  ;;  %4380 = vmatmul.msk.f32.gmra.mxu3 %vm329_vm1, %v4355_v2  ;;  %v5314_v15 = vpop.f32.mrf.mxu3  ;;  %v5316_v1 = vpop.f32.mrf.mxu2 }
 0x14f   : > { %6515 = vst [vmem:[#allocation38_spill] sm:$0xff] %v5314_v15  ;;  %4340 = vmatmul.msk.f32.gmra.mxu2 %vm329_vm1, %v4315_v13 }
 0x150   : > { %6516 = vst [vmem:[#allocation39_spill] sm:$0xff] %v5316_v1 }
 0x153   : > { %v5303_v33 = vpop.f32.mrf.mxu0 }
 0x156   : > { %4239 = vmatmul.msk.f32.gmra.mxu0 %vm329_vm1, %v4214_v22  ;;  %4381 = vmatmul.msk.f32.gmra.mxu3 %vm329_vm1, %v4356_v61  ;;  %v5326_v22 = vpop.f32.mrf.mxu1  ;;  %v5333_v10 = vpop.f32.mrf.mxu3 }
 0x157   : > { %6517 = vst [vmem:[#allocation40_spill] sm:$0xff] %v5326_v22  ;;  %v5336_v1 = vpop.f32.mrf.mxu2  ;;  %4341 = vmatmul.msk.f32.gmra.mxu2 %vm329_vm1, %v4316_v12  ;;  %4293 = vmatmul.msk.f32.gmra.mxu1 %vm329_vm1, %v4314_v19  ;;  %v4406_v22 = vld [vmem:[%s4828_s15 + $0x83] sm:$0xff] }
 0x158   : > { %6518 = vst [vmem:[#allocation41_spill] sm:$0xff] %v5333_v10  ;;  %v4366_v10 = vld [vmem:[%s4828_s15 + $0xc2] sm:$0xff] }
 0x159   : > { %6519 = vst [vmem:[#allocation42_spill] sm:$0xff] %v5336_v1  ;;  %v4317_v1 = vld [vmem:[%s4828_s15 + $0xb9] sm:$0xff] }
 0x15b   : > { %v5318_v2 = vpop.f32.mrf.mxu0 }
 0x15e   : > { %4240 = vmatmul.msk.f32.gmra.mxu0 %vm329_vm1, %v4215_v16  ;;  %4382 = vmatmul.msk.f32.gmra.mxu3 %vm329_vm1, %v4357_v37  ;;  %v5342_v16 = vpop.f32.mrf.mxu1  ;;  %v4217_v37 = vld [vmem:[%s4828_s15 + $0x88] sm:$0xff]  ;;  %v5360_v19 = vpop.f32.mrf.mxu3 }
 0x15f   : > { %6520 = vst [vmem:[#allocation43_spill] sm:$0xff] %v5342_v16  ;;  %4342 = vmatmul.msk.f32.gmra.mxu2 %vm329_vm1, %v4317_v1  ;;  %v5365_v63 = vpop.f32.mrf.mxu2  ;;  %4294 = vmatmul.msk.f32.gmra.mxu1 %vm329_vm1, %v4315_v13  ;;  %v2105_v13 = vld [vmem:[%s5353_s14 + $0x8] sm:$0xff] }
 0x160   : > { %6521 = vst [vmem:[#allocation44_spill] sm:$0xff] %v5360_v19  ;;  %v4361_v19 = vld [vmem:[%s4828_s15 + $0x9a] sm:$0xff] }
 0x161   : > { %6522 = vst [vmem:[#allocation45_spill] sm:$0xff] %v5365_v63  ;;  %v4360_v63 = vld [vmem:[%s4828_s15 + $0x92] sm:$0xff] }
 0x163   : > { %v5329_v61 = vpop.f32.mrf.mxu0 }
 0x166   : > { %4241 = vmatmul.msk.f32.gmra.mxu0 %vm329_vm1, %v4216_v40  ;;  %4383 = vmatmul.msk.f32.gmra.mxu3 %vm329_vm1, %v4358_v30  ;;  %v2359_v30 = vld [vmem:[%s6477_s4] sm:$0xf]  ;;  %v5384_v58 = vpop.f32.mrf.mxu3 }
 0x167   : > { %v2104_v40 = vld [vmem:[%s5353_s14] sm:$0xff]  ;;  %4463 = vmatpush.msk.msra.mxu2 %vm399_vm0, %v2359_v30  ;;  %v4218_v30 = vld [vmem:[%s4828_s15 + $0x90] sm:$0xff]  ;;  %6524 = vst [vmem:[#allocation47_spill] sm:$0xff] %v5384_v58  ;;  %v5387_v59 = vpop.f32.mrf.mxu2 }
 0x168   : > { %2179 = vperm.xlu0 %4689, %v2104_v40   ;;  %v4318_v40 = vld [vmem:[%s4828_s15 + $0xc1] sm:$0xff]  ;;  %6525 = vst [vmem:[#allocation48_spill] sm:$0xff] %v5387_v59 }
 0x169   : > { %4343 = vmatmul.msk.f32.gmra.mxu2 %vm329_vm1, %v4318_v40 }
 0x16b   : > { %v5344_v26 = vpop.f32.mrf.mxu0 }
 0x16e   : > { %4242 = vmatmul.msk.f32.gmra.mxu0 %vm329_vm1, %v4217_v37  ;;  %4384 = vmatmul.msk.f32.gmra.mxu3 %vm329_vm1, %v4359_v6  ;;  %v5373_v6 = vpop.f32.mrf.mxu1 }
 0x16f   : > { %6523 = vst [vmem:[#allocation46_spill] sm:$0xff] %v5373_v6  ;;  %4295 = vmatmul.msk.f32.gmra.mxu1 %vm329_vm1, %v4316_v12  ;;  %v2110_v12 = vld [vmem:[%s5353_s14 + $0x30] sm:$0xff]  ;;  %v5404_v59 = vpop.f32.mrf.mxu2 }
 0x170   : > { %2184 = vperm.xlu0 %4689, %v2105_v13   ;;  %v5402_v13 = vpop.f32.mrf.mxu3  ;;  %6528 = vst [vmem:[#allocation51_spill] sm:$0xff] %v5404_v59  ;;  %v4221_v59 = vld [vmem:[%s4828_s15 + $0xa8] sm:$0xff]  ;;  %v4400_v6 = vld [vmem:[%s4828_s15 + $0x53] sm:$0xff] }
 0x171   : > { %4344 = vmatmul.msk.f32.gmra.mxu2 %vm329_vm1, %v4319_v18  ;;  %6527 = vst [vmem:[#allocation50_spill] sm:$0xff] %v5402_v13  ;;  %v4220_v18 = vld [vmem:[%s4828_s15 + $0xa0] sm:$0xff] }
 0x173   : > { %v5375_v37 = vpop.f32.mrf.mxu0 }
 0x176   : > { %4243 = vmatmul.msk.f32.gmra.mxu0 %vm329_vm1, %v4218_v30  ;;  %4385 = vmatmul.msk.f32.gmra.mxu3 %vm329_vm1, %v4360_v63  ;;  %v5394_v30 = vpop.f32.mrf.mxu1  ;;  %v2106_v63 = vld [vmem:[%s5353_s14 + $0x10] sm:$0xff] }
 0x177   : > { %6526 = vst [vmem:[#allocation49_spill] sm:$0xff] %v5394_v30  ;;  %2189 = vperm.xlu1 %4690, %v2106_v63   ;;  %4296 = vmatmul.msk.f32.gmra.mxu1 %vm329_vm1, %v4317_v1  ;;  %v2107_v1 = vld [vmem:[%s5353_s14 + $0x18] sm:$0xff]  ;;  %v2113_v63 = vld [vmem:[%s5353_s14 + $0x48] sm:$0xff]  ;;  %v5426_v13 = vpop.f32.mrf.mxu2 }
 0x178   : > { %2209 = vperm.xlu0 %4689, %v2110_v12   ;;  %6531 = vst [vmem:[#allocation54_spill] sm:$0xff] %v5426_v13 }
 0x179   : > { %4345 = vmatmul.msk.f32.gmra.mxu2 %vm329_vm1, %v4320_v45  ;;  %v4363_v45 = vld [vmem:[%s4828_s15 + $0xaa] sm:$0xff] }
 0x17b   : > { %v5389_v53 = vpop.f32.mrf.mxu0 }
 0x17e   : > { %4244 = vmatmul.msk.f32.gmra.mxu0 %vm329_vm1, %v4219_v51  ;;  %4386 = vmatmul.msk.f32.gmra.mxu3 %vm329_vm1, %v4361_v19  ;;  %v4362_v51 = vld [vmem:[%s4828_s15 + $0xa2] sm:$0xff]  ;;  %v5415_v19 = vpop.f32.mrf.mxu1 }
 0x17f   : > { %6529 = vst [vmem:[#allocation52_spill] sm:$0xff] %v5415_v19  ;;  %2194 = vperm.xlu1 %4690, %v2107_v1   ;;  %4297 = vmatmul.msk.f32.gmra.mxu1 %vm329_vm1, %v4318_v40  ;;  %v2111_v40 = vld [vmem:[%s5353_s14 + $0x38] sm:$0xff]  ;;  %v2116_v1 = vld [vmem:[%s5353_s14 + $0x60] sm:$0xff] }
 0x180   : > { %2224 = vperm.xlu0 %4689, %v2113_v63   ;;  %v4273_v63 = vld [vmem:[%s4828_s15 + $0xc9] sm:$0xf] }
 0x183   : > { %v5406_v58 = vpop.f32.mrf.mxu0 }
 0x186   : > { %4245 = vmatmul.msk.f32.gmra.mxu0 %vm329_vm1, %v4220_v18  ;;  %4387 = vmatmul.msk.f32.gmra.mxu3 %vm329_vm1, %v4362_v51  ;;  %v5423_v18 = vpop.f32.mrf.mxu3  ;;  %v4321_v51 = vld [vmem:[%s4828_s15 + $0xd9] sm:$0xf]  ;;  %v5434_v19 = vpop.f32.mrf.mxu1 }
 0x187   : > { %6530 = vst [vmem:[#allocation53_spill] sm:$0xff] %v5423_v18  ;;  %4346 = vmatmul.msk.f32.gmra.mxu2 %vm329_vm1, %v4321_v51  ;;  %2214 = vperm.xlu1 %4690, %v2111_v40   ;;  %v4222_v51 = vld [vmem:[%s4828_s15 + $0xb0] sm:$0xff]  ;;  %v2119_v40 = vld [vmem:[%s5353_s14 + $0x78] sm:$0xff] }
 0x188   : > { %2239 = vperm.xlu0 %4689, %v2116_v1   ;;  %6532 = vst [vmem:[#allocation55_spill] sm:$0xff] %v5434_v19  ;;  %4298 = vmatmul.msk.f32.gmra.mxu1 %vm329_vm1, %v4273_v63  ;;  %v4223_v63 = vld [vmem:[%s4828_s15 + $0xb8] sm:$0xff] }
 0x189   : > { %v4365_v19 = vld [vmem:[%s4828_s15 + $0xba] sm:$0xff] }
 0x18b   : > { %v5419_v12 = vpop.f32.mrf.mxu0 }
 0x18e   : > { %4246 = vmatmul.msk.f32.gmra.mxu0 %vm329_vm1, %v4221_v59  ;;  %4388 = vmatmul.msk.f32.gmra.mxu3 %vm329_vm1, %v4363_v45  ;;  %v4364_v59 = vld [vmem:[%s4828_s15 + $0xb2] sm:$0xff]  ;;  %v5441_v18 = vpop.f32.mrf.mxu3  ;;  %v5507_v36 = vpop.f32.mrf.mxu1 }
 0x18f   : > { %6533 = vst [vmem:[#allocation56_spill] sm:$0xff] %v5441_v18  ;;  %v2114_v45 = vld [vmem:[%s5353_s14 + $0x50] sm:$0xff]  ;;  %v2117_v18 = vld [vmem:[%s5353_s14 + $0x68] sm:$0xff] }
 0x190   : > { %2229 = vperm.xlu1 %4690, %v2114_v45   ;;  %2254 = vperm.xlu0 %4689, %v2119_v40   ;;  %v4224_v40 = vld [vmem:[%s4828_s15 + $0xc0] sm:$0xff]  ;;  %6543 = vst [vmem:[#allocation66_spill] sm:$0xff] %v5507_v36 }
 0x193   : > { %v5437_v13 = vpop.f32.mrf.mxu0 }
 0x196   : > { %4247 = vmatmul.msk.f32.gmra.mxu0 %vm329_vm1, %v4222_v51  ;;  %4389 = vmatmul.msk.f32.gmra.mxu3 %vm329_vm1, %v4364_v59  ;;  %v2122_v51 = vld [vmem:[%s5353_s14 + $0x90] sm:$0xff]  ;;  %v5455_v59 = vpop.f32.mrf.mxu3  ;;  %v5516_v38 = vpop.f32.mrf.mxu1 }
 0x197   : > { %6534 = vst [vmem:[#allocation57_spill] sm:$0xff] %v5455_v59  ;;  %v4225_v59 = vld [vmem:[%s4828_s15 + $0xc8] sm:$0xf] }
 0x198   : > { %2244 = vperm.xlu1 %4690, %v2117_v18   ;;  %2269 = vperm.xlu0 %4689, %v2122_v51  }
 0x19b   : > { %v5447_v1 = vpop.f32.mrf.mxu0 }
 0x19e   : > { %4248 = vmatmul.msk.f32.gmra.mxu0 %vm329_vm1, %v4223_v63  ;;  %4390 = vmatmul.msk.f32.gmra.mxu3 %vm329_vm1, %v4365_v19  ;;  %v2120_v19 = vld [vmem:[%s5353_s14 + $0x80] sm:$0xff]  ;;  %v2125_v63 = vld [vmem:[%s5353_s14 + $0xa8] sm:$0xff]  ;;  %v5465_v18 = vpop.f32.mrf.mxu3 }
 0x19f   : > { %6535 = vst [vmem:[#allocation58_spill] sm:$0xff] %v5465_v18  ;;  %v4395_v18 = vld [vmem:[%s4828_s15 + $0x2b] sm:$0xff] }
 0x1a0   : > { %2259 = vperm.xlu1 %4690, %v2120_v19   ;;  %2284 = vperm.xlu0 %4689, %v2125_v63   ;;  %v4368_v63 = vld [vmem:[%s4828_s15 + $0xd2] sm:$0xff] }
 0x1a3   : > { %v5457_v45 = vpop.f32.mrf.mxu0 }
 0x1a6   : > { %4249 = vmatmul.msk.f32.gmra.mxu0 %vm329_vm1, %v4224_v40  ;;  %4391 = vmatmul.msk.f32.gmra.mxu3 %vm329_vm1, %v4366_v10  ;;  %v2108_v10 = vld [vmem:[%s5353_s14 + $0x20] sm:$0xff]  ;;  %v2123_v40 = vld [vmem:[%s5353_s14 + $0x98] sm:$0xff]  ;;  %v5479_v30 = vpop.f32.mrf.mxu3 }
 0x1a7   : > { %2199 = vperm.xlu2 %4691, %v2108_v10   ;;  %6537 = vst [vmem:[#allocation60_spill] sm:$0xff] %v5479_v30 }
 0x1a8   : > { %2274 = vperm.xlu1 %4690, %v2123_v40   ;;  %v4369_v40 = vld [vmem:[%s4828_s15 + $0xda] sm:$0xf] }
 0x1ab   : > { %v5467_v51 = vpop.f32.mrf.mxu0 }
 0x1ae   : > { %4250 = vmatmul.msk.f32.gmra.mxu0 %vm329_vm1, %v4225_v59  ;;  %4392 = vmatmul.msk.f32.gmra.mxu3 %vm329_vm1, %v4367_v48  ;;  %v2109_v48 = vld [vmem:[%s5353_s14 + $0x28] sm:$0xff]  ;;  %v2126_v59 = vld [vmem:[%s5353_s14 + $0xb0] sm:$0xf]  ;;  %v5489_v15 = vpop.f32.mrf.mxu3 }
 0x1af   : > { %2204 = vperm.xlu2 %4691, %v2109_v48   ;;  %6539 = vst [vmem:[#allocation62_spill] sm:$0xff] %v5489_v15  ;;  %v4397_v48 = vld [vmem:[%s4828_s15 + $0x3b] sm:$0xff]  ;;  %v4398_v15 = vld [vmem:[%s4828_s15 + $0x43] sm:$0xff] }
 0x1b0   : > { %2289 = vperm.xlu1 %4690, %v2126_v59   ;;  %v2115_v59 = vld [vmem:[%s5353_s14 + $0x58] sm:$0xff] }
 0x1b3   : > { %v5475_v19 = vpop.f32.mrf.mxu0 }
 0x1b4   : > { %6536 = vst [vmem:[#allocation59_spill] sm:$0xff] %v5475_v19 }
 0x1b6   : > { %4393 = vmatmul.msk.f32.gmra.mxu3 %vm329_vm1, %v4368_v63  ;;  %4420 = vmatmul.msk.f32.vlgmr.msrb.gmra.mxu0 %vm329_vm1, %v4395_v18  ;;  %v2112_v63 = vld [vmem:[%s5353_s14 + $0x40] sm:$0xff] }
 0x1b7   : > { %2219 = vperm.xlu2 %4691, %v2112_v63   ;;  %v4399_v63 = vld [vmem:[%s4828_s15 + $0x4b] sm:$0xff] }
 0x1bb   : > { %v5485_v10 = vpop.f32.mrf.mxu0 }
 0x1bc   : > { %6538 = vst [vmem:[#allocation61_spill] sm:$0xff] %v5485_v10 }
 0x1be   : > { %4394 = vmatmul.msk.f32.gmra.mxu3 %vm329_vm1, %v4369_v40  ;;  %4421 = vmatmul.msk.f32.gmra.mxu0 %vm329_vm1, %v4396_v41  ;;  %v2118_v40 = vld [vmem:[%s5353_s14 + $0x70] sm:$0xff] }
 0x1bf   : > { %2234 = vperm.xlu2 %4691, %v2115_v59   ;;  %v5511_v59 = vpop.f32.mrf.mxu2 }
 0x1c0   : > { %6544 = vst [vmem:[#allocation67_spill] sm:$0xff] %v5511_v59 }
 0x1c3   : > { %v5494_v18 = vpop.f32.mrf.mxu0 }
 0x1c4   : > { %6540 = vst [vmem:[#allocation63_spill] sm:$0xff] %v5494_v18 }
 0x1c6   : > { %4422 = vmatmul.msk.f32.gmra.mxu0 %vm329_vm1, %v4397_v48  ;;  %v2121_v48 = vld [vmem:[%s5353_s14 + $0x88] sm:$0xff] }
 0x1c7   : > { %2249 = vperm.xlu2 %4691, %v2118_v40   ;;  %v5520_v40 = vpop.f32.mrf.mxu3  ;;  %v5522_v36 = vpop.f32.mrf.mxu2 }
 0x1c8   : > { %6546 = vst [vmem:[#allocation69_spill] sm:$0xff] %v5520_v40 }
 0x1cb   : > { %v5499_v30 = vpop.f32.mrf.mxu0 }
 0x1cc   : > { %6541 = vst [vmem:[#allocation64_spill] sm:$0xff] %v5499_v30 }
 0x1ce   : > { %4423 = vmatmul.msk.f32.gmra.mxu0 %vm329_vm1, %v4398_v15  ;;  %v2124_v15 = vld [vmem:[%s5353_s14 + $0xa0] sm:$0xff] }
 0x1cf   : > { %2264 = vperm.xlu2 %4691, %v2121_v48   ;;  %v5528_v48 = vpop.f32.mrf.mxu1  ;;  %v5533_v32 = vpop.f32.mrf.mxu3 }
 0x1d3   : > { %v5504_v41 = vpop.f32.mrf.mxu0 }
 0x1d4   : > { %6542 = vst [vmem:[#allocation65_spill] sm:$0xff] %v5504_v41  ;;  %v4401_v41 = vld [vmem:[%s4828_s15 + $0x5b] sm:$0xff] }
 0x1d6   : > { %4424 = vmatmul.msk.f32.gmra.mxu0 %vm329_vm1, %v4399_v63 }
 0x1d7   : > { %2279 = vperm.xlu2 %4691, %v2124_v15   ;;  %v5538_v15 = vpop.f32.mrf.mxu1  ;;  %v5543_v25 = vpop.f32.mrf.mxu3 }
 0x1db   : > { %v5513_v30 = vpop.f32.mrf.mxu0 }
 0x1dc   : > { %6545 = vst [vmem:[#allocation68_spill] sm:$0xff] %v5513_v30  ;;  %v4402_v30 = vld [vmem:[%s4828_s15 + $0x63] sm:$0xff] }
 0x1de   : > { %4425 = vmatmul.msk.f32.gmra.mxu0 %vm329_vm1, %v4400_v6  ;;  %v5535_v6 = vpop.f32.mrf.mxu2 }
 0x1df   : > { %v5558_v16 = vpop.f32.mrf.mxu3 }
 0x1e3   : > { %v5524_v63 = vpop.f32.mrf.mxu0 }
 0x1e4   : > { %6547 = vst [vmem:[#allocation70_spill] sm:$0xff] %v5524_v63  ;;  %v4403_v63 = vld [vmem:[%s4828_s15 + $0x6b] sm:$0xff] }
 0x1e6   : > { %4426 = vmatmul.msk.f32.gmra.mxu0 %vm329_vm1, %v4401_v41  ;;  %v4482_v41 = vld [vmem:[%s6477_s4 + $0x8] sm:$0xf] }
 0x1e7   : > { %4483 = vmatpush.msk.msra.mxu3 %vm399_vm0, %v4482_v41  ;;  %v5568_v41 = vpop.f32.mrf.mxu3 }
 0x1eb   : > { %v5530_v59 = vpop.f32.mrf.mxu0 }
 0x1ec   : > { %6548 = vst [vmem:[#allocation71_spill] sm:$0xff] %v5530_v59  ;;  %v5549_v59 = vpop.f32.mrf.mxu2 }
 0x1ee   : > { %4427 = vmatmul.msk.f32.gmra.mxu0 %vm329_vm1, %v4402_v30  ;;  %v5552_v30 = vpop.f32.mrf.mxu1 }
 0x1ef   : > { %v5581_v5 = vpop.f32.mrf.mxu3 }
 0x1f3   : > { %v5540_v40 = vpop.f32.mrf.mxu0 }
 0x1f4   : > { %6549 = vst [vmem:[#allocation72_spill] sm:$0xff] %v5540_v40  ;;  %v4404_v40 = vld [vmem:[%s4828_s15 + $0x73] sm:$0xff] }
 0x1f6   : > { %4428 = vmatmul.msk.f32.gmra.mxu0 %vm329_vm1, %v4403_v63  ;;  %v5560_v63 = vpop.f32.mrf.mxu2  ;;  %v5565_v8 = vpop.f32.mrf.mxu1 }
 0x1fb   : > { %v5554_v18 = vpop.f32.mrf.mxu0 }
 0x1fc   : > { %6550 = vst [vmem:[#allocation73_spill] sm:$0xff] %v5554_v18 }
 0x1fe   : > { %4429 = vmatmul.msk.f32.gmra.mxu0 %vm329_vm1, %v4404_v40  ;;  %v5570_v10 = vpop.f32.mrf.mxu2  ;;  %v5576_v40 = vpop.f32.mrf.mxu1 }
 0x203   : > { %v5562_v35 = vpop.f32.mrf.mxu0 }
 0x204   : > { %6551 = vst [vmem:[#allocation74_spill] sm:$0xff] %v5562_v35  ;;  %v4407_v35 = vld [vmem:[%s4828_s15 + $0x8b] sm:$0xff] }
 0x206   : > { %4430 = vmatmul.msk.f32.gmra.mxu0 %vm329_vm1, %v4405_v42  ;;  %v5583_v57 = vpop.f32.mrf.mxu2  ;;  %v5586_v42 = vpop.f32.mrf.mxu1 }
 0x207   : > { %6554 = vst [vmem:[#allocation77_spill] sm:$0xff] %v5586_v42  ;;  %v4409_v42 = vld [vmem:[%s4828_s15 + $0x9b] sm:$0xff] }
 0x20b   : > { %v5572_v18 = vpop.f32.mrf.mxu0 }
 0x20c   : > { %6552 = vst [vmem:[#allocation75_spill] sm:$0xff] %v5572_v18  ;;  %v4408_v18 = vld [vmem:[%s4828_s15 + $0x93] sm:$0xff] }
 0x20e   : > { %4431 = vmatmul.msk.f32.gmra.mxu0 %vm329_vm1, %v4406_v22  ;;  %v5592_v22 = vpop.f32.mrf.mxu3  ;;  %v5601_v47 = vpop.f32.mrf.mxu1 }
 0x20f   : > { %6556 = vst [vmem:[#allocation79_spill] sm:$0xff] %v5592_v22 }
 0x213   : > { %v5578_v29 = vpop.f32.mrf.mxu0 }
 0x214   : > { %6553 = vst [vmem:[#allocation76_spill] sm:$0xff] %v5578_v29  ;;  %v5596_v29 = vpop.f32.mrf.mxu2 }
 0x215   : > { %6557 = vst [vmem:[#allocation80_spill] sm:$0xff] %v5596_v29 }
 0x216   : > { %4432 = vmatmul.msk.f32.gmra.mxu0 %vm329_vm1, %v4407_v35  ;;  %v579_v35 = vadd.f32 %v5170_v55, %v5020_v0  ;;  %v5611_v29 = vpop.f32.mrf.mxu3 }
 0x218   : > { %v832_v27 = vadd.f32 %v5275_v31, %v579_v35  ;;  %v4410_v31 = vld [vmem:[%s4828_s15 + $0xa3] sm:$0xff] }
 0x21a   : > { %v1040_v50 = vadd.f32 %v5132_v39, %v832_v27  ;;  %v4522_v27 = vld [vmem:[%s6477_s4 + $0x10] sm:$0xf]  ;;  %v5626_v39 = vpop.f32.mrf.mxu1 }
 0x21b   : > { %v5588_v19 = vpop.f32.mrf.mxu0  ;;  %4523 = vmatpush.msk.msrb.mxu2 %vm399_vm0, %v4522_v27 }
 0x21c   : > { %6555 = vst [vmem:[#allocation78_spill] sm:$0xff] %v5588_v19  ;;  %v1248_v52 = vadd.f32 %v5389_v53, %v1040_v50  ;;  %v5613_v22 = vpop.f32.mrf.mxu2 }
 0x21e   : > { %4433 = vmatmul.msk.f32.gmra.mxu0 %vm329_vm1, %v4408_v18  ;;  %v582_v18 = vadd.f32 %v5188_v62, %v5028_v4  ;;  %v1456_v35 = vadd.f32 %v5516_v38, %v1248_v52  ;;  %v4502_v4 = vld [vmem:[%s6477_s4 + $0xc] sm:$0xf]  ;;  %v585_v38 = vadd.f32 %v5204_v9, %v5036_v7  ;;  %v5643_v52 = vld [vmem:[%s6476_s3] ss:$0 sm:$0xff] }
 0x21f   : > { %4503 = vmatpush.msk.msrb.mxu1 %vm399_vm0, %v4502_v4 }
 0x220   : > { %v833_v0 = vadd.f32 %v5290_v54, %v582_v18  ;;  %v1664_v62 = vadd.f32 %v5522_v36, %v1456_v35  ;;  %v834_v54 = vadd.f32 %v5303_v33, %v585_v38  ;;  %v5638_v18 = vpop.f32.mrf.mxu3  ;;  %v588_v35 = vadd.f32 %v5219_v28, %v5048_v11 }
 0x222   : > { %v1041_v50 = vadd.f32 %v5146_v44, %v833_v0  ;;  %v1042_v36 = vadd.f32 %v5160_v49, %v834_v54 }
 0x223   : > { %v5603_v19 = vpop.f32.mrf.mxu0 }
 0x224   : > { %v1249_v53 = vadd.f32 %v5406_v58, %v1041_v50  ;;  %v5645_v44 = vpop.f32.mrf.mxu2  ;;  %v2180_v58 = vpop.permute.xlu0 %2179  ;;  %v1250_v4 = vadd.f32 %v5419_v12, %v1042_v36 }
 0x226   : > { %4434 = vmatmul.msk.f32.gmra.mxu0 %vm329_vm1, %v4409_v42  ;;  %v1872_v42 = vadd.f32 %v5533_v32, %v1664_v62  ;;  %v1457_v7 = vadd.f32 %v5528_v48, %v1249_v53  ;;  %v5652_v32 = vpop.f32.mrf.mxu1  ;;  %v835_v48 = vadd.f32 %v5318_v2, %v588_v35  ;;  %v4412_v53 = vld [vmem:[%s4828_s15 + $0xb3] sm:$0xff]  ;;  %v1458_v54 = vadd.f32 %v5538_v15, %v1250_v4 }
 0x228   : > { %v1665_v27 = vadd.f32 %v5535_v6, %v1457_v7  ;;  %v1043_v28 = vadd.f32 %v5176_v56, %v835_v48  ;;  %v1666_v2 = vadd.f32 %v5549_v59, %v1458_v54  ;;  %v2190_v59 = vpop.permute.xlu1 %2189 }
 0x22a   : > { %v1873_v38 = vadd.f32 %v5543_v25, %v1665_v27  ;;  %v591_v25 = vadd.f32 %v5239_v46, %v5056_v14  ;;  %v1251_v6 = vadd.f32 %v5437_v13, %v1043_v28  ;;  %v1874_v36 = vadd.f32 %v5558_v16, %v1666_v2  ;;  %v4413_v27 = vld [vmem:[%s4828_s15 + $0xbb] sm:$0xff] }
 0x22b   : > { %v5616_v55 = vpop.f32.mrf.mxu0 }
 0x22c   : > { %v5665_v11 = vpop.f32.mrf.mxu2  ;;  %v2185_v7 = vpop.permute.xlu0 %2184  ;;  %v1459_v4 = vadd.f32 %v5552_v30, %v1251_v6  ;;  %v594_v30 = vadd.f32 %v5257_v60, %v5064_v17  ;;  %v4562_v60 = vld [vmem:[%s6477_s4 + $0x18] sm:$0xf] }
 0x22d   : > { %4563 = vmatpush.msk.msra.mxu0 %vm399_vm0, %v4562_v60  ;;  %v6563_v60 = vld [vmem:[#allocation37_spill] sm:$0xff] }
 0x22e   : > { %4435 = vmatmul.msk.f32.gmra.mxu0 %vm329_vm1, %v4410_v31  ;;  %v4411_v31 = vld [vmem:[%s4828_s15 + $0xab] sm:$0xff] }
 0x233   : > { %v2011_v0 = vpop.f32.mrf.mxu0 }
 0x234   : > { %v2080_v9 = vadd.f32 %v2011_v0, %v1872_v42  ;;  %v5662_v42 = vpop.f32.mrf.mxu3  ;;  %v5688_v13 = vpop.f32.mrf.mxu2 }
 0x236   : > { %v2131_v33 = vadd.f32 %v5643_v52, %v2080_v9  ;;  %4436 = vmatmul.msk.f32.gmra.mxu0 %vm329_vm1, %v4411_v31  ;;  %v5674_v31 = vpop.f32.mrf.mxu1  ;;  %v836_v9 = vadd.f32 %v5329_v61, %v591_v25 }
 0x238   : > { %v2154_v50 = vmax.f32 %v2131_v33, 0.0  ;;  %v1044_v46 = vadd.f32 %v5195_v3, %v836_v9  ;;  %v2195_v9 = vpop.permute.xlu1 %2194 }
 0x23a   : > { %v2292_v49 = vmul.f32 %v2180_v58, %v2154_v50  ;;  %v1667_v50 = vadd.f32 %v5560_v63, %v1459_v4  ;;  %v1252_v48 = vadd.f32 %v5447_v1, %v1044_v46  ;;  %v2200_v4 = vpop.permute.xlu2 %2199 }
 0x23b   : > { %v2014_v62 = vpop.f32.mrf.mxu0 }
 0x23c   : > { %2317 = vst.msk [vmem:[#allocation2 + $0x8] sm:$0xff] %vm329_vm1, %v2292_v49  ;;  %v2081_v0 = vadd.f32 %v2014_v62, %v1873_v38  ;;  %v5684_v61 = vpop.f32.mrf.mxu3  ;;  %v837_v49 = vadd.f32 %v5344_v26, %v594_v30  ;;  %v1875_v3 = vadd.f32 %v5568_v41, %v1667_v50  ;;  %v1460_v2 = vadd.f32 %v5565_v8, %v1252_v48 }
 0x23d   : > { %v597_v8 = vadd.f32 %v5273_v21, %v5072_v20 }
 0x23e   : > { %v2132_v12 = vadd.f32 %v5643_v52, %v2081_v0  ;;  %4437 = vmatmul.msk.f32.gmra.mxu0 %vm329_vm1, %v4412_v53  ;;  %v4414_v53 = vld [vmem:[%s4828_s15 + $0xc3] sm:$0xff]  ;;  %v5697_v54 = vpop.f32.mrf.mxu1  ;;  %v1045_v26 = vadd.f32 %v5212_v24, %v837_v49  ;;  %v1668_v63 = vadd.f32 %v5570_v10, %v1460_v2 }
 0x23f   : > { %v838_v24 = vadd.f32 %v5375_v37, %v597_v8 }
 0x240   : > { %v2155_v15 = vmax.f32 %v2132_v12, 0.0  ;;  %v1253_v41 = vadd.f32 %v5457_v45, %v1045_v26 }
 0x242   : > { %v2293_v56 = vmul.f32 %v2185_v7, %v2155_v15  ;;  %v5717_v7 = vpop.f32.mrf.mxu2  ;;  %v1461_v21 = vadd.f32 %v5576_v40, %v1253_v41  ;;  %v600_v40 = vadd.f32 %v5288_v43, %v5080_v23  ;;  %v6560_v43 = vld [vmem:[#allocation77_spill] sm:$0xff] }
 0x243   : > { %v2017_v33 = vpop.f32.mrf.mxu0  ;;  %v2360_v58 = vld [vmem:[#allocation2 + $0x8] sm:$0xff] }
 0x244   : > { %v2341_v35 = vld [vmem:[#allocation2 + $0x7] sm:$0xff]  ;;  %2318 = vst.msk [vmem:[#allocation2 + $0x10] sm:$0xff] %vm329_vm1, %v2293_v56  ;;  %v2082_v14 = vadd.f32 %v2017_v33, %v1874_v36  ;;  %4445 = vmatmul.msk.f32.vlgmr.msra.gmra.mxu1 %vm329_vm1, %v2360_v58  ;;  %v5715_v6 = vpop.f32.mrf.mxu3  ;;  %v1876_v36 = vadd.f32 %v5581_v5, %v1668_v63  ;;  %v1046_v5 = vadd.f32 %v5229_v34, %v838_v24 }
 0x245   : > { %4464 = vmatmul.msk.f32.vlgmr.msra.gmra.mxu2 %vm329_vm1, %v2341_v35  ;;  %v4415_v33 = vld [vmem:[%s4828_s15 + $0xcb] sm:$0xff] }
 0x246   : > { %v2133_v16 = vadd.f32 %v5643_v52, %v2082_v14  ;;  %4438 = vmatmul.msk.f32.gmra.mxu0 %vm329_vm1, %v4413_v27  ;;  %v5726_v10 = vpop.f32.mrf.mxu1  ;;  %v1669_v14 = vadd.f32 %v5583_v57, %v1461_v21  ;;  %v1254_v46 = vadd.f32 %v5467_v51, %v1046_v5  ;;  %v6565_v63 = vld [vmem:[#allocation59_spill] sm:$0xff] }
 0x248   : > { %v2156_v38 = vmax.f32 %v2133_v16, 0.0  ;;  %v1462_v57 = vadd.f32 %v6560_v43, %v1254_v46  ;;  %v6569_v46 = vld [vmem:[#allocation40_spill] sm:$0xff] }
 0x24a   : > { %v2294_v62 = vmul.f32 %v2190_v59, %v2156_v38  ;;  %v6558_v59 = vld [vmem:[#allocation79_spill] sm:$0xff]  ;;  %v4416_v38 = vld [vmem:[%s4828_s15 + $0xd3] sm:$0xff]  ;;  %v5740_v34 = vpop.f32.mrf.mxu2 }
 0x24b   : > { %v2020_v0 = vpop.f32.mrf.mxu0  ;;  %v2361_v28 = vld [vmem:[#allocation2 + $0x10] sm:$0xff]  ;;  %v1877_v30 = vadd.f32 %v6558_v59, %v1669_v14 }
 0x24c   : > { %v2342_v12 = vld [vmem:[#allocation2 + $0xf] sm:$0xff]  ;;  %2319 = vst.msk [vmem:[#allocation2 + $0x18] sm:$0xff] %vm329_vm1, %v2294_v62  ;;  %v2083_v17 = vadd.f32 %v2020_v0, %v1875_v3  ;;  %4446 = vmatmul.msk.f32.gmra.mxu1 %vm329_vm1, %v2361_v28  ;;  %v5737_v50 = vpop.f32.mrf.mxu3 }
 0x24d   : > { %v2636_v25 = vld [vmem:[#allocation2 + $0x9] sm:$0xff]  ;;  %4465 = vmatmul.msk.f32.gmra.mxu2 %vm329_vm1, %v2342_v12 }
 0x24e   : > { %4484 = vmatmul.msk.f32.vlgmr.msra.gmra.mxu3 %vm329_vm1, %v2636_v25  ;;  %v2134_v1 = vadd.f32 %v5643_v52, %v2083_v17  ;;  %4439 = vmatmul.msk.f32.gmra.mxu0 %vm329_vm1, %v4414_v53  ;;  %v6559_v0 = vld [vmem:[#allocation16_spill] sm:$0xff]  ;;  %v6561_v28 = vld [vmem:[#allocation27_spill] sm:$0xff]  ;;  %v5754_v2 = vpop.f32.mrf.mxu1  ;;  %v6562_v17 = vld [vmem:[#allocation10_spill] sm:$0xff] }
 0x24f   : > { %v839_v23 = vadd.f32 %v6559_v0, %v600_v40  ;;  %v603_v26 = vadd.f32 %v6563_v60, %v6562_v17  ;;  %v6572_v17 = vld [vmem:[#allocation33_spill] sm:$0xff] }
 0x250   : > { %v2157_v15 = vmax.f32 %v2134_v1, 0.0  ;;  %v6564_v1 = vld [vmem:[#allocation80_spill] sm:$0xff] }
 0x251   : > { %v1047_v12 = vadd.f32 %v6561_v28, %v839_v23  ;;  %v1670_v8 = vadd.f32 %v6564_v1, %v1462_v57  ;;  %v6571_v28 = vld [vmem:[#allocation21_spill] sm:$0xff] }
 0x252   : > { %v2295_v56 = vmul.f32 %v2195_v9, %v2157_v15  ;;  %v2205_v9 = vpop.permute.xlu2 %2204 }
 0x253   : > { %v2023_v58 = vpop.f32.mrf.mxu0  ;;  %v2362_v35 = vld [vmem:[#allocation2 + $0x18] sm:$0xff]  ;;  %v1255_v41 = vadd.f32 %v6565_v63, %v1047_v12  ;;  %v1878_v24 = vadd.f32 %v5611_v29, %v1670_v8  ;;  %v5771_v29 = vpop.f32.mrf.mxu2  ;;  %v6573_v8 = vld [vmem:[#allocation12_spill] sm:$0xff]  ;;  %v6574_v63 = vld [vmem:[#allocation43_spill] sm:$0xff] }
 0x254   : > { %v2343_v27 = vld [vmem:[#allocation2 + $0x17] sm:$0xff]  ;;  %2320 = vst.msk [vmem:[#allocation2 + $0x20] sm:$0xff] %vm329_vm1, %v2295_v56  ;;  %v2084_v45 = vadd.f32 %v2023_v58, %v1876_v36  ;;  %4447 = vmatmul.msk.f32.gmra.mxu1 %vm329_vm1, %v2362_v35  ;;  %v5766_v5 = vpop.f32.mrf.mxu3 }
 0x255   : > { %v2637_v20 = vld [vmem:[#allocation2 + $0x11] sm:$0xff]  ;;  %4466 = vmatmul.msk.f32.gmra.mxu2 %vm329_vm1, %v2343_v27  ;;  %v4417_v56 = vld [vmem:[%s4828_s15 + $0xdb] sm:$0xf] }
 0x256   : > { %4485 = vmatmul.msk.f32.gmra.mxu3 %vm329_vm1, %v2637_v20  ;;  %v2135_v37 = vadd.f32 %v5643_v52, %v2084_v45  ;;  %4440 = vmatmul.msk.f32.gmra.mxu0 %vm329_vm1, %v4415_v33  ;;  %v6566_v20 = vld [vmem:[#allocation18_spill] sm:$0xff]  ;;  %v1463_v45 = vadd.f32 %v5601_v47, %v1255_v41  ;;  %v6568_v47 = vld [vmem:[#allocation11_spill] sm:$0xff]  ;;  %v609_v41 = vadd.f32 %v6574_v63, %v6573_v8 }
 0x257   : > { %v840_v21 = vadd.f32 %v6566_v20, %v603_v26 }
 0x258   : > { %v2158_v16 = vmax.f32 %v2135_v37, 0.0  ;;  %v1671_v59 = vadd.f32 %v5613_v22, %v1463_v45 }
 0x25a   : > { %v2296_v48 = vmul.f32 %v2200_v4, %v2158_v16  ;;  %v6567_v4 = vld [vmem:[#allocation31_spill] sm:$0xff]  ;;  %v606_v16 = vadd.f32 %v6569_v46, %v6568_v47 }
 0x25b   : > { %v2026_v49 = vpop.f32.mrf.mxu0  ;;  %v2363_v3 = vld [vmem:[#allocation2 + $0x20] sm:$0xff]  ;;  %v1048_v40 = vadd.f32 %v6567_v4, %v840_v21  ;;  %v6576_v4 = vld [vmem:[#allocation23_spill] sm:$0xff] }
 0x25c   : > { %v2344_v62 = vld [vmem:[#allocation2 + $0x1f] sm:$0xff]  ;;  %2321 = vst.msk [vmem:[#allocation2 + $0x28] sm:$0xff] %vm329_vm1, %v2296_v48  ;;  %v2085_v51 = vadd.f32 %v2026_v49, %v1877_v30  ;;  %4448 = vmatmul.msk.f32.gmra.mxu1 %vm329_vm1, %v2363_v3  ;;  %v5782_v49 = vpop.f32.mrf.mxu1  ;;  %v2210_v3 = vpop.permute.xlu0 %2209  ;;  %v841_v12 = vadd.f32 %v6571_v28, %v606_v16  ;;  %v6577_v47 = vld [vmem:[#allocation35_spill] sm:$0xff] }
 0x25d   : > { %v5742_v53 = vld [vmem:[#allocation2 + $0x19] sm:$0xff]  ;;  %4467 = vmatmul.msk.f32.gmra.mxu2 %vm329_vm1, %v2344_v62  ;;  %v1879_v62 = vadd.f32 %v5638_v18, %v1671_v59  ;;  %v5797_v26 = vpop.f32.mrf.mxu3 }
 0x25e   : > { %4486 = vmatmul.msk.f32.gmra.mxu3 %vm329_vm1, %v5742_v53  ;;  %v2136_v25 = vadd.f32 %v5643_v52, %v2085_v51  ;;  %4441 = vmatmul.msk.f32.gmra.mxu0 %vm329_vm1, %v4416_v38  ;;  %v6570_v30 = vld [vmem:[#allocation61_spill] sm:$0xff]  ;;  %v1049_v60 = vadd.f32 %v6572_v17, %v841_v12  ;;  %v6579_v59 = vld [vmem:[#allocation46_spill] sm:$0xff] }
 0x25f   : > { %v1256_v48 = vadd.f32 %v6570_v30, %v1048_v40  ;;  %v842_v40 = vadd.f32 %v6576_v4, %v609_v41  ;;  %v6582_v41 = vld [vmem:[#allocation38_spill] sm:$0xff] }
 0x260   : > { %v2159_v15 = vmax.f32 %v2136_v25, 0.0 }
 0x261   : > { %v1464_v25 = vadd.f32 %v5626_v39, %v1256_v48  ;;  %v5802_v39 = vpop.f32.mrf.mxu2  ;;  %v1050_v46 = vadd.f32 %v6577_v47, %v842_v40 }
 0x262   : > { %v2297_v36 = vmul.f32 %v2205_v9, %v2159_v15  ;;  %v6575_v9 = vld [vmem:[#allocation63_spill] sm:$0xff] }
 0x263   : > { %v2029_v33 = vpop.f32.mrf.mxu0  ;;  %v2364_v58 = vld [vmem:[#allocation2 + $0x28] sm:$0xff]  ;;  %v1672_v15 = vadd.f32 %v5645_v44, %v1464_v25 }
 0x264   : > { %v2345_v35 = vld [vmem:[#allocation2 + $0x27] sm:$0xff]  ;;  %2322 = vst.msk [vmem:[#allocation2 + $0x30] sm:$0xff] %vm329_vm1, %v2297_v36  ;;  %v2086_v37 = vadd.f32 %v2029_v33, %v1878_v24  ;;  %4449 = vmatmul.msk.f32.gmra.mxu1 %vm329_vm1, %v2364_v58  ;;  %v1257_v24 = vadd.f32 %v6575_v9, %v1049_v60  ;;  %v6581_v60 = vld [vmem:[#allocation25_spill] sm:$0xff] }
 0x265   : > { %v5762_v27 = vld [vmem:[#allocation2 + $0x21] sm:$0xff]  ;;  %4468 = vmatmul.msk.f32.gmra.mxu2 %vm329_vm1, %v2345_v35  ;;  %v1880_v33 = vadd.f32 %v5662_v42, %v1672_v15  ;;  %v5809_v35 = vpop.f32.mrf.mxu1 }
 0x266   : > { %4487 = vmatmul.msk.f32.gmra.mxu3 %vm329_vm1, %v5762_v27  ;;  %v2137_v14 = vadd.f32 %v5643_v52, %v2086_v37  ;;  %4442 = vmatmul.msk.f32.gmra.mxu0 %vm329_vm1, %v4417_v56  ;;  %v2215_v56 = vpop.permute.xlu1 %2214 }
 0x268   : > { %v2160_v38 = vmax.f32 %v2137_v14, 0.0  ;;  %v1465_v14 = vadd.f32 %v5652_v32, %v1257_v24  ;;  %v6578_v32 = vld [vmem:[#allocation13_spill] sm:$0xff] }
 0x269   : > { %v612_v30 = vadd.f32 %v6579_v59, %v6578_v32  ;;  %v6584_v24 = vld [vmem:[#allocation49_spill] sm:$0xff]  ;;  %v6586_v32 = vld [vmem:[#allocation28_spill] sm:$0xff] }
 0x26a   : > { %v2298_v0 = vmul.f32 %v2210_v3, %v2160_v38  ;;  %v1673_v48 = vadd.f32 %v5665_v11, %v1465_v14  ;;  %v6580_v38 = vld [vmem:[#allocation64_spill] sm:$0xff] }
 0x26b   : > { %v2032_v23 = vpop.f32.mrf.mxu0  ;;  %v2365_v43 = vld [vmem:[#allocation2 + $0x30] sm:$0xff]  ;;  %v1258_v3 = vadd.f32 %v6580_v38, %v1050_v46 }
 0x26c   : > { %v2346_v57 = vld [vmem:[#allocation2 + $0x2f] sm:$0xff]  ;;  %2323 = vst.msk [vmem:[#allocation2 + $0x38] sm:$0xff] %vm329_vm1, %v2298_v0  ;;  %v2087_v22 = vadd.f32 %v2032_v23, %v1879_v62  ;;  %4450 = vmatmul.msk.f32.gmra.mxu1 %vm329_vm1, %v2365_v43  ;;  %v5830_v62 = vpop.f32.mrf.mxu3  ;;  %v5832_v23 = vpop.f32.mrf.mxu2 }
 0x26d   : > { %v5785_v51 = vld [vmem:[#allocation2 + $0x29] sm:$0xff]  ;;  %4469 = vmatmul.msk.f32.gmra.mxu2 %vm329_vm1, %v2346_v57  ;;  %v2220_v43 = vpop.permute.xlu2 %2219  ;;  %v1881_v57 = vadd.f32 %v5684_v61, %v1673_v48  ;;  %v1466_v11 = vadd.f32 %v5674_v31, %v1258_v3  ;;  %v5842_v63 = vpop.f32.mrf.mxu1  ;;  %v6583_v31 = vld [vmem:[#allocation14_spill] sm:$0xff]  ;;  %v6587_v48 = vld [vmem:[#allocation41_spill] sm:$0xff] }
 0x26e   : > { %4488 = vmatmul.msk.f32.gmra.mxu3 %vm329_vm1, %v5785_v51  ;;  %v5794_v18 = vld [vmem:[#allocation2 + $0x2b] sm:$0xff]  ;;  %v2138_v1 = vadd.f32 %v5643_v52, %v2087_v22 }
 0x26f   : > { %4564 = vmatmul.msk.f32.vlgmr.msra.gmra.mxu0 %vm329_vm1, %v5794_v18 }
 0x270   : > { %v2161_v36 = vmax.f32 %v2138_v1, 0.0  ;;  %v843_v1 = vadd.f32 %v6581_v60, %v612_v30  ;;  %v2230_v60 = vpop.permute.xlu1 %2229 }
 0x272   : > { %v2299_v58 = vmul.f32 %v2215_v56, %v2161_v36  ;;  %v1051_v15 = vadd.f32 %v6582_v41, %v843_v1  ;;  %v615_v36 = vadd.f32 %v6584_v24, %v6583_v31  ;;  %v1674_v56 = vadd.f32 %v5688_v13, %v1466_v11  ;;  %v6591_v31 = vld [vmem:[#allocation32_spill] sm:$0xff] }
 0x273   : > { %v2035_v20 = vpop.f32.mrf.mxu0  ;;  %v2366_v21 = vld [vmem:[#allocation2 + $0x38] sm:$0xff] }
 0x274   : > { %v2347_v45 = vld [vmem:[#allocation2 + $0x37] sm:$0xff]  ;;  %2324 = vst.msk [vmem:[#allocation2 + $0x40] sm:$0xff] %vm329_vm1, %v2299_v58  ;;  %v2088_v44 = vadd.f32 %v2035_v20, %v1880_v33  ;;  %4451 = vmatmul.msk.f32.gmra.mxu1 %vm329_vm1, %v2366_v21  ;;  %v2225_v21 = vpop.permute.xlu0 %2224  ;;  %v5857_v4 = vpop.f32.mrf.mxu3  ;;  %v844_v59 = vadd.f32 %v6586_v32, %v615_v36 }
 0x275   : > { %v5811_v37 = vld [vmem:[#allocation2 + $0x31] sm:$0xff]  ;;  %4470 = vmatmul.msk.f32.gmra.mxu2 %vm329_vm1, %v2347_v45  ;;  %v1882_v45 = vadd.f32 %v5715_v6, %v1674_v56  ;;  %v5859_v14 = vpop.f32.mrf.mxu2 }
 0x276   : > { %4489 = vmatmul.msk.f32.gmra.mxu3 %vm329_vm1, %v5811_v37  ;;  %v5820_v42 = vld [vmem:[#allocation2 + $0x33] sm:$0xff]  ;;  %v2139_v16 = vadd.f32 %v5643_v52, %v2088_v44  ;;  %v1052_v38 = vadd.f32 %v6587_v48, %v844_v59 }
 0x277   : > { %4565 = vmatmul.msk.f32.gmra.mxu0 %vm329_vm1, %v5820_v42  ;;  %v6585_v33 = vld [vmem:[#allocation65_spill] sm:$0xff] }
 0x278   : > { %v2162_v0 = vmax.f32 %v2139_v16, 0.0  ;;  %v1259_v58 = vadd.f32 %v6585_v33, %v1051_v15 }
 0x27a   : > { %v2300_v28 = vmul.f32 %v2220_v43, %v2162_v0  ;;  %v1467_v13 = vadd.f32 %v5697_v54, %v1259_v58  ;;  %v5876_v54 = vpop.f32.mrf.mxu1  ;;  %v6588_v0 = vld [vmem:[#allocation15_spill] sm:$0xff]  ;;  %v6589_v43 = vld [vmem:[#allocation52_spill] sm:$0xff] }
 0x27b   : > { %v2038_v12 = vpop.f32.mrf.mxu0  ;;  %v2367_v25 = vld [vmem:[#allocation2 + $0x40] sm:$0xff]  ;;  %v6592_v58 = vld [vmem:[#allocation44_spill] sm:$0xff] }
 0x27c   : > { %v2348_v22 = vld [vmem:[#allocation2 + $0x3f] sm:$0xff]  ;;  %2325 = vst.msk [vmem:[#allocation2 + $0x48] sm:$0xff] %vm329_vm1, %v2300_v28  ;;  %v2089_v8 = vadd.f32 %v2038_v12, %v1881_v57  ;;  %4452 = vmatmul.msk.f32.gmra.mxu1 %vm329_vm1, %v2367_v25  ;;  %v618_v57 = vadd.f32 %v6589_v43, %v6588_v0  ;;  %v1675_v28 = vadd.f32 %v5717_v7, %v1467_v13  ;;  %v6590_v12 = vld [vmem:[#allocation68_spill] sm:$0xff]  ;;  %v5887_v56 = vpop.f32.mrf.mxu3  ;;  %v2235_v13 = vpop.permute.xlu2 %2234 }
 0x27d   : > { %v5835_v17 = vld [vmem:[#allocation2 + $0x39] sm:$0xff]  ;;  %4471 = vmatmul.msk.f32.gmra.mxu2 %vm329_vm1, %v2348_v22  ;;  %v1260_v25 = vadd.f32 %v6590_v12, %v1052_v38 }
 0x27e   : > { %4490 = vmatmul.msk.f32.gmra.mxu3 %vm329_vm1, %v5835_v17  ;;  %v5846_v61 = vld [vmem:[#allocation2 + $0x3b] sm:$0xff]  ;;  %v2140_v9 = vadd.f32 %v5643_v52, %v2089_v8  ;;  %v1883_v1 = vadd.f32 %v5737_v50, %v1675_v28  ;;  %v845_v24 = vadd.f32 %v6591_v31, %v618_v57  ;;  %v5892_v50 = vpop.f32.mrf.mxu2  ;;  %v6600_v31 = vld [vmem:[#allocation71_spill] sm:$0xff] }
 0x27f   : > { %4566 = vmatmul.msk.f32.gmra.mxu0 %vm329_vm1, %v5846_v61  ;;  %v1468_v36 = vadd.f32 %v5726_v10, %v1260_v25  ;;  %v6596_v57 = vld [vmem:[#allocation34_spill] sm:$0xff]  ;;  %v6597_v25 = vld [vmem:[#allocation47_spill] sm:$0xff] }
 0x280   : > { %v2163_v20 = vmax.f32 %v2140_v9, 0.0 }
 0x282   : > { %v2301_v40 = vmul.f32 %v2225_v21, %v2163_v20  ;;  %v1053_v20 = vadd.f32 %v6592_v58, %v845_v24  ;;  %v6593_v21 = vld [vmem:[#allocation17_spill] sm:$0xff]  ;;  %v5906_v59 = vpop.f32.mrf.mxu1 }
 0x283   : > { %v2041_v44 = vpop.f32.mrf.mxu0  ;;  %v2368_v47 = vld [vmem:[#allocation2 + $0x48] sm:$0xff] }
 0x284   : > { %v2349_v46 = vld [vmem:[#allocation2 + $0x47] sm:$0xff]  ;;  %2326 = vst.msk [vmem:[#allocation2 + $0x50] sm:$0xff] %vm329_vm1, %v2301_v40  ;;  %v2090_v30 = vadd.f32 %v2041_v44, %v1882_v45  ;;  %4453 = vmatmul.msk.f32.gmra.mxu1 %vm329_vm1, %v2368_v47  ;;  %v1676_v44 = vadd.f32 %v5740_v34, %v1468_v36 }
 0x285   : > { %v5861_v16 = vld [vmem:[#allocation2 + $0x41] sm:$0xff]  ;;  %4472 = vmatmul.msk.f32.gmra.mxu2 %vm329_vm1, %v2349_v46 }
 0x286   : > { %4491 = vmatmul.msk.f32.gmra.mxu3 %vm329_vm1, %v5861_v16  ;;  %v5870_v6 = vld [vmem:[#allocation2 + $0x43] sm:$0xff]  ;;  %v2141_v3 = vadd.f32 %v5643_v52, %v2090_v30  ;;  %v1884_v30 = vadd.f32 %v5766_v5, %v1676_v44 }
 0x287   : > { %4567 = vmatmul.msk.f32.gmra.mxu0 %vm329_vm1, %v5870_v6  ;;  %v6594_v45 = vld [vmem:[#allocation55_spill] sm:$0xff]  ;;  %v6595_v47 = vld [vmem:[#allocation70_spill] sm:$0xff] }
 0x288   : > { %v2164_v22 = vmax.f32 %v2141_v3, 0.0  ;;  %v621_v40 = vadd.f32 %v6594_v45, %v6593_v21  ;;  %v1261_v46 = vadd.f32 %v6595_v47, %v1053_v20  ;;  %v6601_v47 = vld [vmem:[#allocation36_spill] sm:$0xff] }
 0x28a   : > { %v2302_v11 = vmul.f32 %v2230_v60, %v2164_v22  ;;  %v846_v28 = vadd.f32 %v6596_v57, %v621_v40  ;;  %v1469_v12 = vadd.f32 %v5754_v2, %v1261_v46  ;;  %v5921_v60 = vpop.f32.mrf.mxu3  ;;  %v5926_v2 = vpop.f32.mrf.mxu2  ;;  %v6605_v57 = vld [vmem:[#allocation72_spill] sm:$0xff] }
 0x28b   : > { %v2044_v8 = vpop.f32.mrf.mxu0  ;;  %v2369_v41 = vld [vmem:[#allocation2 + $0x50] sm:$0xff] }
 0x28c   : > { %v2350_v15 = vld [vmem:[#allocation2 + $0x4f] sm:$0xff]  ;;  %2327 = vst.msk [vmem:[#allocation2 + $0x58] sm:$0xff] %vm329_vm1, %v2302_v11  ;;  %v2091_v7 = vadd.f32 %v2044_v8, %v1883_v1  ;;  %4454 = vmatmul.msk.f32.gmra.mxu1 %vm329_vm1, %v2369_v41  ;;  %v1054_v22 = vadd.f32 %v6597_v25, %v846_v28  ;;  %v6599_v8 = vld [vmem:[#allocation66_spill] sm:$0xff] }
 0x28d   : > { %v5883_v9 = vld [vmem:[#allocation2 + $0x49] sm:$0xff]  ;;  %4473 = vmatmul.msk.f32.gmra.mxu2 %vm329_vm1, %v2350_v15  ;;  %v1677_v15 = vadd.f32 %v5771_v29, %v1469_v12 }
 0x28e   : > { %4492 = vmatmul.msk.f32.gmra.mxu3 %vm329_vm1, %v5883_v9  ;;  %v5896_v33 = vld [vmem:[#allocation2 + $0x4b] sm:$0xff]  ;;  %v2142_v10 = vadd.f32 %v5643_v52, %v2091_v7  ;;  %v1262_v24 = vadd.f32 %v6600_v31, %v1054_v22  ;;  %v2240_v7 = vpop.permute.xlu0 %2239  ;;  %v2245_v22 = vpop.permute.xlu1 %2244 }
 0x28f   : > { %4568 = vmatmul.msk.f32.gmra.mxu0 %vm329_vm1, %v5896_v33  ;;  %v6598_v11 = vld [vmem:[#allocation19_spill] sm:$0xff]  ;;  %v1885_v58 = vadd.f32 %v5797_v26, %v1677_v15 }
 0x290   : > { %v2165_v32 = vmax.f32 %v2142_v10, 0.0  ;;  %v624_v41 = vadd.f32 %v6599_v8, %v6598_v11  ;;  %v5933_v10 = vpop.f32.mrf.mxu1 }
 0x292   : > { %v2303_v48 = vmul.f32 %v2235_v13, %v2165_v32  ;;  %v847_v46 = vadd.f32 %v6601_v47, %v624_v41  ;;  %v1470_v32 = vadd.f32 %v5782_v49, %v1262_v24  ;;  %v6602_v13 = vld [vmem:[#allocation50_spill] sm:$0xff]  ;;  %v6603_v49 = vld [vmem:[#allocation20_spill] sm:$0xff]  ;;  %v5954_v12 = vpop.f32.mrf.mxu3  ;;  %v5956_v25 = vpop.f32.mrf.mxu2  ;;  %v6606_v24 = vld [vmem:[#allocation39_spill] sm:$0xff] }
 0x293   : > { %v2047_v38 = vpop.f32.mrf.mxu0  ;;  %v2370_v3 = vld [vmem:[#allocation2 + $0x58] sm:$0xff] }
 0x294   : > { %v2351_v0 = vld [vmem:[#allocation2 + $0x57] sm:$0xff]  ;;  %2328 = vst.msk [vmem:[#allocation2 + $0x60] sm:$0xff] %vm329_vm1, %v2303_v48  ;;  %v2092_v34 = vadd.f32 %v2047_v38, %v1884_v30  ;;  %4455 = vmatmul.msk.f32.gmra.mxu1 %vm329_vm1, %v2370_v3  ;;  %v1055_v30 = vadd.f32 %v6602_v13, %v847_v46  ;;  %v6604_v38 = vld [vmem:[#allocation3_spill] sm:$0xff] }
 0x295   : > { %v5909_v43 = vld [vmem:[#allocation2 + $0x51] sm:$0xff]  ;;  %4474 = vmatmul.msk.f32.gmra.mxu2 %vm329_vm1, %v2351_v0  ;;  %v627_v3 = vadd.f32 %v6604_v38, %v6603_v49  ;;  %v1678_v0 = vadd.f32 %v5802_v39, %v1470_v32 }
 0x296   : > { %4493 = vmatmul.msk.f32.gmra.mxu3 %vm329_vm1, %v5909_v43  ;;  %v5918_v5 = vld [vmem:[#allocation2 + $0x53] sm:$0xff]  ;;  %v2143_v1 = vadd.f32 %v5643_v52, %v2092_v34  ;;  %v1263_v28 = vadd.f32 %v6605_v57, %v1055_v30  ;;  %v2250_v30 = vpop.permute.xlu2 %2249 }
 0x297   : > { %4569 = vmatmul.msk.f32.gmra.mxu0 %vm329_vm1, %v5918_v5  ;;  %v6610_v32 = vld [vmem:[#allocation73_spill] sm:$0xff] }
 0x298   : > { %v2166_v36 = vmax.f32 %v2143_v1, 0.0  ;;  %v1886_v1 = vadd.f32 %v5830_v62, %v1678_v0  ;;  %v1471_v39 = vadd.f32 %v5809_v35, %v1263_v28  ;;  %v6608_v35 = vld [vmem:[#allocation22_spill] sm:$0xff] }
 0x29a   : > { %v2304_v20 = vmul.f32 %v2240_v7, %v2166_v36  ;;  %v848_v36 = vadd.f32 %v6606_v24, %v627_v3  ;;  %v1679_v46 = vadd.f32 %v5832_v23, %v1471_v39  ;;  %v5981_v49 = vpop.f32.mrf.mxu3  ;;  %v5983_v3 = vpop.f32.mrf.mxu2  ;;  %v6613_v24 = vld [vmem:[#allocation24_spill] sm:$0xff] }
 0x29b   : > { %v2050_v21 = vpop.f32.mrf.mxu0  ;;  %v2371_v45 = vld [vmem:[#allocation2 + $0x60] sm:$0xff] }
 0x29c   : > { %v2352_v40 = vld [vmem:[#allocation2 + $0x5f] sm:$0xff]  ;;  %2329 = vst.msk [vmem:[#allocation2 + $0x68] sm:$0xff] %vm329_vm1, %v2304_v20  ;;  %v2093_v29 = vadd.f32 %v2050_v21, %v1885_v58  ;;  %4456 = vmatmul.msk.f32.gmra.mxu1 %vm329_vm1, %v2371_v45  ;;  %v5966_v58 = vpop.f32.mrf.mxu1 }
 0x29d   : > { %v5935_v44 = vld [vmem:[#allocation2 + $0x59] sm:$0xff]  ;;  %4475 = vmatmul.msk.f32.gmra.mxu2 %vm329_vm1, %v2352_v40  ;;  %v6609_v40 = vld [vmem:[#allocation4_spill] sm:$0xff] }
 0x29e   : > { %4494 = vmatmul.msk.f32.gmra.mxu3 %vm329_vm1, %v5935_v44  ;;  %v5944_v26 = vld [vmem:[#allocation2 + $0x5b] sm:$0xff]  ;;  %v2144_v48 = vadd.f32 %v5643_v52, %v2093_v29  ;;  %v630_v47 = vadd.f32 %v6609_v40, %v6608_v35  ;;  %v2255_v35 = vpop.permute.xlu0 %2254 }
 0x29f   : > { %4570 = vmatmul.msk.f32.gmra.mxu0 %vm329_vm1, %v5944_v26  ;;  %v6607_v20 = vld [vmem:[#allocation53_spill] sm:$0xff] }
 0x2a0   : > { %v2167_v34 = vmax.f32 %v2144_v48, 0.0  ;;  %v1056_v21 = vadd.f32 %v6607_v20, %v848_v36  ;;  %v1887_v48 = vadd.f32 %v5857_v4, %v1679_v46  ;;  %v6614_v36 = vld [vmem:[#allocation5_spill] sm:$0xff]  ;;  %v6615_v20 = vld [vmem:[#allocation74_spill] sm:$0xff] }
 0x2a1   : > { %v633_v39 = vadd.f32 %v6614_v36, %v6613_v24 }
 0x2a2   : > { %v2305_v11 = vmul.f32 %v2245_v22, %v2167_v34  ;;  %v1264_v29 = vadd.f32 %v6610_v32, %v1056_v21  ;;  %v6611_v22 = vld [vmem:[#allocation42_spill] sm:$0xff] }
 0x2a3   : > { %v2053_v8 = vpop.f32.mrf.mxu0  ;;  %v2372_v41 = vld [vmem:[#allocation2 + $0x68] sm:$0xff] }
 0x2a4   : > { %v2353_v15 = vld [vmem:[#allocation2 + $0x67] sm:$0xff]  ;;  %2330 = vst.msk [vmem:[#allocation2 + $0x70] sm:$0xff] %vm329_vm1, %v2305_v11  ;;  %v2094_v7 = vadd.f32 %v2053_v8, %v1886_v1  ;;  %4457 = vmatmul.msk.f32.gmra.mxu1 %vm329_vm1, %v2372_v41  ;;  %v849_v1 = vadd.f32 %v6611_v22, %v630_v47  ;;  %v1472_v23 = vadd.f32 %v5842_v63, %v1264_v29  ;;  %v6612_v8 = vld [vmem:[#allocation56_spill] sm:$0xff]  ;;  %v6000_v63 = vpop.f32.mrf.mxu1 }
 0x2a5   : > { %v5959_v31 = vld [vmem:[#allocation2 + $0x61] sm:$0xff]  ;;  %4476 = vmatmul.msk.f32.gmra.mxu2 %vm329_vm1, %v2353_v15 }
 0x2a6   : > { %4495 = vmatmul.msk.f32.gmra.mxu3 %vm329_vm1, %v5959_v31  ;;  %v5970_v62 = vld [vmem:[#allocation2 + $0x63] sm:$0xff]  ;;  %v2145_v45 = vadd.f32 %v5643_v52, %v2094_v7  ;;  %v1057_v41 = vadd.f32 %v6612_v8, %v849_v1  ;;  %v1680_v7 = vadd.f32 %v5859_v14, %v1472_v23 }
 0x2a7   : > { %4571 = vmatmul.msk.f32.gmra.mxu0 %vm329_vm1, %v5970_v62  ;;  %v6618_v23 = vld [vmem:[#allocation26_spill] sm:$0xff] }
 0x2a8   : > { %v2168_v13 = vmax.f32 %v2145_v45, 0.0  ;;  %v1265_v21 = vadd.f32 %v6615_v20, %v1057_v41  ;;  %v1888_v40 = vadd.f32 %v5887_v56, %v1680_v7  ;;  %v4542_v56 = vld [vmem:[%s6477_s4 + $0x14] sm:$0xf]  ;;  %v2260_v7 = vpop.permute.xlu1 %2259 }
 0x2a9   : > { %4543 = vmatpush.msk.msrb.mxu3 %vm399_vm0, %v4542_v56 }
 0x2aa   : > { %v2306_v38 = vmul.f32 %v2250_v30, %v2168_v13  ;;  %v6616_v30 = vld [vmem:[#allocation45_spill] sm:$0xff] }
 0x2ab   : > { %v2056_v0 = vpop.f32.mrf.mxu0  ;;  %v2373_v57 = vld [vmem:[#allocation2 + $0x70] sm:$0xff] }
 0x2ac   : > { %v2354_v28 = vld [vmem:[#allocation2 + $0x6f] sm:$0xff]  ;;  %2331 = vst.msk [vmem:[#allocation2 + $0x78] sm:$0xff] %vm329_vm1, %v2306_v38  ;;  %v2095_v11 = vadd.f32 %v2056_v0, %v1887_v48  ;;  %4458 = vmatmul.msk.f32.gmra.mxu1 %vm329_vm1, %v2373_v57  ;;  %v850_v48 = vadd.f32 %v6616_v30, %v633_v39  ;;  %v1473_v38 = vadd.f32 %v5876_v54, %v1265_v21  ;;  %v6011_v0 = vpop.f32.mrf.mxu3  ;;  %v6019_v57 = vpop.f32.mrf.mxu2  ;;  %v6617_v54 = vld [vmem:[#allocation57_spill] sm:$0xff] }
 0x2ad   : > { %v5985_v34 = vld [vmem:[#allocation2 + $0x69] sm:$0xff]  ;;  %4477 = vmatmul.msk.f32.gmra.mxu2 %vm329_vm1, %v2354_v28  ;;  %v6034_v39 = vpop.f32.mrf.mxu1  ;;  %v4582_v30 = vld [vmem:[%s6477_s4 + $0x1c] sm:$0xf] }
 0x2ae   : > { %4496 = vmatmul.msk.f32.gmra.mxu3 %vm329_vm1, %v5985_v34  ;;  %v5994_v4 = vld [vmem:[#allocation2 + $0x6b] sm:$0xff]  ;;  %v2146_v15 = vadd.f32 %v5643_v52, %v2095_v11  ;;  %v1058_v22 = vadd.f32 %v6617_v54, %v850_v48  ;;  %v6619_v11 = vld [vmem:[#allocation6_spill] sm:$0xff]  ;;  %v1681_v41 = vadd.f32 %v5892_v50, %v1473_v38  ;;  %4583 = vmatpush.msk.msra.mxu1 %vm399_vm0, %v4582_v30 }
 0x2af   : > { %4572 = vmatmul.msk.f32.gmra.mxu0 %vm329_vm1, %v5994_v4  ;;  %v636_v8 = vadd.f32 %v6619_v11, %v6618_v23 }
 0x2b0   : > { %v2169_v45 = vmax.f32 %v2146_v15, 0.0  ;;  %v6620_v15 = vld [vmem:[#allocation75_spill] sm:$0xff]  ;;  %v1889_v20 = vadd.f32 %v5921_v60, %v1681_v41  ;;  %v4602_v60 = vld [vmem:[%s6477_s4 + $0x20] sm:$0xf] }
 0x2b1   : > { %v1266_v24 = vadd.f32 %v6620_v15, %v1058_v22  ;;  %4603 = vmatpush.msk.msra.mxu2 %vm399_vm0, %v4602_v60  ;;  %v6623_v22 = vld [vmem:[#allocation29_spill] sm:$0xff] }
 0x2b2   : > { %v2307_v47 = vmul.f32 %v2255_v35, %v2169_v45 }
 0x2b3   : > { %v2059_v46 = vpop.f32.mrf.mxu0  ;;  %v2374_v32 = vld [vmem:[#allocation2 + $0x78] sm:$0xff] }
 0x2b4   : > { %v2355_v29 = vld [vmem:[#allocation2 + $0x77] sm:$0xff]  ;;  %2332 = vst.msk [vmem:[#allocation2 + $0x80] sm:$0xff] %vm329_vm1, %v2307_v47  ;;  %v2096_v14 = vadd.f32 %v2059_v46, %v1888_v40  ;;  %4459 = vmatmul.msk.f32.gmra.mxu1 %vm329_vm1, %v2374_v32  ;;  %v6062_v54 = vpop.f32.mrf.mxu2 }
 0x2b5   : > { %v6007_v13 = vld [vmem:[#allocation2 + $0x71] sm:$0xff]  ;;  %4478 = vmatmul.msk.f32.gmra.mxu2 %vm329_vm1, %v2355_v29  ;;  %v1474_v29 = vadd.f32 %v5906_v59, %v1266_v24  ;;  %v6622_v59 = vld [vmem:[#allocation58_spill] sm:$0xff]  ;;  %v2265_v24 = vpop.permute.xlu2 %2264 }
 0x2b6   : > { %4497 = vmatmul.msk.f32.gmra.mxu3 %vm329_vm1, %v6007_v13  ;;  %v6023_v28 = vld [vmem:[#allocation2 + $0x73] sm:$0xff]  ;;  %v2147_v1 = vadd.f32 %v5643_v52, %v2096_v14  ;;  %v6056_v14 = vpop.f32.mrf.mxu3 }
 0x2b7   : > { %4573 = vmatmul.msk.f32.gmra.mxu0 %vm329_vm1, %v6023_v28  ;;  %v6621_v46 = vld [vmem:[#allocation48_spill] sm:$0xff]  ;;  %v1682_v11 = vadd.f32 %v5926_v2, %v1474_v29 }
 0x2b8   : > { %v2170_v36 = vmax.f32 %v2147_v1, 0.0  ;;  %v851_v32 = vadd.f32 %v6621_v46, %v636_v8  ;;  %v6624_v1 = vld [vmem:[#allocation7_spill] sm:$0xff]  ;;  %v6625_v8 = vld [vmem:[#allocation76_spill] sm:$0xff] }
 0x2b9   : > { %v639_v23 = vadd.f32 %v6624_v1, %v6623_v22  ;;  %v6626_v46 = vld [vmem:[#allocation51_spill] sm:$0xff]  ;;  %v6627_v29 = vld [vmem:[#allocation60_spill] sm:$0xff]  ;;  %v6630_v1 = vld [vmem:[#allocation78_spill] sm:$0xff] }
 0x2ba   : > { %v2308_v21 = vmul.f32 %v2260_v7, %v2170_v36  ;;  %v1059_v38 = vadd.f32 %v6622_v59, %v851_v32  ;;  %v1890_v7 = vadd.f32 %v5954_v12, %v1682_v11  ;;  %v6629_v59 = vld [vmem:[#allocation8_spill] sm:$0xff] }
 0x2bb   : > { %v2062_v45 = vpop.f32.mrf.mxu0  ;;  %v2375_v35 = vld [vmem:[#allocation2 + $0x80] sm:$0xff]  ;;  %v852_v32 = vadd.f32 %v6626_v46, %v639_v23 }
 0x2bc   : > { %v2356_v40 = vld [vmem:[#allocation2 + $0x7f] sm:$0xff]  ;;  %2333 = vst.msk [vmem:[#allocation2 + $0x88] sm:$0xff] %vm329_vm1, %v2308_v21  ;;  %v2097_v50 = vadd.f32 %v2062_v45, %v1889_v20  ;;  %4460 = vmatmul.msk.f32.gmra.mxu1 %vm329_vm1, %v2375_v35  ;;  %v1267_v41 = vadd.f32 %v6625_v8, %v1059_v38 }
 0x2bd   : > { %v6037_v47 = vld [vmem:[#allocation2 + $0x79] sm:$0xff]  ;;  %4479 = vmatmul.msk.f32.gmra.mxu2 %vm329_vm1, %v2356_v40  ;;  %v1060_v60 = vadd.f32 %v6627_v29, %v852_v32 }
 0x2be   : > { %4498 = vmatmul.msk.f32.gmra.mxu3 %vm329_vm1, %v6037_v47  ;;  %v6052_v48 = vld [vmem:[#allocation2 + $0x7b] sm:$0xff]  ;;  %v2148_v56 = vadd.f32 %v5643_v52, %v2097_v50  ;;  %v1475_v50 = vadd.f32 %v5933_v10, %v1267_v41  ;;  %v6088_v11 = vpop.f32.mrf.mxu3 }
 0x2bf   : > { %4574 = vmatmul.msk.f32.gmra.mxu0 %vm329_vm1, %v6052_v48  ;;  %v6628_v10 = vld [vmem:[#allocation30_spill] sm:$0xff]  ;;  %v1268_v23 = vadd.f32 %v6630_v1, %v1060_v60 }
 0x2c0   : > { %v2171_v15 = vmax.f32 %v2148_v56, 0.0  ;;  %v642_v38 = vadd.f32 %v6629_v59, %v6628_v10  ;;  %v1683_v22 = vadd.f32 %v5956_v25, %v1475_v50  ;;  %v6631_v32 = vld [vmem:[#allocation54_spill] sm:$0xff] }
 0x2c1   : > { %v2454_v36 = vpop.f32.mrf.mxu1  ;;  %v1476_v25 = vadd.f32 %v5966_v58, %v1268_v23 }
 0x2c2   : > { %v2309_v20 = vmul.f32 %v2265_v24, %v2171_v15  ;;  %v2270_v15 = vpop.permute.xlu0 %2269 }
 0x2c3   : > { %v2065_v21 = vpop.f32.mrf.mxu0  ;;  %v2376_v45 = vld [vmem:[#allocation2 + $0x88] sm:$0xff] }
 0x2c4   : > { %v2357_v35 = vld [vmem:[#allocation2 + $0x87] sm:$0xff]  ;;  %2334 = vst.msk [vmem:[#allocation2 + $0x90] sm:$0xff] %vm329_vm1, %v2309_v20  ;;  %v2098_v2 = vadd.f32 %v2065_v21, %v1890_v7  ;;  %4461 = vmatmul.msk.f32.gmra.mxu1 %vm329_vm1, %v2376_v45  ;;  %v1891_v7 = vadd.f32 %v5981_v49, %v1683_v22  ;;  %v2275_v22 = vpop.permute.xlu1 %2274 }
 0x2c5   : > { %v6069_v40 = vld [vmem:[#allocation2 + $0x81] sm:$0xff]  ;;  %4480 = vmatmul.msk.f32.gmra.mxu2 %vm329_vm1, %v2357_v35 }
 0x2c6   : > { %4499 = vmatmul.msk.f32.gmra.mxu3 %vm329_vm1, %v6069_v40  ;;  %v6078_v12 = vld [vmem:[#allocation2 + $0x83] sm:$0xff]  ;;  %v2149_v30 = vadd.f32 %v5643_v52, %v2098_v2  ;;  %v853_v2 = vadd.f32 %v6631_v32, %v642_v38 }
 0x2c7   : > { %4575 = vmatmul.msk.f32.gmra.mxu0 %vm329_vm1, %v6078_v12 }
 0x2c8   : > { %v2582_v56 = vpop.f32.mrf.mxu2  ;;  %v2172_v8 = vmax.f32 %v2149_v30, 0.0  ;;  %v1684_v30 = vadd.f32 %v5983_v3, %v1476_v25 }
 0x2c9   : > { %v2583_v41 = vadd.f32 %v2582_v56, %v2454_v36  ;;  %v2457_v24 = vpop.f32.mrf.mxu1  ;;  %v6632_v36 = vld [vmem:[#allocation62_spill] sm:$0xff] }
 0x2ca   : > { %v2310_v20 = vmul.f32 %v2270_v15, %v2172_v8  ;;  %v1061_v29 = vadd.f32 %v6632_v36, %v853_v2  ;;  %v1892_v8 = vadd.f32 %v6011_v0, %v1684_v30 }
 0x2cb   : > { %v2068_v21 = vpop.f32.mrf.mxu0  ;;  %v2377_v45 = vld [vmem:[#allocation2 + $0x90] sm:$0xff] }
 0x2cc   : > { %v2358_v35 = vld [vmem:[#allocation2 + $0x8f] sm:$0xff]  ;;  %2335 = vst.msk [vmem:[#allocation2 + $0x98] sm:$0xff] %vm329_vm1, %v2310_v20  ;;  %v2099_v50 = vadd.f32 %v2068_v21, %v1891_v7  ;;  %4462 = vmatmul.msk.f32.gmra.mxu1 %vm329_vm1, %v2377_v45  ;;  %v1269_v10 = vadd.f32 %v5603_v19, %v1061_v29  ;;  %v2968_v21 = vld [vmem:[#allocation2 + $0x1a] sm:$0xff] }
 0x2cd   : > { %v6091_v46 = vld [vmem:[#allocation2 + $0x89] sm:$0xff]  ;;  %4481 = vmatmul.msk.f32.gmra.mxu2 %vm329_vm1, %v2358_v35  ;;  %v6633_v45 = vld [vmem:[#allocation9_spill] sm:$0xff] }
 0x2ce   : > { %4500 = vmatmul.msk.f32.gmra.mxu3 %vm329_vm1, %v6091_v46  ;;  %v6100_v49 = vld [vmem:[#allocation2 + $0x8b] sm:$0xff]  ;;  %v2150_v60 = vadd.f32 %v5643_v52, %v2099_v50  ;;  %v1477_v3 = vadd.f32 %v6000_v63, %v1269_v10 }
 0x2cf   : > { %4576 = vmatmul.msk.f32.gmra.mxu0 %vm329_vm1, %v6100_v49  ;;  %v6634_v35 = vld [vmem:[#allocation67_spill] sm:$0xff] }
 0x2d0   : > { %v2585_v58 = vpop.f32.mrf.mxu2  ;;  %v2173_v59 = vmax.f32 %v2150_v60, 0.0  ;;  %v854_v32 = vadd.f32 %v6634_v35, %v6633_v45  ;;  %v1685_v25 = vadd.f32 %v6019_v57, %v1477_v3  ;;  %v2280_v60 = vpop.permute.xlu2 %2279 }
 0x2d1   : > { %v2586_v38 = vadd.f32 %v2585_v58, %v2457_v24  ;;  %v2730_v56 = vpop.f32.mrf.mxu3  ;;  %v2460_v23 = vpop.f32.mrf.mxu1 }
 0x2d2   : > { %v6108_v1 = vadd.f32 %v2730_v56, %v2583_v41  ;;  %v2311_v15 = vmul.f32 %v2275_v22, %v2173_v59  ;;  %v6635_v41 = vld [vmem:[#allocation69_spill] sm:$0xff]  ;;  %v1893_v10 = vadd.f32 %v6056_v14, %v1685_v25  ;;  %v4694_v14 = vld [vmem:[%s6476_s3] ss:$0 sm:$0xff] }
 0x2d3   : > { %v2071_v7 = vpop.f32.mrf.mxu0  ;;  %v6111_v20 = vld [vmem:[#allocation2 + $0x91] sm:$0xff]  ;;  %v1062_v24 = vadd.f32 %v6635_v41, %v854_v32 }
 0x2d4   : > { %2336 = vst.msk [vmem:[#allocation2 + $0xa0] sm:$0xff] %vm329_vm1, %v2311_v15  ;;  %v2100_v19 = vadd.f32 %v2071_v7, %v1892_v8  ;;  %4504 = vmatmul.msk.f32.vlgmr.msrb.gmra.mxu1 %vm329_vm1, %v5742_v53  ;;  %v6122_v0 = vld [vmem:[#allocation2 + $0x93] sm:$0xff]  ;;  %v2970_v41 = vld [vmem:[#allocation2 + $0x2a] sm:$0xff] }
 0x2d5   : > { %4524 = vmatmul.msk.f32.vlgmr.msrb.gmra.mxu2 %vm329_vm1, %v2968_v21  ;;  %v1270_v50 = vadd.f32 %v5616_v55, %v1062_v24  ;;  %v3134_v55 = vld [vmem:[#allocation2 + $0x1b] sm:$0xff]  ;;  %v2285_v21 = vpop.permute.xlu0 %2284 }
 0x2d6   : > { %4501 = vmatmul.msk.f32.gmra.mxu3 %vm329_vm1, %v6111_v20  ;;  %v2151_v2 = vadd.f32 %v5643_v52, %v2100_v19  ;;  %v2969_v52 = vld [vmem:[#allocation2 + $0x22] sm:$0xff] }
 0x2d7   : > { %4577 = vmatmul.msk.f32.gmra.mxu0 %vm329_vm1, %v6122_v0  ;;  %v1478_v22 = vadd.f32 %v6034_v39, %v1270_v50 }
 0x2d8   : > { %v2588_v63 = vpop.f32.mrf.mxu2  ;;  %v2174_v53 = vmax.f32 %v2151_v2, 0.0 }
 0x2d9   : > { %v2589_v36 = vadd.f32 %v2588_v63, %v2460_v23  ;;  %v2733_v29 = vpop.f32.mrf.mxu3  ;;  %v2463_v30 = vpop.f32.mrf.mxu1  ;;  %v1686_v23 = vadd.f32 %v6062_v54, %v1478_v22  ;;  %v3135_v54 = vld [vmem:[#allocation2 + $0x23] sm:$0xff] }
 0x2da   : > { %v6130_v58 = vadd.f32 %v2733_v29, %v2586_v38  ;;  %v2312_v59 = vmul.f32 %v2280_v60, %v2174_v53 }
 0x2db   : > { %v2074_v56 = vpop.f32.mrf.mxu0  ;;  %v6139_v57 = vld [vmem:[#allocation2 + $0x9b] sm:$0xff]  ;;  %v1894_v32 = vadd.f32 %v6088_v11, %v1686_v23 }
 0x2dc   : > { %2337 = vst.msk [vmem:[#allocation2 + $0xa8] sm:$0xff] %vm329_vm1, %v2312_v59  ;;  %v2101_v8 = vadd.f32 %v2074_v56, %v1893_v10  ;;  %4505 = vmatmul.msk.f32.gmra.mxu1 %vm329_vm1, %v5762_v27 }
 0x2dd   : > { %4525 = vmatmul.msk.f32.gmra.mxu2 %vm329_vm1, %v2969_v52 }
 0x2de   : > { %4544 = vmatmul.msk.f32.vlgmr.msrb.gmra.mxu3 %vm329_vm1, %v3134_v55  ;;  %v2152_v38 = vadd.f32 %v4694_v14, %v2101_v8  ;;  %v2972_v55 = vld [vmem:[#allocation2 + $0x3a] sm:$0xff] }
 0x2df   : > { %4578 = vmatmul.msk.f32.gmra.mxu0 %vm329_vm1, %v6139_v57 }
 0x2e0   : > { %v2591_v39 = vpop.f32.mrf.mxu2  ;;  %v2175_v15 = vmax.f32 %v2152_v38, 0.0 }
 0x2e1   : > { %v2592_v27 = vadd.f32 %v2591_v39, %v2463_v30  ;;  %v2736_v7 = vpop.f32.mrf.mxu3  ;;  %v2466_v35 = vpop.f32.mrf.mxu1  ;;  %v2971_v30 = vld [vmem:[#allocation2 + $0x32] sm:$0xff] }
 0x2e2   : > { %v6147_v45 = vadd.f32 %v2736_v7, %v2589_v36  ;;  %v2313_v3 = vmul.f32 %v2285_v21, %v2175_v15  ;;  %v2290_v36 = vpop.permute.xlu1 %2289  ;;  %v2973_v15 = vld [vmem:[#allocation2 + $0x42] sm:$0xff] }
 0x2e3   : > { %v2077_v19 = vpop.f32.mrf.mxu0  ;;  %v6155_v2 = vld [vmem:[#allocation2 + $0xa3] sm:$0xff] }
 0x2e4   : > { %2338 = vst.msk [vmem:[#allocation2 + $0xb0] sm:$0xff] %vm329_vm1, %v2313_v3  ;;  %v2102_v24 = vadd.f32 %v2077_v19, %v1894_v32  ;;  %4506 = vmatmul.msk.f32.gmra.mxu1 %vm329_vm1, %v5785_v51 }
 0x2e5   : > { %4526 = vmatmul.msk.f32.gmra.mxu2 %vm329_vm1, %v2970_v41  ;;  %v2975_v41 = vld [vmem:[#allocation2 + $0x52] sm:$0xff] }
 0x2e6   : > { %4545 = vmatmul.msk.f32.gmra.mxu3 %vm329_vm1, %v3135_v54  ;;  %v2153_v63 = vadd.f32 %v4694_v14, %v2102_v24 }
 0x2e7   : > { %4579 = vmatmul.msk.f32.gmra.mxu0 %vm329_vm1, %v6155_v2 }
 0x2e8   : > { %v2594_v11 = vpop.f32.mrf.mxu2  ;;  %v2176_v25 = vmax.f32 %v2153_v63, 0.0 }
 0x2e9   : > { %v2595_v50 = vadd.f32 %v2594_v11, %v2466_v35  ;;  %v2739_v53 = vpop.f32.mrf.mxu3  ;;  %v2469_v51 = vpop.f32.mrf.mxu1  ;;  %v2974_v35 = vld [vmem:[#allocation2 + $0x4a] sm:$0xff]  ;;  %v2976_v11 = vld [vmem:[#allocation2 + $0x5a] sm:$0xff] }
 0x2ea   : > { %v6159_v29 = vadd.f32 %v2739_v53, %v2592_v27  ;;  %v2314_v60 = vmul.f32 %v2290_v36, %v2176_v25  ;;  %v2977_v36 = vld [vmem:[#allocation2 + $0x62] sm:$0xff] }
 0x2eb   : > { %v3316_v10 = vld [vmem:[#allocation2 + $0xab] sm:$0xff] }
 0x2ec   : > { %2340 = vst.msk [vmem:[#allocation2 + $0xb8] sm:$0xf] %vm2339_vm2, %v2314_v60  ;;  %4507 = vmatmul.msk.f32.gmra.mxu1 %vm329_vm1, %v5811_v37 }
 0x2ed   : > { %4527 = vmatmul.msk.f32.gmra.mxu2 %vm329_vm1, %v2971_v30 }
 0x2ee   : > { %4546 = vmatmul.msk.f32.gmra.mxu3 %vm329_vm1, %v5794_v18 }
 0x2ef   : > { %4580 = vmatmul.msk.f32.gmra.mxu0 %vm329_vm1, %v3316_v10  ;;  %v2978_v10 = vld [vmem:[#allocation2 + $0x6a] sm:$0xff] }
 0x2f0   : > { %v2597_v59 = vpop.f32.mrf.mxu2 }
 0x2f1   : > { %v2598_v56 = vadd.f32 %v2597_v59, %v2469_v51  ;;  %v2742_v52 = vpop.f32.mrf.mxu3  ;;  %v2472_v8 = vpop.f32.mrf.mxu1 }
 0x2f2   : > { %v6167_v22 = vadd.f32 %v2742_v52, %v2595_v50 }
 0x2f3   : > { %v3317_v37 = vld [vmem:[#allocation2 + $0xb3] sm:$0xff] }
 0x2f4   : > { %4508 = vmatmul.msk.f32.gmra.mxu1 %vm329_vm1, %v5835_v17 }
 0x2f5   : > { %4528 = vmatmul.msk.f32.gmra.mxu2 %vm329_vm1, %v2972_v55 }
 0x2f6   : > { %4547 = vmatmul.msk.f32.gmra.mxu3 %vm329_vm1, %v5820_v42 }
 0x2f7   : > { %4581 = vmatmul.msk.f32.gmra.mxu0 %vm329_vm1, %v3317_v37 }
 0x2f8   : > { %v2600_v18 = vpop.f32.mrf.mxu2 }
 0x2f9   : > { %v2601_v14 = vadd.f32 %v2600_v18, %v2472_v8  ;;  %v2745_v38 = vpop.f32.mrf.mxu3  ;;  %v2475_v23 = vpop.f32.mrf.mxu1  ;;  %v2979_v8 = vld [vmem:[#allocation2 + $0x72] sm:$0xff] }
 0x2fa   : > { %v6175_v39 = vadd.f32 %v2745_v38, %v2598_v56 }
 0x2fc   : > { %4509 = vmatmul.msk.f32.gmra.mxu1 %vm329_vm1, %v5861_v16 }
 0x2fd   : > { %4529 = vmatmul.msk.f32.gmra.mxu2 %vm329_vm1, %v2973_v15 }
 0x2fe   : > { %4548 = vmatmul.msk.f32.gmra.mxu3 %vm329_vm1, %v5846_v61 }
 0x300   : > { %v2603_v17 = vpop.f32.mrf.mxu2 }
 0x301   : > { %v2604_v42 = vadd.f32 %v2603_v17, %v2475_v23  ;;  %v2748_v27 = vpop.f32.mrf.mxu3  ;;  %v2478_v21 = vpop.f32.mrf.mxu1  ;;  %v2981_v17 = vld [vmem:[#allocation2 + $0x82] sm:$0xff] }
 0x302   : > { %v6182_v7 = vadd.f32 %v2748_v27, %v2601_v14  ;;  %v2980_v14 = vld [vmem:[#allocation2 + $0x7a] sm:$0xff] }
 0x304   : > { %4510 = vmatmul.msk.f32.gmra.mxu1 %vm329_vm1, %v5883_v9 }
 0x305   : > { %4530 = vmatmul.msk.f32.gmra.mxu2 %vm329_vm1, %v2974_v35  ;;  %v2982_v35 = vld [vmem:[#allocation2 + $0x8a] sm:$0xff] }
 0x306   : > { %4549 = vmatmul.msk.f32.gmra.mxu3 %vm329_vm1, %v5870_v6 }
 0x308   : > { %v2606_v16 = vpop.f32.mrf.mxu2 }
 0x309   : > { %v2607_v32 = vadd.f32 %v2606_v16, %v2478_v21  ;;  %v2751_v3 = vpop.f32.mrf.mxu3  ;;  %v2481_v61 = vpop.f32.mrf.mxu1 }
 0x30a   : > { %v6189_v19 = vadd.f32 %v2751_v3, %v2604_v42 }
 0x30c   : > { %4511 = vmatmul.msk.f32.gmra.mxu1 %vm329_vm1, %v5909_v43 }
 0x30d   : > { %4531 = vmatmul.msk.f32.gmra.mxu2 %vm329_vm1, %v2975_v41 }
 0x30e   : > { %4550 = vmatmul.msk.f32.gmra.mxu3 %vm329_vm1, %v5896_v33 }
 0x310   : > { %v2609_v9 = vpop.f32.mrf.mxu2 }
 0x311   : > { %v2610_v24 = vadd.f32 %v2609_v9, %v2481_v61  ;;  %v2754_v54 = vpop.f32.mrf.mxu3  ;;  %v2484_v6 = vpop.f32.mrf.mxu1  ;;  %v2983_v61 = vld [vmem:[#allocation2 + $0x92] sm:$0xff] }
 0x312   : > { %v6196_v63 = vadd.f32 %v2754_v54, %v2607_v32  ;;  %v2818_v54 = vld [vmem:[#allocation2 + $0x99] sm:$0xff] }
 0x314   : > { %4512 = vmatmul.msk.f32.gmra.mxu1 %vm329_vm1, %v5935_v44 }
 0x315   : > { %4532 = vmatmul.msk.f32.gmra.mxu2 %vm329_vm1, %v2976_v11 }
 0x316   : > { %4551 = vmatmul.msk.f32.gmra.mxu3 %vm329_vm1, %v5918_v5 }
 0x318   : > { %v2612_v43 = vpop.f32.mrf.mxu2 }
 0x319   : > { %v2613_v25 = vadd.f32 %v2612_v43, %v2484_v6  ;;  %v2757_v50 = vpop.f32.mrf.mxu3  ;;  %v2487_v33 = vpop.f32.mrf.mxu1  ;;  %v2984_v6 = vld [vmem:[#allocation2 + $0x9a] sm:$0xff] }
 0x31a   : > { %v6203_v53 = vadd.f32 %v2757_v50, %v2610_v24 }
 0x31c   : > { %4513 = vmatmul.msk.f32.gmra.mxu1 %vm329_vm1, %v5959_v31 }
 0x31d   : > { %4533 = vmatmul.msk.f32.gmra.mxu2 %vm329_vm1, %v2977_v36  ;;  %v2985_v36 = vld [vmem:[#allocation2 + $0xa2] sm:$0xff] }
 0x31e   : > { %4552 = vmatmul.msk.f32.gmra.mxu3 %vm329_vm1, %v5944_v26 }
 0x320   : > { %v2615_v44 = vpop.f32.mrf.mxu2 }
 0x321   : > { %v2616_v51 = vadd.f32 %v2615_v44, %v2487_v33  ;;  %v2760_v60 = vpop.f32.mrf.mxu3  ;;  %v2490_v5 = vpop.f32.mrf.mxu1  ;;  %v2819_v33 = vld [vmem:[#allocation2 + $0xa1] sm:$0xff] }
 0x322   : > { %v6210_v30 = vadd.f32 %v2760_v60, %v2613_v25  ;;  %v3466_v60 = vld [vmem:[#allocation2 + $0x2c] sm:$0xff] }
 0x324   : > { %4514 = vmatmul.msk.f32.gmra.mxu1 %vm329_vm1, %v5985_v34 }
 0x325   : > { %4534 = vmatmul.msk.f32.gmra.mxu2 %vm329_vm1, %v2978_v10 }
 0x326   : > { %4553 = vmatmul.msk.f32.gmra.mxu3 %vm329_vm1, %v5970_v62 }
 0x328   : > { %v2618_v31 = vpop.f32.mrf.mxu2 }
 0x329   : > { %v2619_v59 = vadd.f32 %v2618_v31, %v2490_v5  ;;  %v2763_v56 = vpop.f32.mrf.mxu3  ;;  %v2493_v26 = vpop.f32.mrf.mxu1  ;;  %v3632_v5 = vld [vmem:[#allocation2 + $0x2d] sm:$0xff] }
 0x32a   : > { %v6217_v52 = vadd.f32 %v2763_v56, %v2616_v51  ;;  %v3633_v56 = vld [vmem:[#allocation2 + $0x35] sm:$0xff] }
 0x32c   : > { %4515 = vmatmul.msk.f32.gmra.mxu1 %vm329_vm1, %v6007_v13 }
 0x32d   : > { %4535 = vmatmul.msk.f32.gmra.mxu2 %vm329_vm1, %v2979_v8 }
 0x32e   : > { %4554 = vmatmul.msk.f32.gmra.mxu3 %vm329_vm1, %v5994_v4 }
 0x330   : > { %v2621_v34 = vpop.f32.mrf.mxu2 }
 0x331   : > { %v2622_v55 = vadd.f32 %v2621_v34, %v2493_v26  ;;  %v2766_v37 = vpop.f32.mrf.mxu3  ;;  %v2496_v62 = vpop.f32.mrf.mxu1 }
 0x332   : > { %v6224_v18 = vadd.f32 %v2766_v37, %v2619_v59  ;;  %v3468_v37 = vld [vmem:[#allocation2 + $0x3c] sm:$0xff] }
 0x334   : > { %4516 = vmatmul.msk.f32.gmra.mxu1 %vm329_vm1, %v6037_v47 }
 0x335   : > { %4536 = vmatmul.msk.f32.gmra.mxu2 %vm329_vm1, %v2980_v14 }
 0x336   : > { %4555 = vmatmul.msk.f32.gmra.mxu3 %vm329_vm1, %v6023_v28 }
 0x338   : > { %v2624_v13 = vpop.f32.mrf.mxu2 }
 0x339   : > { %v2625_v38 = vadd.f32 %v2624_v13, %v2496_v62  ;;  %v2769_v23 = vpop.f32.mrf.mxu3  ;;  %v2499_v4 = vpop.f32.mrf.mxu1 }
 0x33a   : > { %v6231_v15 = vadd.f32 %v2769_v23, %v2622_v55  ;;  %v3635_v23 = vld [vmem:[#allocation2 + $0x45] sm:$0xff] }
 0x33c   : > { %4517 = vmatmul.msk.f32.gmra.mxu1 %vm329_vm1, %v6069_v40 }
 0x33d   : > { %4537 = vmatmul.msk.f32.gmra.mxu2 %vm329_vm1, %v2981_v17 }
 0x33e   : > { %4556 = vmatmul.msk.f32.gmra.mxu3 %vm329_vm1, %v6052_v48 }
 0x340   : > { %v2627_v47 = vpop.f32.mrf.mxu2 }
 0x341   : > { %v2628_v42 = vadd.f32 %v2627_v47, %v2499_v4  ;;  %v2772_v27 = vpop.f32.mrf.mxu3  ;;  %v2502_v28 = vpop.f32.mrf.mxu1 }
 0x342   : > { %v6238_v21 = vadd.f32 %v2772_v27, %v2625_v38  ;;  %v3469_v38 = vld [vmem:[#allocation2 + $0x44] sm:$0xff]  ;;  %v3636_v27 = vld [vmem:[#allocation2 + $0x4d] sm:$0xff] }
 0x344   : > { %4518 = vmatmul.msk.f32.gmra.mxu1 %vm329_vm1, %v6091_v46 }
 0x345   : > { %4538 = vmatmul.msk.f32.gmra.mxu2 %vm329_vm1, %v2982_v35 }
 0x346   : > { %4557 = vmatmul.msk.f32.gmra.mxu3 %vm329_vm1, %v6078_v12 }
 0x348   : > { %v2630_v40 = vpop.f32.mrf.mxu2 }
 0x349   : > { %v2631_v16 = vadd.f32 %v2630_v40, %v2502_v28  ;;  %v2775_v32 = vpop.f32.mrf.mxu3  ;;  %v2505_v48 = vpop.f32.mrf.mxu1 }
 0x34a   : > { %v6245_v3 = vadd.f32 %v2775_v32, %v2628_v42  ;;  %v3470_v42 = vld [vmem:[#allocation2 + $0x4c] sm:$0xff]  ;;  %v3637_v32 = vld [vmem:[#allocation2 + $0x55] sm:$0xff] }
 0x34c   : > { %4519 = vmatmul.msk.f32.gmra.mxu1 %vm329_vm1, %v6111_v20 }
 0x34d   : > { %4539 = vmatmul.msk.f32.gmra.mxu2 %vm329_vm1, %v2983_v61 }
 0x34e   : > { %4558 = vmatmul.msk.f32.gmra.mxu3 %vm329_vm1, %v6100_v49 }
 0x350   : > { %v2633_v46 = vpop.f32.mrf.mxu2 }
 0x351   : > { %v2634_v41 = vadd.f32 %v2633_v46, %v2505_v48  ;;  %v2778_v9 = vpop.f32.mrf.mxu3  ;;  %v2896_v12 = vpop.f32.mrf.mxu1 }
 0x352   : > { %v6252_v24 = vadd.f32 %v2778_v9, %v2631_v16  ;;  %v2950_v20 = vadd.f32 %v2896_v12, %v6108_v1  ;;  %v3471_v16 = vld [vmem:[#allocation2 + $0x54] sm:$0xff]  ;;  %v3638_v9 = vld [vmem:[#allocation2 + $0x5d] sm:$0xff] }
 0x354   : > { %4520 = vmatmul.msk.f32.gmra.mxu1 %vm329_vm1, %v2818_v54 }
 0x355   : > { %4540 = vmatmul.msk.f32.gmra.mxu2 %vm329_vm1, %v2984_v6 }
 0x356   : > { %4559 = vmatmul.msk.f32.gmra.mxu3 %vm329_vm1, %v6122_v0 }
 0x358   : > { %v3062_v11 = vpop.f32.mrf.mxu2 }
 0x359   : > { %v2781_v43 = vpop.f32.mrf.mxu3  ;;  %v6259_v49 = vadd.f32 %v3062_v11, %v2950_v20  ;;  %v2899_v50 = vpop.f32.mrf.mxu1  ;;  %v3473_v20 = vld [vmem:[#allocation2 + $0x64] sm:$0xff] }
 0x35a   : > { %v6261_v25 = vadd.f32 %v2781_v43, %v2634_v41  ;;  %v2951_v0 = vadd.f32 %v2899_v50, %v6130_v58  ;;  %v3467_v58 = vld [vmem:[#allocation2 + $0x34] sm:$0xff]  ;;  %v3472_v41 = vld [vmem:[#allocation2 + $0x5c] sm:$0xff]  ;;  %v3639_v11 = vld [vmem:[#allocation2 + $0x65] sm:$0xff] }
 0x35c   : > { %4521 = vmatmul.msk.f32.gmra.mxu1 %vm329_vm1, %v2819_v33 }
 0x35d   : > { %4541 = vmatmul.msk.f32.gmra.mxu2 %vm329_vm1, %v2985_v36  ;;  %v3474_v36 = vld [vmem:[#allocation2 + $0x6c] sm:$0xff] }
 0x35e   : > { %4560 = vmatmul.msk.f32.gmra.mxu3 %vm329_vm1, %v6139_v57 }
 0x360   : > { %v3065_v44 = vpop.f32.mrf.mxu2 }
 0x361   : > { %v6268_v1 = vadd.f32 %v3065_v44, %v2951_v0  ;;  %v2902_v51 = vpop.f32.mrf.mxu1  ;;  %v3640_v0 = vld [vmem:[#allocation2 + $0x6d] sm:$0xff] }
 0x362   : > { %v2952_v10 = vadd.f32 %v2902_v51, %v6147_v45 }
 0x364   : > { %4584 = vmatmul.msk.f32.vlgmr.msra.gmra.mxu1 %vm329_vm1, %v3466_v60 }
 0x365   : > { %4604 = vmatmul.msk.f32.vlgmr.msra.gmra.mxu2 %vm329_vm1, %v3632_v5  ;;  %v3475_v5 = vld [vmem:[#allocation2 + $0x74] sm:$0xff] }
 0x366   : > { %4561 = vmatmul.msk.f32.gmra.mxu3 %vm329_vm1, %v6155_v2  ;;  %v3634_v2 = vld [vmem:[#allocation2 + $0x3d] sm:$0xff] }
 0x368   : > { %v3068_v31 = vpop.f32.mrf.mxu2 }
 0x369   : > { %v6275_v59 = vadd.f32 %v3068_v31, %v2952_v10  ;;  %v2905_v57 = vpop.f32.mrf.mxu1  ;;  %v3641_v10 = vld [vmem:[#allocation2 + $0x75] sm:$0xff] }
 0x36a   : > { %v2953_v26 = vadd.f32 %v2905_v57, %v6159_v29 }
 0x36c   : > { %4585 = vmatmul.msk.f32.gmra.mxu1 %vm329_vm1, %v3467_v58 }
 0x36d   : > { %4605 = vmatmul.msk.f32.gmra.mxu2 %vm329_vm1, %v3633_v56 }
 0x370   : > { %v3071_v8 = vpop.f32.mrf.mxu2 }
 0x371   : > { %v6280_v34 = vadd.f32 %v3071_v8, %v2953_v26  ;;  %v2908_v55 = vpop.f32.mrf.mxu1  ;;  %v3476_v26 = vld [vmem:[#allocation2 + $0x7c] sm:$0xff] }
 0x372   : > { %v2954_v45 = vadd.f32 %v2908_v55, %v6167_v22 }
 0x374   : > { %4586 = vmatmul.msk.f32.gmra.mxu1 %vm329_vm1, %v3468_v37 }
 0x375   : > { %4606 = vmatmul.msk.f32.gmra.mxu2 %vm329_vm1, %v3634_v2 }
 0x378   : > { %v3074_v62 = vpop.f32.mrf.mxu2 }
 0x379   : > { %v6285_v14 = vadd.f32 %v3074_v62, %v2954_v45  ;;  %v2911_v13 = vpop.f32.mrf.mxu1  ;;  %v3228_v45 = vpop.f32.mrf.mxu3  ;;  %v3643_v62 = vld [vmem:[#allocation2 + $0x85] sm:$0xff] }
 0x37a   : > { %v2955_v29 = vadd.f32 %v2911_v13, %v6175_v39 }
 0x37c   : > { %4587 = vmatmul.msk.f32.gmra.mxu1 %vm329_vm1, %v3469_v38  ;;  %v3394_v38 = vpop.f32.mrf.mxu0 }
 0x37d   : > { %4607 = vmatmul.msk.f32.gmra.mxu2 %vm329_vm1, %v3635_v23 }
 0x380   : > { %v3077_v4 = vpop.f32.mrf.mxu2 }
 0x381   : > { %v6290_v17 = vadd.f32 %v3077_v4, %v2955_v29  ;;  %v2914_v47 = vpop.f32.mrf.mxu1  ;;  %v3478_v4 = vld [vmem:[#allocation2 + $0x8c] sm:$0xff] }
 0x382   : > { %v2956_v22 = vadd.f32 %v2914_v47, %v6182_v7  ;;  %v3644_v47 = vld [vmem:[#allocation2 + $0x8d] sm:$0xff] }
 0x384   : > { %4588 = vmatmul.msk.f32.gmra.mxu1 %vm329_vm1, %v3470_v42 }
 0x385   : > { %4608 = vmatmul.msk.f32.gmra.mxu2 %vm329_vm1, %v3636_v27 }
 0x388   : > { %v3080_v28 = vpop.f32.mrf.mxu2 }
 0x389   : > { %v6295_v35 = vadd.f32 %v3080_v28, %v2956_v22  ;;  %v2917_v40 = vpop.f32.mrf.mxu1 }
 0x38a   : > { %v2957_v39 = vadd.f32 %v2917_v40, %v6189_v19  ;;  %v3397_v40 = vpop.f32.mrf.mxu0 }
 0x38c   : > { %4589 = vmatmul.msk.f32.gmra.mxu1 %vm329_vm1, %v3471_v16  ;;  %v3479_v16 = vld [vmem:[#allocation2 + $0x94] sm:$0xff] }
 0x38d   : > { %4609 = vmatmul.msk.f32.gmra.mxu2 %vm329_vm1, %v3637_v32  ;;  %v3645_v32 = vld [vmem:[#allocation2 + $0x95] sm:$0xff] }
 0x390   : > { %v3083_v48 = vpop.f32.mrf.mxu2 }
 0x391   : > { %v6300_v61 = vadd.f32 %v3083_v48, %v2957_v39  ;;  %v2920_v46 = vpop.f32.mrf.mxu1 }
 0x392   : > { %v2958_v7 = vadd.f32 %v2920_v46, %v6196_v63 }
 0x394   : > { %4590 = vmatmul.msk.f32.gmra.mxu1 %vm329_vm1, %v3472_v41 }
 0x395   : > { %4610 = vmatmul.msk.f32.gmra.mxu2 %vm329_vm1, %v3638_v9  ;;  %v3480_v9 = vld [vmem:[#allocation2 + $0x9c] sm:$0xff] }
 0x398   : > { %v3086_v12 = vpop.f32.mrf.mxu2 }
 0x399   : > { %v6305_v54 = vadd.f32 %v3086_v12, %v2958_v7  ;;  %v2923_v6 = vpop.f32.mrf.mxu1  ;;  %v3646_v7 = vld [vmem:[#allocation2 + $0x9d] sm:$0xff] }
 0x39a   : > { %v2959_v19 = vadd.f32 %v2923_v6, %v6203_v53 }
 0x39c   : > { %4591 = vmatmul.msk.f32.gmra.mxu1 %vm329_vm1, %v3473_v20 }
 0x39d   : > { %4611 = vmatmul.msk.f32.gmra.mxu2 %vm329_vm1, %v3639_v11 }
 0x3a0   : > { %v3089_v43 = vpop.f32.mrf.mxu2 }
 0x3a1   : > { %v6310_v50 = vadd.f32 %v3089_v43, %v2959_v19  ;;  %v2926_v33 = vpop.f32.mrf.mxu1  ;;  %v3481_v43 = vld [vmem:[#allocation2 + $0xa4] sm:$0xff] }
 0x3a2   : > { %v2960_v63 = vadd.f32 %v2926_v33, %v6210_v30  ;;  %v3642_v30 = vld [vmem:[#allocation2 + $0x7d] sm:$0xff]  ;;  %v3647_v33 = vld [vmem:[#allocation2 + $0xa5] sm:$0xff] }
 0x3a4   : > { %4592 = vmatmul.msk.f32.gmra.mxu1 %vm329_vm1, %v3474_v36 }
 0x3a5   : > { %4612 = vmatmul.msk.f32.gmra.mxu2 %vm329_vm1, %v3640_v0  ;;  %v3282_v0 = vadd.f32 %v3228_v45, %v6259_v49  ;;  %v3649_v45 = vld [vmem:[#allocation2 + $0xb5] sm:$0xff] }
 0x3a8   : > { %v3092_v44 = vpop.f32.mrf.mxu2 }
 0x3a9   : > { %v6315_v51 = vadd.f32 %v3092_v44, %v2960_v63  ;;  %v2929_v60 = vpop.f32.mrf.mxu1 }
 0x3aa   : > { %v2961_v53 = vadd.f32 %v2929_v60, %v6217_v52  ;;  %v3477_v52 = vld [vmem:[#allocation2 + $0x84] sm:$0xff] }
 0x3ac   : > { %4593 = vmatmul.msk.f32.gmra.mxu1 %vm329_vm1, %v3475_v5  ;;  %v3482_v5 = vld [vmem:[#allocation2 + $0xac] sm:$0xff] }
 0x3ad   : > { %4613 = vmatmul.msk.f32.gmra.mxu2 %vm329_vm1, %v3641_v10  ;;  %v3448_v10 = vadd.f32 %v3394_v38, %v3282_v0  ;;  %v4625_v0 = vld [vmem:[%s4828_s15 + $0x42] sm:$0xff] }
 0x3b0   : > { %v3095_v31 = vpop.f32.mrf.mxu2 }
 0x3b1   : > { %v6320_v57 = vadd.f32 %v3095_v31, %v2961_v53  ;;  %v2932_v58 = vpop.f32.mrf.mxu1  ;;  %v6360_v31 = vld [vmem:[%s6478_s5] ss:$0 sm:$0xff] }
 0x3b2   : > { %v2962_v56 = vadd.f32 %v2932_v58, %v6224_v18 }
 0x3b4   : > { %4594 = vmatmul.msk.f32.gmra.mxu1 %vm329_vm1, %v3476_v26 }
 0x3b5   : > { %4614 = vmatmul.msk.f32.gmra.mxu2 %vm329_vm1, %v3642_v30  ;;  %v4622_v30 = vld [vmem:[%s4828_s15 + $0x2a] sm:$0xff] }
 0x3b8   : > { %v3098_v8 = vpop.f32.mrf.mxu2 }
 0x3b9   : > { %v6325_v55 = vadd.f32 %v3098_v8, %v2962_v56  ;;  %v2935_v37 = vpop.f32.mrf.mxu1 }
 0x3ba   : > { %v2963_v2 = vadd.f32 %v2935_v37, %v6231_v15  ;;  %v3231_v15 = vpop.f32.mrf.mxu3 }
 0x3bb   : > { %v3283_v58 = vadd.f32 %v3231_v15, %v6268_v1 }
 0x3bc   : > { %4595 = vmatmul.msk.f32.gmra.mxu1 %vm329_vm1, %v3477_v52 }
 0x3bd   : > { %4615 = vmatmul.msk.f32.gmra.mxu2 %vm329_vm1, %v3643_v62  ;;  %v3449_v62 = vadd.f32 %v3397_v40, %v3283_v58 }
 0x3c0   : > { %v3101_v18 = vpop.f32.mrf.mxu2 }
 0x3c1   : > { %v6330_v13 = vadd.f32 %v3101_v18, %v2963_v2  ;;  %v2938_v23 = vpop.f32.mrf.mxu1  ;;  %v3483_v2 = vld [vmem:[#allocation2 + $0xb4] sm:$0xff] }
 0x3c2   : > { %v2964_v29 = vadd.f32 %v2938_v23, %v6238_v21  ;;  %v3234_v21 = vpop.f32.mrf.mxu3 }
 0x3c4   : > { %4596 = vmatmul.msk.f32.gmra.mxu1 %vm329_vm1, %v3478_v4 }
 0x3c5   : > { %4616 = vmatmul.msk.f32.gmra.mxu2 %vm329_vm1, %v3644_v47  ;;  %v4623_v47 = vld [vmem:[%s4828_s15 + $0x32] sm:$0xff] }
 0x3c8   : > { %v3104_v42 = vpop.f32.mrf.mxu2 }
 0x3c9   : > { %v6335_v27 = vadd.f32 %v3104_v42, %v2964_v29  ;;  %v2941_v22 = vpop.f32.mrf.mxu1  ;;  %v3284_v29 = vadd.f32 %v3234_v21, %v6275_v59  ;;  %v4624_v21 = vld [vmem:[%s4828_s15 + $0x3a] sm:$0xff] }
 0x3ca   : > { %v2965_v28 = vadd.f32 %v2941_v22, %v6245_v3  ;;  %v3400_v3 = vpop.f32.mrf.mxu0  ;;  %v3237_v20 = vpop.f32.mrf.mxu3 }
 0x3cb   : > { %v3450_v40 = vadd.f32 %v3400_v3, %v3284_v29 }
 0x3cc   : > { %4597 = vmatmul.msk.f32.gmra.mxu1 %vm329_vm1, %v3479_v16 }
 0x3cd   : > { %4617 = vmatmul.msk.f32.gmra.mxu2 %vm329_vm1, %v3645_v32 }
 0x3d0   : > { %v3107_v39 = vpop.f32.mrf.mxu2 }
 0x3d1   : > { %v6340_v48 = vadd.f32 %v3107_v39, %v2965_v28  ;;  %v2944_v46 = vpop.f32.mrf.mxu1 }
 0x3d2   : > { %v2966_v41 = vadd.f32 %v2944_v46, %v6252_v24  ;;  %v3403_v24 = vpop.f32.mrf.mxu0  ;;  %v3240_v60 = vpop.f32.mrf.mxu3 }
 0x3d4   : > { %4598 = vmatmul.msk.f32.gmra.mxu1 %vm329_vm1, %v3480_v9 }
 0x3d5   : > { %4618 = vmatmul.msk.f32.gmra.mxu2 %vm329_vm1, %v3646_v7 }
 0x3d8   : > { %v3110_v12 = vpop.f32.mrf.mxu2 }
 0x3d9   : > { %v6345_v6 = vadd.f32 %v3110_v12, %v2966_v41  ;;  %v2947_v11 = vpop.f32.mrf.mxu1  ;;  %v3285_v41 = vadd.f32 %v3237_v20, %v6280_v34 }
 0x3da   : > { %v2967_v19 = vadd.f32 %v2947_v11, %v6261_v25  ;;  %v3648_v25 = vld [vmem:[#allocation2 + $0xad] sm:$0xff]  ;;  %v3406_v26 = vpop.f32.mrf.mxu0  ;;  %v3243_v18 = vpop.f32.mrf.mxu3 }
 0x3db   : > { %v3451_v11 = vadd.f32 %v3403_v24, %v3285_v41 }
 0x3dc   : > { %4599 = vmatmul.msk.f32.gmra.mxu1 %vm329_vm1, %v3481_v43 }
 0x3dd   : > { %4619 = vmatmul.msk.f32.gmra.mxu2 %vm329_vm1, %v3647_v33 }
 0x3e0   : > { %v3113_v36 = vpop.f32.mrf.mxu2 }
 0x3e1   : > { %v6352_v63 = vadd.f32 %v3113_v36, %v2967_v19  ;;  %v3560_v44 = vpop.f32.mrf.mxu1  ;;  %v3286_v36 = vadd.f32 %v3240_v60, %v6285_v14  ;;  %v4626_v60 = vld [vmem:[%s4828_s15 + $0x4a] sm:$0xff] }
 0x3e2   : > { %v3614_v53 = vadd.f32 %v3560_v44, %v3448_v10  ;;  %v3409_v22 = vpop.f32.mrf.mxu0  ;;  %v3246_v39 = vpop.f32.mrf.mxu3 }
 0x3e3   : > { %v3452_v10 = vadd.f32 %v3406_v26, %v3286_v36 }
 0x3e4   : > { %4600 = vmatmul.msk.f32.gmra.mxu1 %vm329_vm1, %v3482_v5 }
 0x3e5   : > { %4620 = vmatmul.msk.f32.gmra.mxu2 %vm329_vm1, %v3648_v25 }
 0x3e8   : > { %v3726_v49 = vpop.f32.mrf.mxu2 }
 0x3e9   : > { %v3780_v56 = vadd.f32 %v3726_v49, %v3614_v53  ;;  %v3563_v8 = vpop.f32.mrf.mxu1 }
 0x3ea   : > { %v3615_v38 = vadd.f32 %v3563_v8, %v3449_v62  ;;  %v3412_v19 = vpop.f32.mrf.mxu0  ;;  %v3249_v20 = vpop.f32.mrf.mxu3 }
 0x3eb   : > { %v3820_v37 = vadd.f32 %v6360_v31, %v3780_v56  ;;  %v3287_v56 = vadd.f32 %v3243_v18, %v6290_v17 }
 0x3ec   : > { %4601 = vmatmul.msk.f32.gmra.mxu1 %vm329_vm1, %v3483_v2 }
 0x3ed   : > { %v3838_v52 = vadd.f32 %v4622_v30, %v3820_v37  ;;  %4621 = vmatmul.msk.f32.gmra.mxu2 %vm329_vm1, %v3649_v45  ;;  %v3453_v45 = vadd.f32 %v3409_v22, %v3287_v56 }
 0x3ef   : > { %v3856_v1 = vmax.f32 %v3838_v52, 0.0 }
 0x3f0   : > { %v3729_v23 = vpop.f32.mrf.mxu2 }
 0x3f1   : > { %3874 = vst.msk [vmem:[%s6370_s11] sm:$0xff] %vm329_vm1, %v3856_v1  ;;  %v3781_v4 = vadd.f32 %v3729_v23, %v3615_v38  ;;  %v3566_v15 = vpop.f32.mrf.mxu1  ;;  %v3288_v1 = vadd.f32 %v3246_v39, %v6295_v35  ;;  %v4627_v38 = vld [vmem:[%s4828_s15 + $0x52] sm:$0xff] }
 0x3f2   : > { %v3616_v32 = vadd.f32 %v3566_v15, %v3450_v40  ;;  %v3415_v49 = vpop.f32.mrf.mxu0  ;;  %v3252_v37 = vpop.f32.mrf.mxu3  ;;  %v3289_v40 = vadd.f32 %v3249_v20, %v6300_v61 }
 0x3f3   : > { %v3821_v42 = vadd.f32 %v6360_v31, %v3781_v4 }
 0x3f5   : > { %v3839_v28 = vadd.f32 %v4623_v47, %v3821_v42  ;;  %v3454_v47 = vadd.f32 %v3412_v19, %v3288_v1  ;;  %v4629_v19 = vld [vmem:[%s4828_s15 + $0x62] sm:$0xff] }
 0x3f7   : > { %v3857_v16 = vmax.f32 %v3839_v28, 0.0 }
 0x3f8   : > { %v3732_v46 = vpop.f32.mrf.mxu2 }
 0x3f9   : > { %3875 = vst.msk [vmem:[%s6370_s11 + $0x8] sm:$0xff] %vm329_vm1, %v3857_v16  ;;  %v3782_v59 = vadd.f32 %v3732_v46, %v3616_v32  ;;  %v3569_v9 = vpop.f32.mrf.mxu1  ;;  %v4628_v16 = vld [vmem:[%s4828_s15 + $0x5a] sm:$0xff] }
 0x3fa   : > { %v3617_v3 = vadd.f32 %v3569_v9, %v3451_v11  ;;  %v3418_v18 = vpop.f32.mrf.mxu0  ;;  %v3255_v15 = vpop.f32.mrf.mxu3  ;;  %v3290_v11 = vadd.f32 %v3252_v37, %v6305_v54  ;;  %v4631_v37 = vld [vmem:[%s4828_s15 + $0x72] sm:$0xff] }
 0x3fb   : > { %v3822_v7 = vadd.f32 %v6360_v31, %v3782_v59  ;;  %v3455_v59 = vadd.f32 %v3415_v49, %v3289_v40 }
 0x3fc   : > { %v3456_v36 = vadd.f32 %v3418_v18, %v3290_v11 }
 0x3fd   : > { %v3840_v12 = vadd.f32 %v4624_v21, %v3822_v7 }
 0x3ff   : > { %v3858_v43 = vmax.f32 %v3840_v12, 0.0 }
 0x400   : > { %v3735_v33 = vpop.f32.mrf.mxu2 }
 0x401   : > { %3876 = vst.msk [vmem:[%s6370_s11 + $0x10] sm:$0xff] %vm329_vm1, %v3858_v43  ;;  %v3783_v34 = vadd.f32 %v3735_v33, %v3617_v3  ;;  %v3572_v44 = vpop.f32.mrf.mxu1 }
 0x402   : > { %v3618_v24 = vadd.f32 %v3572_v44, %v3452_v10  ;;  %v3421_v46 = vpop.f32.mrf.mxu0  ;;  %v3258_v7 = vpop.f32.mrf.mxu3  ;;  %v4630_v10 = vld [vmem:[%s4828_s15 + $0x6a] sm:$0xff] }
 0x403   : > { %v3823_v5 = vadd.f32 %v6360_v31, %v3783_v34 }
 0x405   : > { %v3841_v25 = vadd.f32 %v4625_v0, %v3823_v5  ;;  %v3291_v5 = vadd.f32 %v3255_v15, %v6310_v50 }
 0x407   : > { %v3859_v53 = vmax.f32 %v3841_v25, 0.0 }
 0x408   : > { %v3738_v58 = vpop.f32.mrf.mxu2 }
 0x409   : > { %3877 = vst.msk [vmem:[%s6370_s11 + $0x18] sm:$0xff] %vm329_vm1, %v3859_v53  ;;  %v3784_v14 = vadd.f32 %v3738_v58, %v3618_v24  ;;  %v3575_v30 = vpop.f32.mrf.mxu1  ;;  %v3457_v58 = vadd.f32 %v3421_v46, %v3291_v5 }
 0x40a   : > { %v3619_v26 = vadd.f32 %v3575_v30, %v3453_v45  ;;  %v3424_v34 = vpop.f32.mrf.mxu0  ;;  %v3261_v25 = vpop.f32.mrf.mxu3 }
 0x40b   : > { %v3824_v8 = vadd.f32 %v6360_v31, %v3784_v14 }
 0x40d   : > { %v3842_v2 = vadd.f32 %v4626_v60, %v3824_v8  ;;  %v3292_v8 = vadd.f32 %v3258_v7, %v6315_v51 }
 0x40f   : > { %v3860_v52 = vmax.f32 %v3842_v2, 0.0 }
 0x410   : > { %v3741_v62 = vpop.f32.mrf.mxu2 }
 0x411   : > { %3878 = vst.msk [vmem:[%s6370_s11 + $0x20] sm:$0xff] %vm329_vm1, %v3860_v52  ;;  %v3785_v17 = vadd.f32 %v3741_v62, %v3619_v26  ;;  %v3578_v23 = vpop.f32.mrf.mxu1  ;;  %v3458_v62 = vadd.f32 %v3424_v34, %v3292_v8  ;;  %v4636_v8 = vld [vmem:[%s4828_s15 + $0x9a] sm:$0xff] }
 0x412   : > { %v3620_v22 = vadd.f32 %v3578_v23, %v3454_v47  ;;  %v3427_v60 = vpop.f32.mrf.mxu0  ;;  %v3264_v52 = vpop.f32.mrf.mxu3 }
 0x413   : > { %v3825_v29 = vadd.f32 %v6360_v31, %v3785_v17 }
 0x415   : > { %v3843_v4 = vadd.f32 %v4627_v38, %v3825_v29  ;;  %v3293_v38 = vadd.f32 %v3261_v25, %v6320_v57  ;;  %v4632_v29 = vld [vmem:[%s4828_s15 + $0x7a] sm:$0xff]  ;;  %v4635_v25 = vld [vmem:[%s4828_s15 + $0x92] sm:$0xff] }
 0x417   : > { %v3861_v42 = vmax.f32 %v3843_v4, 0.0 }
 0x418   : > { %v3744_v28 = vpop.f32.mrf.mxu2 }
 0x419   : > { %3879 = vst.msk [vmem:[%s6370_s11 + $0x28] sm:$0xff] %vm329_vm1, %v3861_v42  ;;  %v3786_v35 = vadd.f32 %v3744_v28, %v3620_v22  ;;  %v3581_v32 = vpop.f32.mrf.mxu1  ;;  %v3459_v42 = vadd.f32 %v3427_v60, %v3293_v38  ;;  %v4637_v38 = vld [vmem:[%s4828_s15 + $0xa2] sm:$0xff] }
 0x41a   : > { %v3621_v9 = vadd.f32 %v3581_v32, %v3455_v59  ;;  %v3430_v23 = vpop.f32.mrf.mxu0  ;;  %v3267_v22 = vpop.f32.mrf.mxu3  ;;  %v4633_v32 = vld [vmem:[%s4828_s15 + $0x82] sm:$0xff] }
 0x41b   : > { %v3826_v39 = vadd.f32 %v6360_v31, %v3786_v35 }
 0x41d   : > { %v3844_v41 = vadd.f32 %v4628_v16, %v3826_v39  ;;  %v3294_v16 = vadd.f32 %v3264_v52, %v6325_v55 }
 0x41f   : > { %v3862_v21 = vmax.f32 %v3844_v41, 0.0 }
 0x420   : > { %v3747_v12 = vpop.f32.mrf.mxu2 }
 0x421   : > { %3880 = vst.msk [vmem:[%s6370_s11 + $0x30] sm:$0xff] %vm329_vm1, %v3862_v21  ;;  %v3787_v61 = vadd.f32 %v3747_v12, %v3621_v9  ;;  %v3584_v43 = vpop.f32.mrf.mxu1  ;;  %v3460_v21 = vadd.f32 %v3430_v23, %v3294_v16 }
 0x422   : > { %v3622_v0 = vadd.f32 %v3584_v43, %v3456_v36  ;;  %v3433_v41 = vpop.f32.mrf.mxu0  ;;  %v3270_v12 = vpop.f32.mrf.mxu3 }
 0x423   : > { %v3827_v3 = vadd.f32 %v6360_v31, %v3787_v61  ;;  %v3295_v61 = vadd.f32 %v3267_v22, %v6330_v13  ;;  %v3296_v5 = vadd.f32 %v3270_v12, %v6335_v27 }
 0x425   : > { %v3845_v33 = vadd.f32 %v4629_v19, %v3827_v3  ;;  %v4634_v19 = vld [vmem:[%s4828_s15 + $0x8a] sm:$0xff]  ;;  %v3461_v36 = vadd.f32 %v3433_v41, %v3295_v61 }
 0x427   : > { %v3863_v20 = vmax.f32 %v3845_v33, 0.0 }
 0x428   : > { %v3750_v44 = vpop.f32.mrf.mxu2 }
 0x429   : > { %3881 = vst.msk [vmem:[%s6370_s11 + $0x38] sm:$0xff] %vm329_vm1, %v3863_v20  ;;  %v3788_v54 = vadd.f32 %v3750_v44, %v3622_v0  ;;  %v3587_v53 = vpop.f32.mrf.mxu1 }
 0x42a   : > { %v3623_v14 = vadd.f32 %v3587_v53, %v3457_v58  ;;  %v3436_v34 = vpop.f32.mrf.mxu0 }
 0x42b   : > { %v3828_v24 = vadd.f32 %v6360_v31, %v3788_v54  ;;  %v3273_v54 = vpop.f32.mrf.mxu3 }
 0x42d   : > { %v3846_v49 = vadd.f32 %v4630_v10, %v3828_v24 }
 0x42f   : > { %v3864_v56 = vmax.f32 %v3846_v49, 0.0  ;;  %v3462_v49 = vadd.f32 %v3436_v34, %v3296_v5 }
 0x430   : > { %v3753_v30 = vpop.f32.mrf.mxu2 }
 0x431   : > { %3882 = vst.msk [vmem:[%s6370_s11 + $0x40] sm:$0xff] %vm329_vm1, %v3864_v56  ;;  %v3789_v50 = vadd.f32 %v3753_v30, %v3623_v14  ;;  %v3590_v2 = vpop.f32.mrf.mxu1  ;;  %v3297_v30 = vadd.f32 %v3273_v54, %v6340_v48 }
 0x432   : > { %v3624_v17 = vadd.f32 %v3590_v2, %v3458_v62  ;;  %v3439_v14 = vpop.f32.mrf.mxu0 }
 0x433   : > { %v3829_v45 = vadd.f32 %v6360_v31, %v3789_v50  ;;  %v3276_v2 = vpop.f32.mrf.mxu3  ;;  %v3463_v52 = vadd.f32 %v3439_v14, %v3297_v30 }
 0x435   : > { %v3847_v26 = vadd.f32 %v4631_v37, %v3829_v45 }
 0x437   : > { %v3865_v1 = vmax.f32 %v3847_v26, 0.0 }
 0x438   : > { %v3756_v18 = vpop.f32.mrf.mxu2 }
 0x439   : > { %3883 = vst.msk [vmem:[%s6370_s11 + $0x48] sm:$0xff] %vm329_vm1, %v3865_v1  ;;  %v3790_v51 = vadd.f32 %v3756_v18, %v3624_v17  ;;  %v3593_v4 = vpop.f32.mrf.mxu1  ;;  %v3298_v17 = vadd.f32 %v3276_v2, %v6345_v6 }
 0x43a   : > { %v3625_v40 = vadd.f32 %v3593_v4, %v3459_v42  ;;  %v3442_v18 = vpop.f32.mrf.mxu0 }
 0x43b   : > { %v3830_v47 = vadd.f32 %v6360_v31, %v3790_v51  ;;  %v3464_v4 = vadd.f32 %v3442_v18, %v3298_v17 }
 0x43d   : > { %v3848_v15 = vadd.f32 %v4632_v29, %v3830_v47  ;;  %v3279_v47 = vpop.f32.mrf.mxu3 }
 0x43f   : > { %v3866_v28 = vmax.f32 %v3848_v15, 0.0 }
 0x440   : > { %v3759_v35 = vpop.f32.mrf.mxu2 }
 0x441   : > { %3884 = vst.msk [vmem:[%s6370_s11 + $0x50] sm:$0xff] %vm329_vm1, %v3866_v28  ;;  %v3791_v57 = vadd.f32 %v3759_v35, %v3625_v40  ;;  %v3596_v39 = vpop.f32.mrf.mxu1  ;;  %v3299_v28 = vadd.f32 %v3279_v47, %v6352_v63  ;;  %v4638_v40 = vld [vmem:[%s4828_s15 + $0xaa] sm:$0xff] }
 0x442   : > { %v3626_v7 = vadd.f32 %v3596_v39, %v3460_v21  ;;  %v3445_v16 = vpop.f32.mrf.mxu0 }
 0x443   : > { %v3831_v46 = vadd.f32 %v6360_v31, %v3791_v57  ;;  %v3465_v39 = vadd.f32 %v3445_v16, %v3299_v28 }
 0x445   : > { %v3849_v59 = vadd.f32 %v4633_v32, %v3831_v46 }
 0x447   : > { %v3867_v9 = vmax.f32 %v3849_v59, 0.0 }
 0x448   : > { %v3762_v11 = vpop.f32.mrf.mxu2 }
 0x449   : > { %3885 = vst.msk [vmem:[%s6370_s11 + $0x58] sm:$0xff] %vm329_vm1, %v3867_v9  ;;  %v3792_v55 = vadd.f32 %v3762_v11, %v3626_v7  ;;  %v3599_v43 = vpop.f32.mrf.mxu1  ;;  %v4639_v9 = vld [vmem:[%s4828_s15 + $0xb2] sm:$0xff] }
 0x44a   : > { %v3627_v0 = vadd.f32 %v3599_v43, %v3461_v36 }
 0x44b   : > { %v3832_v3 = vadd.f32 %v6360_v31, %v3792_v55 }
 0x44d   : > { %v3850_v33 = vadd.f32 %v4634_v19, %v3832_v3 }
 0x44f   : > { %v3868_v20 = vmax.f32 %v3850_v33, 0.0 }
 0x450   : > { %v3765_v44 = vpop.f32.mrf.mxu2 }
 0x451   : > { %3886 = vst.msk [vmem:[%s6370_s11 + $0x60] sm:$0xff] %vm329_vm1, %v3868_v20  ;;  %v3793_v13 = vadd.f32 %v3765_v44, %v3627_v0  ;;  %v3602_v10 = vpop.f32.mrf.mxu1 }
 0x452   : > { %v3628_v56 = vadd.f32 %v3602_v10, %v3462_v49 }
 0x453   : > { %v3833_v53 = vadd.f32 %v6360_v31, %v3793_v13 }
 0x455   : > { %v3851_v24 = vadd.f32 %v4635_v25, %v3833_v53 }
 0x457   : > { %v3869_v58 = vmax.f32 %v3851_v24, 0.0 }
 0x458   : > { %v3768_v60 = vpop.f32.mrf.mxu2 }
 0x459   : > { %3887 = vst.msk [vmem:[%s6370_s11 + $0x68] sm:$0xff] %vm329_vm1, %v3869_v58  ;;  %v3794_v27 = vadd.f32 %v3768_v60, %v3628_v56  ;;  %v3605_v50 = vpop.f32.mrf.mxu1 }
 0x45a   : > { %v3629_v62 = vadd.f32 %v3605_v50, %v3463_v52 }
 0x45b   : > { %v3834_v37 = vadd.f32 %v6360_v31, %v3794_v27 }
 0x45d   : > { %v3852_v45 = vadd.f32 %v4636_v8, %v3834_v37 }
 0x45f   : > { %v3870_v26 = vmax.f32 %v3852_v45, 0.0 }
 0x460   : > { %v3771_v1 = vpop.f32.mrf.mxu2 }
 0x461   : > { %3888 = vst.msk [vmem:[%s6370_s11 + $0x70] sm:$0xff] %vm329_vm1, %v3870_v26  ;;  %v3795_v48 = vadd.f32 %v3771_v1, %v3629_v62  ;;  %v3608_v51 = vpop.f32.mrf.mxu1 }
 0x462   : > { %v3630_v42 = vadd.f32 %v3608_v51, %v3464_v4 }
 0x463   : > { %v3835_v23 = vadd.f32 %v6360_v31, %v3795_v48 }
 0x465   : > { %v3853_v29 = vadd.f32 %v4637_v38, %v3835_v23 }
 0x467   : > { %v3871_v15 = vmax.f32 %v3853_v29, 0.0 }
 0x468   : > { %v3774_v22 = vpop.f32.mrf.mxu2 }
 0x469   : > { %3889 = vst.msk [vmem:[%s6370_s11 + $0x78] sm:$0xff] %vm329_vm1, %v3871_v15  ;;  %v3796_v6 = vadd.f32 %v3774_v22, %v3630_v42  ;;  %v3611_v57 = vpop.f32.mrf.mxu1 }
 0x46a   : > { %v3631_v41 = vadd.f32 %v3611_v57, %v3465_v39 }
 0x46b   : > { %v3836_v35 = vadd.f32 %v6360_v31, %v3796_v6 }
 0x46d   : > { %v3854_v32 = vadd.f32 %v4638_v40, %v3836_v35 }
 0x46f   : > { %v3872_v46 = vmax.f32 %v3854_v32, 0.0 }
 0x470   : > { %v3777_v59 = vpop.f32.mrf.mxu2 }
 0x471   : > { %3890 = vst.msk [vmem:[%s6370_s11 + $0x80] sm:$0xff] %vm329_vm1, %v3872_v46  ;;  %v3797_v21 = vadd.f32 %v3777_v59, %v3631_v41 }
 0x473   : > { %v3837_v63 = vadd.f32 %v6360_v31, %v3797_v21 }
 0x475   : > { %v3855_v7 = vadd.f32 %v4639_v9, %v3837_v63 }
 0x477   : > { %v3873_v12 = vmax.f32 %v3855_v7, 0.0 }
 0x479   : > { %3891 = vst.msk [vmem:[%s6370_s11 + $0x88] sm:$0xff] %vm329_vm1, %v3873_v12 }
 0x47a PF: > { %s16_s25 = sadd.s32 1, %s4733_s25   ;;  %s6636_s21 = smov %s4725_s23 }
 0x47b   : > { %p13_p7 = scmp.ge.s32.totalorder %s16_s25, 6   ;;  %s6637_s22 = smov %s4729_s24 }
 0x47c   : > { %s6638_s23 = smov %s6641_s26  ;;  %s6639_s24 = smov %s6645_s27 }
 0x47d   :  { %15 = sbr.rel (!%p13_p7) target bundleno = 3 (0x3), region = 100 }

</bundles_post_ra>
